<compile_context>
chip_gen: v6e
topology: v6e:2x2x1
jax: 0.10.0
libtpu: 0.0.40
codegen_flags: <defaults>
</compile_context>

<pallas_src>
import functools
import math

import numpy as np
import jax
import jax.numpy as jnp
from jax import lax
from jax.experimental import pallas as pl
from jax.experimental.pallas import tpu as pltpu

EPS = 1e-5  # nn.InstanceNorm2d default eps


# ----------------------------------------------------------------------------
# Fused per-layer Pallas kernel
# ----------------------------------------------------------------------------
def _layer_kernel(n_phases, norm, act, has_inject, *refs):
    """One UNet layer for one batch element.

    pat_ref : [1, n_phases, CK, P]   bf16 im2col patches (per phase for ConvT)
    w_ref   : [n_phases, Cout, CK]   bf16 weight matrices
    zpat_ref: [1, CKz, Pz]           bf16 inject-conv patches of z       (if inject)
    wz_ref  : [Cout, CKz]            bf16 inject-conv weights            (if inject)
    pool_ref: [Pz, n_phases*P]       f32 AvgPool (+phase reorder) matrix (if inject)
    o_ref   : [1, Cout, n_phases*P]  output (bf16 for hidden layers, f32 for last)
    """
    if has_inject:
        pat_ref, w_ref, zpat_ref, wz_ref, pool_ref, o_ref = refs
    else:
        pat_ref, w_ref, o_ref = refs

    # --- main conv: per-phase matmul on the MXU, f32 accumulation -------------
    ys = [jnp.dot(w_ref[p], pat_ref[0, p], preferred_element_type=jnp.float32)
          for p in range(n_phases)]
    hw = ys[0].shape[-1]

    if norm:
        # single-pass InstanceNorm over the full spatial extent (all phases jointly)
        s1 = sum(jnp.sum(y, axis=-1, keepdims=True) for y in ys)
        s2 = sum(jnp.sum(y * y, axis=-1, keepdims=True) for y in ys)
        inv_n = 1.0 / (n_phases * hw)
        mean = s1 * inv_n
        var = jnp.maximum(s2 * inv_n - mean * mean, 0.0)
        rstd = lax.rsqrt(var + EPS)
        ys = [(y - mean) * rstd for y in ys]

    if act == 'relu':
        ys = [jnp.maximum(y, 0.0) for y in ys]
    elif act == 'sigmoid':
        ys = [jax.nn.sigmoid(y) for y in ys]   # lowers to logistic on the EUP

    if has_inject:
        # inject branch: conv(z) -> InstanceNorm -> AvgPool (matmul) -> ReLU -> gate
        yz = jnp.dot(wz_ref[...], zpat_ref[0], preferred_element_type=jnp.float32)
        m = jnp.mean(yz, axis=-1, keepdims=True)
        v = jnp.maximum(jnp.mean(yz * yz, axis=-1, keepdims=True) - m * m, 0.0)
        yz = (yz - m) * lax.rsqrt(v + EPS)
        a = jnp.maximum(
            jnp.dot(yz, pool_ref[...], preferred_element_type=jnp.float32), 0.0)
        ys = [y * a[:, p * hw:(p + 1) * hw] for p, y in enumerate(ys)]

    if n_phases == 1:
        o_ref[0] = ys[0].astype(o_ref.dtype)
    else:
        for p, y in enumerate(ys):
            o_ref[0, :, p * hw:(p + 1) * hw] = y.astype(o_ref.dtype)


def fused_layer(pat, w, norm, act, inject=None, out_dtype=jnp.float32):
    """pat: [B, n_phases, CK, P] bf16, w: [n_phases, Cout, CK] bf16.
    inject: optional (zpat [B,CKz,Pz] bf16, wz [Cout,CKz] bf16, pool [Pz, n_phases*P] f32).
    Returns [B, Cout, n_phases*P] in `out_dtype`."""
    B, n_phases, CK, P = pat.shape
    Cout = w.shape[1]
    Pout = n_phases * P
    has_inject = inject is not None
    kern = functools.partial(_layer_kernel, n_phases, norm, act, has_inject)

    in_specs = [
        pl.BlockSpec((1, n_phases, CK, P), lambda b: (b, 0, 0, 0)),
        pl.BlockSpec((n_phases, Cout, CK), lambda b: (0, 0, 0)),
    ]
    args = [pat, w]
    if has_inject:
        zpat, wz, pool = inject
        CKz, Pz = zpat.shape[1], zpat.shape[2]
        in_specs += [
            pl.BlockSpec((1, CKz, Pz), lambda b: (b, 0, 0)),
            pl.BlockSpec((Cout, CKz), lambda b: (0, 0)),
            pl.BlockSpec((Pz, Pout), lambda b: (0, 0)),
        ]
        args += [zpat, wz, pool]

    return pl.pallas_call(
        kern,
        out_shape=jax.ShapeDtypeStruct((B, Cout, Pout), out_dtype),
        grid=(B,),
        in_specs=in_specs,
        out_specs=pl.BlockSpec((1, Cout, Pout), lambda b: (b, 0, 0)),
        compiler_params=pltpu.CompilerParams(
            dimension_semantics=("parallel",)),   # shards batch across v7x's 2 TCs
    )(*args)


# ----------------------------------------------------------------------------
# Plain-JAX glue: padding + im2col tap extraction (layout plumbing only)
# ----------------------------------------------------------------------------
def _conv_patches(x, k, stride, pad, pad_mode='reflect'):
    """x: [B, C, H, W] -> (patches [B, C*k*k, Ho*Wo] in (ci, kh, kw) order, Ho, Wo)."""
    if pad > 0:
        x = jnp.pad(x, ((0, 0), (0, 0), (pad, pad), (pad, pad)), mode=pad_mode)
    B, C, Hp, Wp = x.shape
    Ho = (Hp - k) // stride + 1
    Wo = (Wp - k) // stride + 1
    cols = []
    for kh in range(k):
        for kw in range(k):
            cols.append(lax.slice(
                x, (0, 0, kh, kw),
                (B, C, kh + (Ho - 1) * stride + 1, kw + (Wo - 1) * stride + 1),
                (1, 1, stride, stride)))
    pat = jnp.stack(cols, axis=2).reshape(B, C * k * k, Ho * Wo)
    return pat, Ho, Wo


_CT_ROFF = ((0, 1), (1, 2))   # xp row/col offsets per output phase
_CT_KSEL = ((3, 1), (2, 0))   # matching ConvTranspose kernel taps per phase


def _convT_patches(x):
    """Sub-pixel patches for ConvTranspose2d(k=4, s=2, p=1).
    x: [B, C, H, W] -> ([B, 4, C*4, H*W], H, W); phase index = ph*2 + pw,
    output position of (phase, h, w) is (2h+ph, 2w+pw)."""
    xp = jnp.pad(x, ((0, 0), (0, 0), (1, 1), (1, 1)))   # zero pad
    B, C, Hp, Wp = xp.shape
    H, W = Hp - 2, Wp - 2
    phases = []
    for ph in range(2):
        for pw in range(2):
            cols = []
            for a in range(2):
                for b in range(2):
                    r0, c0 = _CT_ROFF[ph][a], _CT_ROFF[pw][b]
                    cols.append(lax.slice(xp, (0, 0, r0, c0), (B, C, r0 + H, c0 + W)))
            phases.append(jnp.stack(cols, axis=2).reshape(B, C * 4, H * W))
    return jnp.stack(phases, axis=1), H, W


def _pool_matrix(Hc, Wc, pool_k, pool_s, out_positions):
    """AvgPool2d(pool_k, pool_s, padding=1, count_include_pad=True) as a matrix
    [Hc*Wc, len(out_positions)].  out_positions gives, per output lane, the (oh, ow)
    coordinate in the pooled grid.  pool_k=None -> identity gather (no pooling)."""
    M = np.zeros((Hc * Wc, len(out_positions)), np.float32)
    for idx, (oh, ow) in enumerate(out_positions):
        if pool_k is None:
            M[oh * Wc + ow, idx] = 1.0
            continue
        inv = 1.0 / (pool_k * pool_k)
        for dh in range(pool_k):
            ih = oh * pool_s - 1 + dh
            if ih < 0 or ih >= Hc:
                continue
            for dw in range(pool_k):
                iw = ow * pool_s - 1 + dw
                if 0 <= iw < Wc:
                    M[ih * Wc + iw, idx] = inv
    return jnp.asarray(M)


# ----------------------------------------------------------------------------
# Parameters: PyTorch-layout init + one-time (outside jit) repack for the kernels
# ----------------------------------------------------------------------------
def init_params(g_layers, filter_size, key):
    D = (len(g_layers) - 3) // 2
    L = len(g_layers) - 1
    params = {}
    keys = jax.random.split(key, 2 * L)
    for i in range(L):
        if i == 0 or i == L - 1:
            shape = (g_layers[i + 1], g_layers[i], 3, 3)                      # Conv2d 3x3
        elif 0 < i < D + 1:
            shape = (g_layers[i + 1], g_layers[i], filter_size, filter_size)  # Conv2d 4x4 s2
        else:
            shape = (g_layers[i], g_layers[i + 1], filter_size, filter_size)  # ConvTranspose2d
        scale = 1.0 / math.sqrt(shape[1] * shape[2] * shape[3])
        params[f'layer{i}'] = scale * jax.random.normal(keys[2 * i], shape, jnp.float32)
        if 0 < i < L - 1:  # inject{i}
            ik = filter_size if i < 2 * D else 3
            ishape = (g_layers[i + 1], g_layers[0], ik, ik)
            iscale = 1.0 / math.sqrt(ishape[1] * ik * ik)
            params[f'inject{i}'] = iscale * jax.random.normal(keys[2 * i + 1], ishape, jnp.float32)
    return params


def prepare_params(params, g_layers, filter_size):
    """One-time reshape/cast of the PyTorch-layout weights into the MXU-friendly
    [n_phases, Cout, CK] bf16 matrices consumed by the kernels."""
    assert filter_size == 4, "sub-pixel ConvTranspose path assumes filter_size == 4"
    D = (len(g_layers) - 3) // 2
    L = len(g_layers) - 1
    prep = {}
    for i in range(L):
        w = params[f'layer{i}']
        if i == 0 or i == L - 1 or i < D + 1:
            # Conv2d weight [Cout, Cin, k, k] -> [1, Cout, Cin*k*k]
            prep[f'layer{i}'] = w.reshape(w.shape[0], -1)[None].astype(jnp.bfloat16)
        else:
            # ConvTranspose2d weight [Cin, Cout, 4, 4] -> [4, Cout, Cin*4] (phase-major)
            Cin, Cout = w.shape[0], w.shape[1]
            phases = []
            for ph in range(2):
                for pw in range(2):
                    sub = jnp.take(jnp.take(w, jnp.array(_CT_KSEL[ph]), axis=2),
                                   jnp.array(_CT_KSEL[pw]), axis=3)   # [Cin, Cout, 2, 2]
                    phases.append(jnp.transpose(sub, (1, 0, 2, 3)).reshape(Cout, Cin * 4))
            prep[f'layer{i}'] = jnp.stack(phases, 0).astype(jnp.bfloat16)
        if 0 < i < L - 1:
            wz = params[f'inject{i}']
            prep[f'inject{i}'] = wz.reshape(wz.shape[0], -1).astype(jnp.bfloat16)
    return prep


# ----------------------------------------------------------------------------
# Forward pass (mirrors UNet_1Poly.forward)
# ----------------------------------------------------------------------------
def forward(prep, x, g_layers, filter_size=4):
    D = (len(g_layers) - 3) // 2
    L = len(g_layers) - 1
    B = x.shape[0]
    # z = x.squeeze(3).squeeze(2): a no-op for H, W > 1, so the inject branches
    # consume the raw input tensor.
    z = x

    zcache = {}  # inject-conv patches of z are reused across layers

    def z_patches(k):
        if k not in zcache:
            pat, Hc, Wc = _conv_patches(z, k, 1, 1, 'reflect')
            zcache[k] = (pat.astype(jnp.bfloat16), Hc, Wc)
        return zcache[k]

    def inject_inputs(i, out_positions):
        if i < D + 1:
            pk, ps, kz = 2 ** i + 1, 2 ** i, filter_size
        elif i < 2 * D:
            pk, ps, kz = 2 ** (2 * D - i) + 1, 2 ** (2 * D - i), filter_size
        else:
            pk, ps, kz = None, None, 3   # conv3 inject, no pooling
        zpat, Hc, Wc = z_patches(kz)
        pool = _pool_matrix(Hc, Wc, pk, ps, out_positions)
        return (zpat, prep[f'inject{i}'], pool)

    for i in range(L):
        last = (i == L - 1)
        # hidden layers travel as bf16 (values at the next matmul are identical to
        # casting after im2col, since padding/im2col are pure data movement);
        # only the final sigmoid output stays float32.
        odt = jnp.float32 if last else jnp.bfloat16
        if i == 0 or last:
            pat, Ho, Wo = _conv_patches(x, 3, 1, 1, 'reflect')
            norm = (i == 0)
            act = 'relu' if i == 0 else 'sigmoid'
            y = fused_layer(pat[:, None].astype(jnp.bfloat16), prep[f'layer{i}'],
                            norm, act, out_dtype=odt)
            x = y.reshape(B, y.shape[1], Ho, Wo)
        elif i < D + 1:   # downsampling conv (4x4, stride 2, reflect pad 1) + IN + ReLU + inject
            pat, Ho, Wo = _conv_patches(x, filter_size, 2, 1, 'reflect')
            pos = [(oh, ow) for oh in range(Ho) for ow in range(Wo)]
            y = fused_layer(pat[:, None].astype(jnp.bfloat16), prep[f'layer{i}'],
                            True, 'relu', inject=inject_inputs(i, pos), out_dtype=odt)
            x = y.reshape(B, y.shape[1], Ho, Wo)
        else:             # upsampling ConvTranspose (sub-pixel phases) + IN + ReLU + inject
            pat, H, W = _convT_patches(x)
            pos = [(2 * h + ph, 2 * w + pw)
                   for ph in (0, 1) for pw in (0, 1)
                   for h in range(H) for w in range(W)]
            y = fused_layer(pat.astype(jnp.bfloat16), prep[f'layer{i}'],
                            True, 'relu', inject=inject_inputs(i, pos), out_dtype=odt)
            Cout = y.shape[1]
            y = y.reshape(B, Cout, 2, 2, H, W)                       # [B,C,ph,pw,h,w]
            y = jnp.transpose(y, (0, 1, 4, 2, 5, 3))                 # [B,C,h,ph,w,pw]
            x = y.reshape(B, Cout, 2 * H, 2 * W)
    return x


# ----------------------------------------------------------------------------
if __name__ == "__main__":
    G_LAYERS = [4, 8, 8, 16, 8, 8, 3]   # D=2 down, 2 up, final 3-channel sigmoid output
    FILTER = 4
    key = jax.random.PRNGKey(0)
    pkey, xkey = jax.random.split(key)
    params = init_params(G_LAYERS, FILTER, pkey)
    prep = prepare_params(params, G_LAYERS, FILTER)      # one-time repack, outside jit
    x = jax.random.normal(xkey, (2, G_LAYERS[0], 16, 16), jnp.float32)  # NCHW

    fwd = jax.jit(functools.partial(forward, g_layers=tuple(G_LAYERS), filter_size=FILTER))
    out = jax.block_until_ready(fwd(prep, x))

    assert out.shape == (2, G_LAYERS[-1], 16, 16), out.shape
    assert out.dtype == jnp.float32
    assert bool(jnp.all(jnp.isfinite(out)))
    assert bool(jnp.all((out >= 0.0) & (out <= 1.0)))  # sigmoid output range
    print("KERNEL_OK")
</pallas_src>

<mosaic_0001>
module attributes {stable_mosaic.version = 11 : i64} {
  func.func @_layer_kernel(%arg0: i32, %arg1: memref<1x1x36x256xbf16, #tpu.memory_space<vmem>>, %arg2: memref<1x8x36xbf16, #tpu.memory_space<vmem>>, %arg3: memref<1x8x256xbf16, #tpu.memory_space<vmem>>) attributes {dimension_semantics = [#tpu.dimension_semantics<parallel>], iteration_bounds = array<i64: 2>, scalar_prefetch = 0 : i64, scratch_operands = 0 : i64, tpu.core_type = #tpu.core_type<tc>, window_params = [{transform_indices = @transform_0, window_bounds = array<i64: 1, 1, 36, 256>}, {pipeline_mode = #tpu.pipeline_mode<synchronous>, transform_indices = @transform_1, window_bounds = array<i64: 1, 8, 36>}, {transform_indices = @transform_2, window_bounds = array<i64: 1, 8, 256>}]} {
    %c0 = arith.constant 0 : index
    %c0_0 = arith.constant 0 : index
    %c0_1 = arith.constant 0 : index
    %0 = vector.load %arg2[%c0, %c0_0, %c0_1] : memref<1x8x36xbf16, #tpu.memory_space<vmem>>, vector<1x8x36xbf16>
    %1 = vector.shape_cast %0 : vector<1x8x36xbf16> to vector<8x36xbf16>
    %c0_2 = arith.constant 0 : index
    %c0_3 = arith.constant 0 : index
    %c0_4 = arith.constant 0 : index
    %c0_5 = arith.constant 0 : index
    %2 = vector.load %arg1[%c0_2, %c0_3, %c0_4, %c0_5] : memref<1x1x36x256xbf16, #tpu.memory_space<vmem>>, vector<1x1x36x256xbf16>
    %3 = vector.shape_cast %2 : vector<1x1x36x256xbf16> to vector<36x256xbf16>
    %cst = arith.constant dense<0.000000e+00> : vector<8x256xf32>
    %4 = tpu.matmul %1, %3, %cst {dimension_numbers = #tpu.dot_dimension_numbers<[1], [0], [0], [1], [0, 0, 1, 1], [], []>} : vector<8x36xbf16>, vector<36x256xbf16>, vector<8x256xf32> -> vector<8x256xf32>
    %cst_6 = arith.constant dense<0.000000e+00> : vector<8xf32>
    %5 = vector.multi_reduction <add>, %4, %cst_6 [1] : vector<8x256xf32> to vector<8xf32>
    %6 = vector.shape_cast %5 : vector<8xf32> to vector<8x1xf32>
    %cst_7 = arith.constant 0.000000e+00 : f32
    %7 = vector.broadcast %cst_7 : f32 to vector<8x1xf32>
    %8 = arith.addf %7, %6 : vector<8x1xf32>
    %9 = arith.mulf %4, %4 : vector<8x256xf32>
    %cst_8 = arith.constant dense<0.000000e+00> : vector<8xf32>
    %10 = vector.multi_reduction <add>, %9, %cst_8 [1] : vector<8x256xf32> to vector<8xf32>
    %11 = vector.shape_cast %10 : vector<8xf32> to vector<8x1xf32>
    %cst_9 = arith.constant 0.000000e+00 : f32
    %12 = vector.broadcast %cst_9 : f32 to vector<8x1xf32>
    %13 = arith.addf %12, %11 : vector<8x1xf32>
    %cst_10 = arith.constant 3.906250e-03 : f32
    %14 = vector.broadcast %cst_10 : f32 to vector<8x1xf32>
    %15 = arith.mulf %8, %14 : vector<8x1xf32>
    %cst_11 = arith.constant 3.906250e-03 : f32
    %16 = vector.broadcast %cst_11 : f32 to vector<8x1xf32>
    %17 = arith.mulf %13, %16 : vector<8x1xf32>
    %18 = arith.mulf %15, %15 : vector<8x1xf32>
    %19 = arith.subf %17, %18 : vector<8x1xf32>
    %cst_12 = arith.constant 0.000000e+00 : f32
    %20 = vector.broadcast %cst_12 : f32 to vector<8x1xf32>
    %21 = arith.maximumf %19, %20 : vector<8x1xf32>
    %cst_13 = arith.constant 9.99999974E-6 : f32
    %22 = vector.broadcast %cst_13 : f32 to vector<8x1xf32>
    %23 = arith.addf %21, %22 : vector<8x1xf32>
    %24 = math.rsqrt %23 : vector<8x1xf32>
    %25 = vector.broadcast %15 : vector<8x1xf32> to vector<8x256xf32>
    %26 = arith.subf %4, %25 : vector<8x256xf32>
    %27 = vector.broadcast %24 : vector<8x1xf32> to vector<8x256xf32>
    %28 = arith.mulf %26, %27 : vector<8x256xf32>
    %cst_14 = arith.constant 0.000000e+00 : f32
    %29 = vector.broadcast %cst_14 : f32 to vector<8x256xf32>
    %30 = arith.maximumf %28, %29 : vector<8x256xf32>
    %31 = arith.truncf %30 : vector<8x256xf32> to vector<8x256xbf16>
    %c0_15 = arith.constant 0 : index
    %c0_16 = arith.constant 0 : index
    %c0_17 = arith.constant 0 : index
    %32 = vector.load %arg3[%c0_15, %c0_16, %c0_17] : memref<1x8x256xbf16, #tpu.memory_space<vmem>>, vector<1x8x256xbf16>
    %33 = vector.shape_cast %32 : vector<1x8x256xbf16> to vector<8x256xbf16>
    %34 = vector.shape_cast %31 : vector<8x256xbf16> to vector<1x8x256xbf16>
    tpu.vector_store %arg3[%c0_15, %c0_16, %c0_17], %34 {strides = array<i32>} : memref<1x8x256xbf16, #tpu.memory_space<vmem>>, vector<1x8x256xbf16>,
    return
  }
  func.func @transform_0(%arg0: i32) -> (i32, i32, i32, i32) {
    %c0_i32 = arith.constant 0 : i32
    %c0_i32_0 = arith.constant 0 : i32
    %c0_i32_1 = arith.constant 0 : i32
    %c0_i32_2 = arith.constant 0 : i32
    return %arg0, %c0_i32, %c0_i32_0, %c0_i32_1 : i32, i32, i32, i32
  }
  func.func @transform_1(%arg0: i32) -> (i32, i32, i32) {
    %c0_i32 = arith.constant 0 : i32
    %c0_i32_0 = arith.constant 0 : i32
    %c0_i32_1 = arith.constant 0 : i32
    %c0_i32_2 = arith.constant 0 : i32
    return %c0_i32, %c0_i32_0, %c0_i32_1 : i32, i32, i32
  }
  func.func @transform_2(%arg0: i32) -> (i32, i32, i32) {
    %c0_i32 = arith.constant 0 : i32
    %c0_i32_0 = arith.constant 0 : i32
    %c0_i32_1 = arith.constant 0 : i32
    return %arg0, %c0_i32, %c0_i32_0 : i32, i32, i32
  }
}

module attributes {stable_mosaic.version = 11 : i64} {
  func.func @_layer_kernel(%arg0: i32, %arg1: memref<1x1x128x64xbf16, #tpu.memory_space<vmem>>, %arg2: memref<1x8x128xbf16, #tpu.memory_space<vmem>>, %arg3: memref<1x64x225xbf16, #tpu.memory_space<vmem>>, %arg4: memref<8x64xbf16, #tpu.memory_space<vmem>>, %arg5: memref<225x64xf32, #tpu.memory_space<vmem>>, %arg6: memref<1x8x64xbf16, #tpu.memory_space<vmem>>) attributes {dimension_semantics = [#tpu.dimension_semantics<parallel>], iteration_bounds = array<i64: 2>, scalar_prefetch = 0 : i64, scratch_operands = 0 : i64, tpu.core_type = #tpu.core_type<tc>, window_params = [{transform_indices = @transform_0, window_bounds = array<i64: 1, 1, 128, 64>}, {pipeline_mode = #tpu.pipeline_mode<synchronous>, transform_indices = @transform_1, window_bounds = array<i64: 1, 8, 128>}, {transform_indices = @transform_2, window_bounds = array<i64: 1, 64, 225>}, {pipeline_mode = #tpu.pipeline_mode<synchronous>, transform_indices = @transform_3, window_bounds = array<i64: 8, 64>}, {pipeline_mode = #tpu.pipeline_mode<synchronous>, transform_indices = @transform_4, window_bounds = array<i64: 225, 64>}, {transform_indices = @transform_5, window_bounds = array<i64: 1, 8, 64>}]} {
    %c0 = arith.constant 0 : index
    %c0_0 = arith.constant 0 : index
    %c0_1 = arith.constant 0 : index
    %0 = vector.load %arg2[%c0, %c0_0, %c0_1] : memref<1x8x128xbf16, #tpu.memory_space<vmem>>, vector<1x8x128xbf16>
    %1 = vector.shape_cast %0 : vector<1x8x128xbf16> to vector<8x128xbf16>
    %c0_2 = arith.constant 0 : index
    %c0_3 = arith.constant 0 : index
    %c0_4 = arith.constant 0 : index
    %c0_5 = arith.constant 0 : index
    %2 = vector.load %arg1[%c0_2, %c0_3, %c0_4, %c0_5] : memref<1x1x128x64xbf16, #tpu.memory_space<vmem>>, vector<1x1x128x64xbf16>
    %3 = vector.shape_cast %2 : vector<1x1x128x64xbf16> to vector<128x64xbf16>
    %cst = arith.constant dense<0.000000e+00> : vector<8x64xf32>
    %4 = tpu.matmul %1, %3, %cst {dimension_numbers = #tpu.dot_dimension_numbers<[1], [0], [0], [1], [0, 0, 1, 1], [], []>} : vector<8x128xbf16>, vector<128x64xbf16>, vector<8x64xf32> -> vector<8x64xf32>
    %cst_6 = arith.constant dense<0.000000e+00> : vector<8xf32>
    %5 = vector.multi_reduction <add>, %4, %cst_6 [1] : vector<8x64xf32> to vector<8xf32>
    %6 = vector.shape_cast %5 : vector<8xf32> to vector<8x1xf32>
    %cst_7 = arith.constant 0.000000e+00 : f32
    %7 = vector.broadcast %cst_7 : f32 to vector<8x1xf32>
    %8 = arith.addf %7, %6 : vector<8x1xf32>
    %9 = arith.mulf %4, %4 : vector<8x64xf32>
    %cst_8 = arith.constant dense<0.000000e+00> : vector<8xf32>
    %10 = vector.multi_reduction <add>, %9, %cst_8 [1] : vector<8x64xf32> to vector<8xf32>
    %11 = vector.shape_cast %10 : vector<8xf32> to vector<8x1xf32>
    %cst_9 = arith.constant 0.000000e+00 : f32
    %12 = vector.broadcast %cst_9 : f32 to vector<8x1xf32>
    %13 = arith.addf %12, %11 : vector<8x1xf32>
    %cst_10 = arith.constant 1.562500e-02 : f32
    %14 = vector.broadcast %cst_10 : f32 to vector<8x1xf32>
    %15 = arith.mulf %8, %14 : vector<8x1xf32>
    %cst_11 = arith.constant 1.562500e-02 : f32
    %16 = vector.broadcast %cst_11 : f32 to vector<8x1xf32>
    %17 = arith.mulf %13, %16 : vector<8x1xf32>
    %18 = arith.mulf %15, %15 : vector<8x1xf32>
    %19 = arith.subf %17, %18 : vector<8x1xf32>
    %cst_12 = arith.constant 0.000000e+00 : f32
    %20 = vector.broadcast %cst_12 : f32 to vector<8x1xf32>
    %21 = arith.maximumf %19, %20 : vector<8x1xf32>
    %cst_13 = arith.constant 9.99999974E-6 : f32
    %22 = vector.broadcast %cst_13 : f32 to vector<8x1xf32>
    %23 = arith.addf %21, %22 : vector<8x1xf32>
    %24 = math.rsqrt %23 : vector<8x1xf32>
    %25 = vector.broadcast %15 : vector<8x1xf32> to vector<8x64xf32>
    %26 = arith.subf %4, %25 : vector<8x64xf32>
    %27 = vector.broadcast %24 : vector<8x1xf32> to vector<8x64xf32>
    %28 = arith.mulf %26, %27 : vector<8x64xf32>
    %cst_14 = arith.constant 0.000000e+00 : f32
    %29 = vector.broadcast %cst_14 : f32 to vector<8x64xf32>
    %30 = arith.maximumf %28, %29 : vector<8x64xf32>
    %c0_15 = arith.constant 0 : index
    %c0_16 = arith.constant 0 : index
    %31 = vector.load %arg4[%c0_15, %c0_16] : memref<8x64xbf16, #tpu.memory_space<vmem>>, vector<8x64xbf16>
    %c0_17 = arith.constant 0 : index
    %c0_18 = arith.constant 0 : index
    %c0_19 = arith.constant 0 : index
    %32 = vector.load %arg3[%c0_17, %c0_18, %c0_19] : memref<1x64x225xbf16, #tpu.memory_space<vmem>>, vector<1x64x225xbf16>
    %33 = vector.shape_cast %32 : vector<1x64x225xbf16> to vector<64x225xbf16>
    %cst_20 = arith.constant dense<0.000000e+00> : vector<8x225xf32>
    %34 = tpu.matmul %31, %33, %cst_20 {dimension_numbers = #tpu.dot_dimension_numbers<[1], [0], [0], [1], [0, 0, 1, 1], [], []>} : vector<8x64xbf16>, vector<64x225xbf16>, vector<8x225xf32> -> vector<8x225xf32>
    %cst_21 = arith.constant dense<0.000000e+00> : vector<8xf32>
    %35 = vector.multi_reduction <add>, %34, %cst_21 [1] : vector<8x225xf32> to vector<8xf32>
    %36 = vector.shape_cast %35 : vector<8xf32> to vector<8x1xf32>
    %cst_22 = arith.constant 2.250000e+02 : f32
    %37 = vector.broadcast %cst_22 : f32 to vector<8x1xf32>
    %38 = arith.divf %36, %37 : vector<8x1xf32>
    %39 = arith.mulf %34, %34 : vector<8x225xf32>
    %cst_23 = arith.constant dense<0.000000e+00> : vector<8xf32>
    %40 = vector.multi_reduction <add>, %39, %cst_23 [1] : vector<8x225xf32> to vector<8xf32>
    %41 = vector.shape_cast %40 : vector<8xf32> to vector<8x1xf32>
    %cst_24 = arith.constant 2.250000e+02 : f32
    %42 = vector.broadcast %cst_24 : f32 to vector<8x1xf32>
    %43 = arith.divf %41, %42 : vector<8x1xf32>
    %44 = arith.mulf %38, %38 : vector<8x1xf32>
    %45 = arith.subf %43, %44 : vector<8x1xf32>
    %cst_25 = arith.constant 0.000000e+00 : f32
    %46 = vector.broadcast %cst_25 : f32 to vector<8x1xf32>
    %47 = arith.maximumf %45, %46 : vector<8x1xf32>
    %48 = vector.broadcast %38 : vector<8x1xf32> to vector<8x225xf32>
    %49 = arith.subf %34, %48 : vector<8x225xf32>
    %cst_26 = arith.constant 9.99999974E-6 : f32
    %50 = vector.broadcast %cst_26 : f32 to vector<8x1xf32>
    %51 = arith.addf %47, %50 : vector<8x1xf32>
    %52 = math.rsqrt %51 : vector<8x1xf32>
    %53 = vector.broadcast %52 : vector<8x1xf32> to vector<8x225xf32>
    %54 = arith.mulf %49, %53 : vector<8x225xf32>
    %c0_27 = arith.constant 0 : index
    %c0_28 = arith.constant 0 : index
    %55 = vector.load %arg5[%c0_27, %c0_28] : memref<225x64xf32, #tpu.memory_space<vmem>>, vector<225x64xf32>
    %cst_29 = arith.constant dense<0.000000e+00> : vector<8x64xf32>
    %56 = tpu.matmul %54, %55, %cst_29 {dimension_numbers = #tpu.dot_dimension_numbers<[1], [0], [0], [1], [0, 0, 1, 1], [], []>} : vector<8x225xf32>, vector<225x64xf32>, vector<8x64xf32> -> vector<8x64xf32>
    %cst_30 = arith.constant 0.000000e+00 : f32
    %57 = vector.broadcast %cst_30 : f32 to vector<8x64xf32>
    %58 = arith.maximumf %56, %57 : vector<8x64xf32>
    %59 = arith.mulf %30, %58 : vector<8x64xf32>
    %60 = arith.truncf %59 : vector<8x64xf32> to vector<8x64xbf16>
    %c0_31 = arith.constant 0 : index
    %c0_32 = arith.constant 0 : index
    %c0_33 = arith.constant 0 : index
    %61 = vector.load %arg6[%c0_31, %c0_32, %c0_33] : memref<1x8x64xbf16, #tpu.memory_space<vmem>>, vector<1x8x64xbf16>
    %62 = vector.shape_cast %61 : vector<1x8x64xbf16> to vector<8x64xbf16>
    %63 = vector.shape_cast %60 : vector<8x64xbf16> to vector<1x8x64xbf16>
    tpu.vector_store %arg6[%c0_31, %c0_32, %c0_33], %63 {strides = array<i32>} : memref<1x8x64xbf16, #tpu.memory_space<vmem>>, vector<1x8x64xbf16>,
    return
  }
  func.func @transform_0(%arg0: i32) -> (i32, i32, i32, i32) {
    %c0_i32 = arith.constant 0 : i32
    %c0_i32_0 = arith.constant 0 : i32
    %c0_i32_1 = arith.constant 0 : i32
    %c0_i32_2 = arith.constant 0 : i32
    return %arg0, %c0_i32, %c0_i32_0, %c0_i32_1 : i32, i32, i32, i32
  }
  func.func @transform_1(%arg0: i32) -> (i32, i32, i32) {
    %c0_i32 = arith.constant 0 : i32
    %c0_i32_0 = arith.constant 0 : i32
    %c0_i32_1 = arith.constant 0 : i32
    %c0_i32_2 = arith.constant 0 : i32
    return %c0_i32, %c0_i32_0, %c0_i32_1 : i32, i32, i32
  }
  func.func @transform_2(%arg0: i32) -> (i32, i32, i32) {
    %c0_i32 = arith.constant 0 : i32
    %c0_i32_0 = arith.constant 0 : i32
    %c0_i32_1 = arith.constant 0 : i32
    return %arg0, %c0_i32, %c0_i32_0 : i32, i32, i32
  }
  func.func @transform_3(%arg0: i32) -> (i32, i32) {
    %c0_i32 = arith.constant 0 : i32
    %c0_i32_0 = arith.constant 0 : i32
    %c0_i32_1 = arith.constant 0 : i32
    return %c0_i32, %c0_i32_0 : i32, i32
  }
  func.func @transform_4(%arg0: i32) -> (i32, i32) {
    %c0_i32 = arith.constant 0 : i32
    %c0_i32_0 = arith.constant 0 : i32
    %c0_i32_1 = arith.constant 0 : i32
    return %c0_i32, %c0_i32_0 : i32, i32
  }
  func.func @transform_5(%arg0: i32) -> (i32, i32, i32) {
    %c0_i32 = arith.constant 0 : i32
    %c0_i32_0 = arith.constant 0 : i32
    %c0_i32_1 = arith.constant 0 : i32
    return %arg0, %c0_i32, %c0_i32_0 : i32, i32, i32
  }
}

module attributes {stable_mosaic.version = 11 : i64} {
  func.func @_layer_kernel(%arg0: i32, %arg1: memref<1x1x128x16xbf16, #tpu.memory_space<vmem>>, %arg2: memref<1x16x128xbf16, #tpu.memory_space<vmem>>, %arg3: memref<1x64x225xbf16, #tpu.memory_space<vmem>>, %arg4: memref<16x64xbf16, #tpu.memory_space<vmem>>, %arg5: memref<225x16xf32, #tpu.memory_space<vmem>>, %arg6: memref<1x16x16xbf16, #tpu.memory_space<vmem>>) attributes {dimension_semantics = [#tpu.dimension_semantics<parallel>], iteration_bounds = array<i64: 2>, scalar_prefetch = 0 : i64, scratch_operands = 0 : i64, tpu.core_type = #tpu.core_type<tc>, window_params = [{transform_indices = @transform_0, window_bounds = array<i64: 1, 1, 128, 16>}, {pipeline_mode = #tpu.pipeline_mode<synchronous>, transform_indices = @transform_1, window_bounds = array<i64: 1, 16, 128>}, {transform_indices = @transform_2, window_bounds = array<i64: 1, 64, 225>}, {pipeline_mode = #tpu.pipeline_mode<synchronous>, transform_indices = @transform_3, window_bounds = array<i64: 16, 64>}, {pipeline_mode = #tpu.pipeline_mode<synchronous>, transform_indices = @transform_4, window_bounds = array<i64: 225, 16>}, {transform_indices = @transform_5, window_bounds = array<i64: 1, 16, 16>}]} {
    %c0 = arith.constant 0 : index
    %c0_0 = arith.constant 0 : index
    %c0_1 = arith.constant 0 : index
    %0 = vector.load %arg2[%c0, %c0_0, %c0_1] : memref<1x16x128xbf16, #tpu.memory_space<vmem>>, vector<1x16x128xbf16>
    %1 = vector.shape_cast %0 : vector<1x16x128xbf16> to vector<16x128xbf16>
    %c0_2 = arith.constant 0 : index
    %c0_3 = arith.constant 0 : index
    %c0_4 = arith.constant 0 : index
    %c0_5 = arith.constant 0 : index
    %2 = vector.load %arg1[%c0_2, %c0_3, %c0_4, %c0_5] : memref<1x1x128x16xbf16, #tpu.memory_space<vmem>>, vector<1x1x128x16xbf16>
    %3 = vector.shape_cast %2 : vector<1x1x128x16xbf16> to vector<128x16xbf16>
    %cst = arith.constant dense<0.000000e+00> : vector<16x16xf32>
    %4 = tpu.matmul %1, %3, %cst {dimension_numbers = #tpu.dot_dimension_numbers<[1], [0], [0], [1], [0, 0, 1, 1], [], []>} : vector<16x128xbf16>, vector<128x16xbf16>, vector<16x16xf32> -> vector<16x16xf32>
    %cst_6 = arith.constant dense<0.000000e+00> : vector<16xf32>
    %5 = vector.multi_reduction <add>, %4, %cst_6 [1] : vector<16x16xf32> to vector<16xf32>
    %6 = vector.shape_cast %5 : vector<16xf32> to vector<16x1xf32>
    %cst_7 = arith.constant 0.000000e+00 : f32
    %7 = vector.broadcast %cst_7 : f32 to vector<16x1xf32>
    %8 = arith.addf %7, %6 : vector<16x1xf32>
    %9 = arith.mulf %4, %4 : vector<16x16xf32>
    %cst_8 = arith.constant dense<0.000000e+00> : vector<16xf32>
    %10 = vector.multi_reduction <add>, %9, %cst_8 [1] : vector<16x16xf32> to vector<16xf32>
    %11 = vector.shape_cast %10 : vector<16xf32> to vector<16x1xf32>
    %cst_9 = arith.constant 0.000000e+00 : f32
    %12 = vector.broadcast %cst_9 : f32 to vector<16x1xf32>
    %13 = arith.addf %12, %11 : vector<16x1xf32>
    %cst_10 = arith.constant 6.250000e-02 : f32
    %14 = vector.broadcast %cst_10 : f32 to vector<16x1xf32>
    %15 = arith.mulf %8, %14 : vector<16x1xf32>
    %cst_11 = arith.constant 6.250000e-02 : f32
    %16 = vector.broadcast %cst_11 : f32 to vector<16x1xf32>
    %17 = arith.mulf %13, %16 : vector<16x1xf32>
    %18 = arith.mulf %15, %15 : vector<16x1xf32>
    %19 = arith.subf %17, %18 : vector<16x1xf32>
    %cst_12 = arith.constant 0.000000e+00 : f32
    %20 = vector.broadcast %cst_12 : f32 to vector<16x1xf32>
    %21 = arith.maximumf %19, %20 : vector<16x1xf32>
    %cst_13 = arith.constant 9.99999974E-6 : f32
    %22 = vector.broadcast %cst_13 : f32 to vector<16x1xf32>
    %23 = arith.addf %21, %22 : vector<16x1xf32>
    %24 = math.rsqrt %23 : vector<16x1xf32>
    %25 = vector.broadcast %15 : vector<16x1xf32> to vector<16x16xf32>
    %26 = arith.subf %4, %25 : vector<16x16xf32>
    %27 = vector.broadcast %24 : vector<16x1xf32> to vector<16x16xf32>
    %28 = arith.mulf %26, %27 : vector<16x16xf32>
    %cst_14 = arith.constant 0.000000e+00 : f32
    %29 = vector.broadcast %cst_14 : f32 to vector<16x16xf32>
    %30 = arith.maximumf %28, %29 : vector<16x16xf32>
    %c0_15 = arith.constant 0 : index
    %c0_16 = arith.constant 0 : index
    %31 = vector.load %arg4[%c0_15, %c0_16] : memref<16x64xbf16, #tpu.memory_space<vmem>>, vector<16x64xbf16>
    %c0_17 = arith.constant 0 : index
    %c0_18 = arith.constant 0 : index
    %c0_19 = arith.constant 0 : index
    %32 = vector.load %arg3[%c0_17, %c0_18, %c0_19] : memref<1x64x225xbf16, #tpu.memory_space<vmem>>, vector<1x64x225xbf16>
    %33 = vector.shape_cast %32 : vector<1x64x225xbf16> to vector<64x225xbf16>
    %cst_20 = arith.constant dense<0.000000e+00> : vector<16x225xf32>
    %34 = tpu.matmul %31, %33, %cst_20 {dimension_numbers = #tpu.dot_dimension_numbers<[1], [0], [0], [1], [0, 0, 1, 1], [], []>} : vector<16x64xbf16>, vector<64x225xbf16>, vector<16x225xf32> -> vector<16x225xf32>
    %cst_21 = arith.constant dense<0.000000e+00> : vector<16xf32>
    %35 = vector.multi_reduction <add>, %34, %cst_21 [1] : vector<16x225xf32> to vector<16xf32>
    %36 = vector.shape_cast %35 : vector<16xf32> to vector<16x1xf32>
    %cst_22 = arith.constant 2.250000e+02 : f32
    %37 = vector.broadcast %cst_22 : f32 to vector<16x1xf32>
    %38 = arith.divf %36, %37 : vector<16x1xf32>
    %39 = arith.mulf %34, %34 : vector<16x225xf32>
    %cst_23 = arith.constant dense<0.000000e+00> : vector<16xf32>
    %40 = vector.multi_reduction <add>, %39, %cst_23 [1] : vector<16x225xf32> to vector<16xf32>
    %41 = vector.shape_cast %40 : vector<16xf32> to vector<16x1xf32>
    %cst_24 = arith.constant 2.250000e+02 : f32
    %42 = vector.broadcast %cst_24 : f32 to vector<16x1xf32>
    %43 = arith.divf %41, %42 : vector<16x1xf32>
    %44 = arith.mulf %38, %38 : vector<16x1xf32>
    %45 = arith.subf %43, %44 : vector<16x1xf32>
    %cst_25 = arith.constant 0.000000e+00 : f32
    %46 = vector.broadcast %cst_25 : f32 to vector<16x1xf32>
    %47 = arith.maximumf %45, %46 : vector<16x1xf32>
    %48 = vector.broadcast %38 : vector<16x1xf32> to vector<16x225xf32>
    %49 = arith.subf %34, %48 : vector<16x225xf32>
    %cst_26 = arith.constant 9.99999974E-6 : f32
    %50 = vector.broadcast %cst_26 : f32 to vector<16x1xf32>
    %51 = arith.addf %47, %50 : vector<16x1xf32>
    %52 = math.rsqrt %51 : vector<16x1xf32>
    %53 = vector.broadcast %52 : vector<16x1xf32> to vector<16x225xf32>
    %54 = arith.mulf %49, %53 : vector<16x225xf32>
    %c0_27 = arith.constant 0 : index
    %c0_28 = arith.constant 0 : index
    %55 = vector.load %arg5[%c0_27, %c0_28] : memref<225x16xf32, #tpu.memory_space<vmem>>, vector<225x16xf32>
    %cst_29 = arith.constant dense<0.000000e+00> : vector<16x16xf32>
    %56 = tpu.matmul %54, %55, %cst_29 {dimension_numbers = #tpu.dot_dimension_numbers<[1], [0], [0], [1], [0, 0, 1, 1], [], []>} : vector<16x225xf32>, vector<225x16xf32>, vector<16x16xf32> -> vector<16x16xf32>
    %cst_30 = arith.constant 0.000000e+00 : f32
    %57 = vector.broadcast %cst_30 : f32 to vector<16x16xf32>
    %58 = arith.maximumf %56, %57 : vector<16x16xf32>
    %59 = arith.mulf %30, %58 : vector<16x16xf32>
    %60 = arith.truncf %59 : vector<16x16xf32> to vector<16x16xbf16>
    %c0_31 = arith.constant 0 : index
    %c0_32 = arith.constant 0 : index
    %c0_33 = arith.constant 0 : index
    %61 = vector.load %arg6[%c0_31, %c0_32, %c0_33] : memref<1x16x16xbf16, #tpu.memory_space<vmem>>, vector<1x16x16xbf16>
    %62 = vector.shape_cast %61 : vector<1x16x16xbf16> to vector<16x16xbf16>
    %63 = vector.shape_cast %60 : vector<16x16xbf16> to vector<1x16x16xbf16>
    tpu.vector_store %arg6[%c0_31, %c0_32, %c0_33], %63 {strides = array<i32>} : memref<1x16x16xbf16, #tpu.memory_space<vmem>>, vector<1x16x16xbf16>,
    return
  }
  func.func @transform_0(%arg0: i32) -> (i32, i32, i32, i32) {
    %c0_i32 = arith.constant 0 : i32
    %c0_i32_0 = arith.constant 0 : i32
    %c0_i32_1 = arith.constant 0 : i32
    %c0_i32_2 = arith.constant 0 : i32
    return %arg0, %c0_i32, %c0_i32_0, %c0_i32_1 : i32, i32, i32, i32
  }
  func.func @transform_1(%arg0: i32) -> (i32, i32, i32) {
    %c0_i32 = arith.constant 0 : i32
    %c0_i32_0 = arith.constant 0 : i32
    %c0_i32_1 = arith.constant 0 : i32
    %c0_i32_2 = arith.constant 0 : i32
    return %c0_i32, %c0_i32_0, %c0_i32_1 : i32, i32, i32
  }
  func.func @transform_2(%arg0: i32) -> (i32, i32, i32) {
    %c0_i32 = arith.constant 0 : i32
    %c0_i32_0 = arith.constant 0 : i32
    %c0_i32_1 = arith.constant 0 : i32
    return %arg0, %c0_i32, %c0_i32_0 : i32, i32, i32
  }
  func.func @transform_3(%arg0: i32) -> (i32, i32) {
    %c0_i32 = arith.constant 0 : i32
    %c0_i32_0 = arith.constant 0 : i32
    %c0_i32_1 = arith.constant 0 : i32
    return %c0_i32, %c0_i32_0 : i32, i32
  }
  func.func @transform_4(%arg0: i32) -> (i32, i32) {
    %c0_i32 = arith.constant 0 : i32
    %c0_i32_0 = arith.constant 0 : i32
    %c0_i32_1 = arith.constant 0 : i32
    return %c0_i32, %c0_i32_0 : i32, i32
  }
  func.func @transform_5(%arg0: i32) -> (i32, i32, i32) {
    %c0_i32 = arith.constant 0 : i32
    %c0_i32_0 = arith.constant 0 : i32
    %c0_i32_1 = arith.constant 0 : i32
    return %arg0, %c0_i32, %c0_i32_0 : i32, i32, i32
  }
}

module attributes {stable_mosaic.version = 11 : i64} {
  func.func @_layer_kernel(%arg0: i32, %arg1: memref<1x4x64x16xbf16, #tpu.memory_space<vmem>>, %arg2: memref<4x8x64xbf16, #tpu.memory_space<vmem>>, %arg3: memref<1x64x225xbf16, #tpu.memory_space<vmem>>, %arg4: memref<8x64xbf16, #tpu.memory_space<vmem>>, %arg5: memref<225x64xf32, #tpu.memory_space<vmem>>, %arg6: memref<1x8x64xbf16, #tpu.memory_space<vmem>>) attributes {dimension_semantics = [#tpu.dimension_semantics<parallel>], iteration_bounds = array<i64: 2>, scalar_prefetch = 0 : i64, scratch_operands = 0 : i64, tpu.core_type = #tpu.core_type<tc>, window_params = [{transform_indices = @transform_0, window_bounds = array<i64: 1, 4, 64, 16>}, {pipeline_mode = #tpu.pipeline_mode<synchronous>, transform_indices = @transform_1, window_bounds = array<i64: 4, 8, 64>}, {transform_indices = @transform_2, window_bounds = array<i64: 1, 64, 225>}, {pipeline_mode = #tpu.pipeline_mode<synchronous>, transform_indices = @transform_3, window_bounds = array<i64: 8, 64>}, {pipeline_mode = #tpu.pipeline_mode<synchronous>, transform_indices = @transform_4, window_bounds = array<i64: 225, 64>}, {transform_indices = @transform_5, window_bounds = array<i64: 1, 8, 64>}]} {
    %c0 = arith.constant 0 : index
    %c0_0 = arith.constant 0 : index
    %c0_1 = arith.constant 0 : index
    %0 = vector.load %arg2[%c0, %c0_0, %c0_1] : memref<4x8x64xbf16, #tpu.memory_space<vmem>>, vector<1x8x64xbf16>
    %1 = vector.shape_cast %0 : vector<1x8x64xbf16> to vector<8x64xbf16>
    %c0_2 = arith.constant 0 : index
    %c0_3 = arith.constant 0 : index
    %c0_4 = arith.constant 0 : index
    %c0_5 = arith.constant 0 : index
    %2 = vector.load %arg1[%c0_2, %c0_3, %c0_4, %c0_5] : memref<1x4x64x16xbf16, #tpu.memory_space<vmem>>, vector<1x1x64x16xbf16>
    %3 = vector.shape_cast %2 : vector<1x1x64x16xbf16> to vector<64x16xbf16>
    %cst = arith.constant dense<0.000000e+00> : vector<8x16xf32>
    %4 = tpu.matmul %1, %3, %cst {dimension_numbers = #tpu.dot_dimension_numbers<[1], [0], [0], [1], [0, 0, 1, 1], [], []>} : vector<8x64xbf16>, vector<64x16xbf16>, vector<8x16xf32> -> vector<8x16xf32>
    %c1 = arith.constant 1 : index
    %c0_6 = arith.constant 0 : index
    %c0_7 = arith.constant 0 : index
    %5 = vector.load %arg2[%c1, %c0_6, %c0_7] : memref<4x8x64xbf16, #tpu.memory_space<vmem>>, vector<1x8x64xbf16>
    %6 = vector.shape_cast %5 : vector<1x8x64xbf16> to vector<8x64xbf16>
    %c0_8 = arith.constant 0 : index
    %c1_9 = arith.constant 1 : index
    %c0_10 = arith.constant 0 : index
    %c0_11 = arith.constant 0 : index
    %7 = vector.load %arg1[%c0_8, %c1_9, %c0_10, %c0_11] : memref<1x4x64x16xbf16, #tpu.memory_space<vmem>>, vector<1x1x64x16xbf16>
    %8 = vector.shape_cast %7 : vector<1x1x64x16xbf16> to vector<64x16xbf16>
    %cst_12 = arith.constant dense<0.000000e+00> : vector<8x16xf32>
    %9 = tpu.matmul %6, %8, %cst_12 {dimension_numbers = #tpu.dot_dimension_numbers<[1], [0], [0], [1], [0, 0, 1, 1], [], []>} : vector<8x64xbf16>, vector<64x16xbf16>, vector<8x16xf32> -> vector<8x16xf32>
    %c2 = arith.constant 2 : index
    %c0_13 = arith.constant 0 : index
    %c0_14 = arith.constant 0 : index
    %10 = vector.load %arg2[%c2, %c0_13, %c0_14] : memref<4x8x64xbf16, #tpu.memory_space<vmem>>, vector<1x8x64xbf16>
    %11 = vector.shape_cast %10 : vector<1x8x64xbf16> to vector<8x64xbf16>
    %c0_15 = arith.constant 0 : index
    %c2_16 = arith.constant 2 : index
    %c0_17 = arith.constant 0 : index
    %c0_18 = arith.constant 0 : index
    %12 = vector.load %arg1[%c0_15, %c2_16, %c0_17, %c0_18] : memref<1x4x64x16xbf16, #tpu.memory_space<vmem>>, vector<1x1x64x16xbf16>
    %13 = vector.shape_cast %12 : vector<1x1x64x16xbf16> to vector<64x16xbf16>
    %cst_19 = arith.constant dense<0.000000e+00> : vector<8x16xf32>
    %14 = tpu.matmul %11, %13, %cst_19 {dimension_numbers = #tpu.dot_dimension_numbers<[1], [0], [0], [1], [0, 0, 1, 1], [], []>} : vector<8x64xbf16>, vector<64x16xbf16>, vector<8x16xf32> -> vector<8x16xf32>
    %c3 = arith.constant 3 : index
    %c0_20 = arith.constant 0 : index
    %c0_21 = arith.constant 0 : index
    %15 = vector.load %arg2[%c3, %c0_20, %c0_21] : memref<4x8x64xbf16, #tpu.memory_space<vmem>>, vector<1x8x64xbf16>
    %16 = vector.shape_cast %15 : vector<1x8x64xbf16> to vector<8x64xbf16>
    %c0_22 = arith.constant 0 : index
    %c3_23 = arith.constant 3 : index
    %c0_24 = arith.constant 0 : index
    %c0_25 = arith.constant 0 : index
    %17 = vector.load %arg1[%c0_22, %c3_23, %c0_24, %c0_25] : memref<1x4x64x16xbf16, #tpu.memory_space<vmem>>, vector<1x1x64x16xbf16>
    %18 = vector.shape_cast %17 : vector<1x1x64x16xbf16> to vector<64x16xbf16>
    %cst_26 = arith.constant dense<0.000000e+00> : vector<8x16xf32>
    %19 = tpu.matmul %16, %18, %cst_26 {dimension_numbers = #tpu.dot_dimension_numbers<[1], [0], [0], [1], [0, 0, 1, 1], [], []>} : vector<8x64xbf16>, vector<64x16xbf16>, vector<8x16xf32> -> vector<8x16xf32>
    %cst_27 = arith.constant dense<0.000000e+00> : vector<8xf32>
    %20 = vector.multi_reduction <add>, %4, %cst_27 [1] : vector<8x16xf32> to vector<8xf32>
    %21 = vector.shape_cast %20 : vector<8xf32> to vector<8x1xf32>
    %cst_28 = arith.constant 0.000000e+00 : f32
    %22 = vector.broadcast %cst_28 : f32 to vector<8x1xf32>
    %23 = arith.addf %22, %21 : vector<8x1xf32>
    %cst_29 = arith.constant dense<0.000000e+00> : vector<8xf32>
    %24 = vector.multi_reduction <add>, %9, %cst_29 [1] : vector<8x16xf32> to vector<8xf32>
    %25 = vector.shape_cast %24 : vector<8xf32> to vector<8x1xf32>
    %26 = arith.addf %23, %25 : vector<8x1xf32>
    %cst_30 = arith.constant dense<0.000000e+00> : vector<8xf32>
    %27 = vector.multi_reduction <add>, %14, %cst_30 [1] : vector<8x16xf32> to vector<8xf32>
    %28 = vector.shape_cast %27 : vector<8xf32> to vector<8x1xf32>
    %29 = arith.addf %26, %28 : vector<8x1xf32>
    %cst_31 = arith.constant dense<0.000000e+00> : vector<8xf32>
    %30 = vector.multi_reduction <add>, %19, %cst_31 [1] : vector<8x16xf32> to vector<8xf32>
    %31 = vector.shape_cast %30 : vector<8xf32> to vector<8x1xf32>
    %32 = arith.addf %29, %31 : vector<8x1xf32>
    %33 = arith.mulf %4, %4 : vector<8x16xf32>
    %cst_32 = arith.constant dense<0.000000e+00> : vector<8xf32>
    %34 = vector.multi_reduction <add>, %33, %cst_32 [1] : vector<8x16xf32> to vector<8xf32>
    %35 = vector.shape_cast %34 : vector<8xf32> to vector<8x1xf32>
    %cst_33 = arith.constant 0.000000e+00 : f32
    %36 = vector.broadcast %cst_33 : f32 to vector<8x1xf32>
    %37 = arith.addf %36, %35 : vector<8x1xf32>
    %38 = arith.mulf %9, %9 : vector<8x16xf32>
    %cst_34 = arith.constant dense<0.000000e+00> : vector<8xf32>
    %39 = vector.multi_reduction <add>, %38, %cst_34 [1] : vector<8x16xf32> to vector<8xf32>
    %40 = vector.shape_cast %39 : vector<8xf32> to vector<8x1xf32>
    %41 = arith.addf %37, %40 : vector<8x1xf32>
    %42 = arith.mulf %14, %14 : vector<8x16xf32>
    %cst_35 = arith.constant dense<0.000000e+00> : vector<8xf32>
    %43 = vector.multi_reduction <add>, %42, %cst_35 [1] : vector<8x16xf32> to vector<8xf32>
    %44 = vector.shape_cast %43 : vector<8xf32> to vector<8x1xf32>
    %45 = arith.addf %41, %44 : vector<8x1xf32>
    %46 = arith.mulf %19, %19 : vector<8x16xf32>
    %cst_36 = arith.constant dense<0.000000e+00> : vector<8xf32>
    %47 = vector.multi_reduction <add>, %46, %cst_36 [1] : vector<8x16xf32> to vector<8xf32>
    %48 = vector.shape_cast %47 : vector<8xf32> to vector<8x1xf32>
    %49 = arith.addf %45, %48 : vector<8x1xf32>
    %cst_37 = arith.constant 1.562500e-02 : f32
    %50 = vector.broadcast %cst_37 : f32 to vector<8x1xf32>
    %51 = arith.mulf %32, %50 : vector<8x1xf32>
    %cst_38 = arith.constant 1.562500e-02 : f32
    %52 = vector.broadcast %cst_38 : f32 to vector<8x1xf32>
    %53 = arith.mulf %49, %52 : vector<8x1xf32>
    %54 = arith.mulf %51, %51 : vector<8x1xf32>
    %55 = arith.subf %53, %54 : vector<8x1xf32>
    %cst_39 = arith.constant 0.000000e+00 : f32
    %56 = vector.broadcast %cst_39 : f32 to vector<8x1xf32>
    %57 = arith.maximumf %55, %56 : vector<8x1xf32>
    %cst_40 = arith.constant 9.99999974E-6 : f32
    %58 = vector.broadcast %cst_40 : f32 to vector<8x1xf32>
    %59 = arith.addf %57, %58 : vector<8x1xf32>
    %60 = math.rsqrt %59 : vector<8x1xf32>
    %61 = vector.broadcast %51 : vector<8x1xf32> to vector<8x16xf32>
    %62 = arith.subf %4, %61 : vector<8x16xf32>
    %63 = vector.broadcast %60 : vector<8x1xf32> to vector<8x16xf32>
    %64 = arith.mulf %62, %63 : vector<8x16xf32>
    %65 = vector.broadcast %51 : vector<8x1xf32> to vector<8x16xf32>
    %66 = arith.subf %9, %65 : vector<8x16xf32>
    %67 = vector.broadcast %60 : vector<8x1xf32> to vector<8x16xf32>
    %68 = arith.mulf %66, %67 : vector<8x16xf32>
    %69 = vector.broadcast %51 : vector<8x1xf32> to vector<8x16xf32>
    %70 = arith.subf %14, %69 : vector<8x16xf32>
    %71 = vector.broadcast %60 : vector<8x1xf32> to vector<8x16xf32>
    %72 = arith.mulf %70, %71 : vector<8x16xf32>
    %73 = vector.broadcast %51 : vector<8x1xf32> to vector<8x16xf32>
    %74 = arith.subf %19, %73 : vector<8x16xf32>
    %75 = vector.broadcast %60 : vector<8x1xf32> to vector<8x16xf32>
    %76 = arith.mulf %74, %75 : vector<8x16xf32>
    %cst_41 = arith.constant 0.000000e+00 : f32
    %77 = vector.broadcast %cst_41 : f32 to vector<8x16xf32>
    %78 = arith.maximumf %64, %77 : vector<8x16xf32>
    %cst_42 = arith.constant 0.000000e+00 : f32
    %79 = vector.broadcast %cst_42 : f32 to vector<8x16xf32>
    %80 = arith.maximumf %68, %79 : vector<8x16xf32>
    %cst_43 = arith.constant 0.000000e+00 : f32
    %81 = vector.broadcast %cst_43 : f32 to vector<8x16xf32>
    %82 = arith.maximumf %72, %81 : vector<8x16xf32>
    %cst_44 = arith.constant 0.000000e+00 : f32
    %83 = vector.broadcast %cst_44 : f32 to vector<8x16xf32>
    %84 = arith.maximumf %76, %83 : vector<8x16xf32>
    %c0_45 = arith.constant 0 : index
    %c0_46 = arith.constant 0 : index
    %85 = vector.load %arg4[%c0_45, %c0_46] : memref<8x64xbf16, #tpu.memory_space<vmem>>, vector<8x64xbf16>
    %c0_47 = arith.constant 0 : index
    %c0_48 = arith.constant 0 : index
    %c0_49 = arith.constant 0 : index
    %86 = vector.load %arg3[%c0_47, %c0_48, %c0_49] : memref<1x64x225xbf16, #tpu.memory_space<vmem>>, vector<1x64x225xbf16>
    %87 = vector.shape_cast %86 : vector<1x64x225xbf16> to vector<64x225xbf16>
    %cst_50 = arith.constant dense<0.000000e+00> : vector<8x225xf32>
    %88 = tpu.matmul %85, %87, %cst_50 {dimension_numbers = #tpu.dot_dimension_numbers<[1], [0], [0], [1], [0, 0, 1, 1], [], []>} : vector<8x64xbf16>, vector<64x225xbf16>, vector<8x225xf32> -> vector<8x225xf32>
    %cst_51 = arith.constant dense<0.000000e+00> : vector<8xf32>
    %89 = vector.multi_reduction <add>, %88, %cst_51 [1] : vector<8x225xf32> to vector<8xf32>
    %90 = vector.shape_cast %89 : vector<8xf32> to vector<8x1xf32>
    %cst_52 = arith.constant 2.250000e+02 : f32
    %91 = vector.broadcast %cst_52 : f32 to vector<8x1xf32>
    %92 = arith.divf %90, %91 : vector<8x1xf32>
    %93 = arith.mulf %88, %88 : vector<8x225xf32>
    %cst_53 = arith.constant dense<0.000000e+00> : vector<8xf32>
    %94 = vector.multi_reduction <add>, %93, %cst_53 [1] : vector<8x225xf32> to vector<8xf32>
    %95 = vector.shape_cast %94 : vector<8xf32> to vector<8x1xf32>
    %cst_54 = arith.constant 2.250000e+02 : f32
    %96 = vector.broadcast %cst_54 : f32 to vector<8x1xf32>
    %97 = arith.divf %95, %96 : vector<8x1xf32>
    %98 = arith.mulf %92, %92 : vector<8x1xf32>
    %99 = arith.subf %97, %98 : vector<8x1xf32>
    %cst_55 = arith.constant 0.000000e+00 : f32
    %100 = vector.broadcast %cst_55 : f32 to vector<8x1xf32>
    %101 = arith.maximumf %99, %100 : vector<8x1xf32>
    %102 = vector.broadcast %92 : vector<8x1xf32> to vector<8x225xf32>
    %103 = arith.subf %88, %102 : vector<8x225xf32>
    %cst_56 = arith.constant 9.99999974E-6 : f32
    %104 = vector.broadcast %cst_56 : f32 to vector<8x1xf32>
    %105 = arith.addf %101, %104 : vector<8x1xf32>
    %106 = math.rsqrt %105 : vector<8x1xf32>
    %107 = vector.broadcast %106 : vector<8x1xf32> to vector<8x225xf32>
    %108 = arith.mulf %103, %107 : vector<8x225xf32>
    %c0_57 = arith.constant 0 : index
    %c0_58 = arith.constant 0 : index
    %109 = vector.load %arg5[%c0_57, %c0_58] : memref<225x64xf32, #tpu.memory_space<vmem>>, vector<225x64xf32>
    %cst_59 = arith.constant dense<0.000000e+00> : vector<8x64xf32>
    %110 = tpu.matmul %108, %109, %cst_59 {dimension_numbers = #tpu.dot_dimension_numbers<[1], [0], [0], [1], [0, 0, 1, 1], [], []>} : vector<8x225xf32>, vector<225x64xf32>, vector<8x64xf32> -> vector<8x64xf32>
    %cst_60 = arith.constant 0.000000e+00 : f32
    %111 = vector.broadcast %cst_60 : f32 to vector<8x64xf32>
    %112 = arith.maximumf %110, %111 : vector<8x64xf32>
    %113 = vector.extract_strided_slice %112 {offsets = [0, 0], sizes = [8, 16], strides = [1, 1]} : vector<8x64xf32> to vector<8x16xf32>
    %114 = arith.mulf %78, %113 : vector<8x16xf32>
    %115 = vector.extract_strided_slice %112 {offsets = [0, 16], sizes = [8, 16], strides = [1, 1]} : vector<8x64xf32> to vector<8x16xf32>
    %116 = arith.mulf %80, %115 : vector<8x16xf32>
    %117 = vector.extract_strided_slice %112 {offsets = [0, 32], sizes = [8, 16], strides = [1, 1]} : vector<8x64xf32> to vector<8x16xf32>
    %118 = arith.mulf %82, %117 : vector<8x16xf32>
    %119 = vector.extract_strided_slice %112 {offsets = [0, 48], sizes = [8, 16], strides = [1, 1]} : vector<8x64xf32> to vector<8x16xf32>
    %120 = arith.mulf %84, %119 : vector<8x16xf32>
    %121 = arith.truncf %114 : vector<8x16xf32> to vector<8x16xbf16>
    %c0_61 = arith.constant 0 : index
    %c0_62 = arith.constant 0 : index
    %c0_63 = arith.constant 0 : index
    %122 = vector.load %arg6[%c0_61, %c0_62, %c0_63] : memref<1x8x64xbf16, #tpu.memory_space<vmem>>, vector<1x8x16xbf16>
    %123 = vector.shape_cast %122 : vector<1x8x16xbf16> to vector<8x16xbf16>
    %124 = vector.shape_cast %121 : vector<8x16xbf16> to vector<1x8x16xbf16>
    tpu.vector_store %arg6[%c0_61, %c0_62, %c0_63], %124 {strides = array<i32>} : memref<1x8x64xbf16, #tpu.memory_space<vmem>>, vector<1x8x16xbf16>,
    %125 = arith.truncf %116 : vector<8x16xf32> to vector<8x16xbf16>
    %c0_64 = arith.constant 0 : index
    %c0_65 = arith.constant 0 : index
    %c16 = arith.constant 16 : index
    %126 = vector.load %arg6[%c0_64, %c0_65, %c16] : memref<1x8x64xbf16, #tpu.memory_space<vmem>>, vector<1x8x16xbf16>
    %127 = vector.shape_cast %126 : vector<1x8x16xbf16> to vector<8x16xbf16>
    %128 = vector.shape_cast %125 : vector<8x16xbf16> to vector<1x8x16xbf16>
    tpu.vector_store %arg6[%c0_64, %c0_65, %c16], %128 {strides = array<i32>} : memref<1x8x64xbf16, #tpu.memory_space<vmem>>, vector<1x8x16xbf16>,
    %129 = arith.truncf %118 : vector<8x16xf32> to vector<8x16xbf16>
    %c0_66 = arith.constant 0 : index
    %c0_67 = arith.constant 0 : index
    %c32 = arith.constant 32 : index
    %130 = vector.load %arg6[%c0_66, %c0_67, %c32] : memref<1x8x64xbf16, #tpu.memory_space<vmem>>, vector<1x8x16xbf16>
    %131 = vector.shape_cast %130 : vector<1x8x16xbf16> to vector<8x16xbf16>
    %132 = vector.shape_cast %129 : vector<8x16xbf16> to vector<1x8x16xbf16>
    tpu.vector_store %arg6[%c0_66, %c0_67, %c32], %132 {strides = array<i32>} : memref<1x8x64xbf16, #tpu.memory_space<vmem>>, vector<1x8x16xbf16>,
    %133 = arith.truncf %120 : vector<8x16xf32> to vector<8x16xbf16>
    %c0_68 = arith.constant 0 : index
    %c0_69 = arith.constant 0 : index
    %c48 = arith.constant 48 : index
    %134 = vector.load %arg6[%c0_68, %c0_69, %c48] : memref<1x8x64xbf16, #tpu.memory_space<vmem>>, vector<1x8x16xbf16>
    %135 = vector.shape_cast %134 : vector<1x8x16xbf16> to vector<8x16xbf16>
    %136 = vector.shape_cast %133 : vector<8x16xbf16> to vector<1x8x16xbf16>
    tpu.vector_store %arg6[%c0_68, %c0_69, %c48], %136 {strides = array<i32>} : memref<1x8x64xbf16, #tpu.memory_space<vmem>>, vector<1x8x16xbf16>,
    return
  }
  func.func @transform_0(%arg0: i32) -> (i32, i32, i32, i32) {
    %c0_i32 = arith.constant 0 : i32
    %c0_i32_0 = arith.constant 0 : i32
    %c0_i32_1 = arith.constant 0 : i32
    %c0_i32_2 = arith.constant 0 : i32
    return %arg0, %c0_i32, %c0_i32_0, %c0_i32_1 : i32, i32, i32, i32
  }
  func.func @transform_1(%arg0: i32) -> (i32, i32, i32) {
    %c0_i32 = arith.constant 0 : i32
    %c0_i32_0 = arith.constant 0 : i32
    %c0_i32_1 = arith.constant 0 : i32
    %c0_i32_2 = arith.constant 0 : i32
    return %c0_i32, %c0_i32_0, %c0_i32_1 : i32, i32, i32
  }
  func.func @transform_2(%arg0: i32) -> (i32, i32, i32) {
    %c0_i32 = arith.constant 0 : i32
    %c0_i32_0 = arith.constant 0 : i32
    %c0_i32_1 = arith.constant 0 : i32
    return %arg0, %c0_i32, %c0_i32_0 : i32, i32, i32
  }
  func.func @transform_3(%arg0: i32) -> (i32, i32) {
    %c0_i32 = arith.constant 0 : i32
    %c0_i32_0 = arith.constant 0 : i32
    %c0_i32_1 = arith.constant 0 : i32
    return %c0_i32, %c0_i32_0 : i32, i32
  }
  func.func @transform_4(%arg0: i32) -> (i32, i32) {
    %c0_i32 = arith.constant 0 : i32
    %c0_i32_0 = arith.constant 0 : i32
    %c0_i32_1 = arith.constant 0 : i32
    return %c0_i32, %c0_i32_0 : i32, i32
  }
  func.func @transform_5(%arg0: i32) -> (i32, i32, i32) {
    %c0_i32 = arith.constant 0 : i32
    %c0_i32_0 = arith.constant 0 : i32
    %c0_i32_1 = arith.constant 0 : i32
    return %arg0, %c0_i32, %c0_i32_0 : i32, i32, i32
  }
}

module attributes {stable_mosaic.version = 11 : i64} {
  func.func @_layer_kernel(%arg0: i32, %arg1: memref<1x4x32x64xbf16, #tpu.memory_space<vmem>>, %arg2: memref<4x8x32xbf16, #tpu.memory_space<vmem>>, %arg3: memref<1x36x256xbf16, #tpu.memory_space<vmem>>, %arg4: memref<8x36xbf16, #tpu.memory_space<vmem>>, %arg5: memref<256x256xf32, #tpu.memory_space<vmem>>, %arg6: memref<1x8x256xbf16, #tpu.memory_space<vmem>>) attributes {dimension_semantics = [#tpu.dimension_semantics<parallel>], iteration_bounds = array<i64: 2>, scalar_prefetch = 0 : i64, scratch_operands = 0 : i64, tpu.core_type = #tpu.core_type<tc>, window_params = [{transform_indices = @transform_0, window_bounds = array<i64: 1, 4, 32, 64>}, {pipeline_mode = #tpu.pipeline_mode<synchronous>, transform_indices = @transform_1, window_bounds = array<i64: 4, 8, 32>}, {transform_indices = @transform_2, window_bounds = array<i64: 1, 36, 256>}, {pipeline_mode = #tpu.pipeline_mode<synchronous>, transform_indices = @transform_3, window_bounds = array<i64: 8, 36>}, {pipeline_mode = #tpu.pipeline_mode<synchronous>, transform_indices = @transform_4, window_bounds = array<i64: 256, 256>}, {transform_indices = @transform_5, window_bounds = array<i64: 1, 8, 256>}]} {
    %c0 = arith.constant 0 : index
    %c0_0 = arith.constant 0 : index
    %c0_1 = arith.constant 0 : index
    %0 = vector.load %arg2[%c0, %c0_0, %c0_1] : memref<4x8x32xbf16, #tpu.memory_space<vmem>>, vector<1x8x32xbf16>
    %1 = vector.shape_cast %0 : vector<1x8x32xbf16> to vector<8x32xbf16>
    %c0_2 = arith.constant 0 : index
    %c0_3 = arith.constant 0 : index
    %c0_4 = arith.constant 0 : index
    %c0_5 = arith.constant 0 : index
    %2 = vector.load %arg1[%c0_2, %c0_3, %c0_4, %c0_5] : memref<1x4x32x64xbf16, #tpu.memory_space<vmem>>, vector<1x1x32x64xbf16>
    %3 = vector.shape_cast %2 : vector<1x1x32x64xbf16> to vector<32x64xbf16>
    %cst = arith.constant dense<0.000000e+00> : vector<8x64xf32>
    %4 = tpu.matmul %1, %3, %cst {dimension_numbers = #tpu.dot_dimension_numbers<[1], [0], [0], [1], [0, 0, 1, 1], [], []>} : vector<8x32xbf16>, vector<32x64xbf16>, vector<8x64xf32> -> vector<8x64xf32>
    %c1 = arith.constant 1 : index
    %c0_6 = arith.constant 0 : index
    %c0_7 = arith.constant 0 : index
    %5 = vector.load %arg2[%c1, %c0_6, %c0_7] : memref<4x8x32xbf16, #tpu.memory_space<vmem>>, vector<1x8x32xbf16>
    %6 = vector.shape_cast %5 : vector<1x8x32xbf16> to vector<8x32xbf16>
    %c0_8 = arith.constant 0 : index
    %c1_9 = arith.constant 1 : index
    %c0_10 = arith.constant 0 : index
    %c0_11 = arith.constant 0 : index
    %7 = vector.load %arg1[%c0_8, %c1_9, %c0_10, %c0_11] : memref<1x4x32x64xbf16, #tpu.memory_space<vmem>>, vector<1x1x32x64xbf16>
    %8 = vector.shape_cast %7 : vector<1x1x32x64xbf16> to vector<32x64xbf16>
    %cst_12 = arith.constant dense<0.000000e+00> : vector<8x64xf32>
    %9 = tpu.matmul %6, %8, %cst_12 {dimension_numbers = #tpu.dot_dimension_numbers<[1], [0], [0], [1], [0, 0, 1, 1], [], []>} : vector<8x32xbf16>, vector<32x64xbf16>, vector<8x64xf32> -> vector<8x64xf32>
    %c2 = arith.constant 2 : index
    %c0_13 = arith.constant 0 : index
    %c0_14 = arith.constant 0 : index
    %10 = vector.load %arg2[%c2, %c0_13, %c0_14] : memref<4x8x32xbf16, #tpu.memory_space<vmem>>, vector<1x8x32xbf16>
    %11 = vector.shape_cast %10 : vector<1x8x32xbf16> to vector<8x32xbf16>
    %c0_15 = arith.constant 0 : index
    %c2_16 = arith.constant 2 : index
    %c0_17 = arith.constant 0 : index
    %c0_18 = arith.constant 0 : index
    %12 = vector.load %arg1[%c0_15, %c2_16, %c0_17, %c0_18] : memref<1x4x32x64xbf16, #tpu.memory_space<vmem>>, vector<1x1x32x64xbf16>
    %13 = vector.shape_cast %12 : vector<1x1x32x64xbf16> to vector<32x64xbf16>
    %cst_19 = arith.constant dense<0.000000e+00> : vector<8x64xf32>
    %14 = tpu.matmul %11, %13, %cst_19 {dimension_numbers = #tpu.dot_dimension_numbers<[1], [0], [0], [1], [0, 0, 1, 1], [], []>} : vector<8x32xbf16>, vector<32x64xbf16>, vector<8x64xf32> -> vector<8x64xf32>
    %c3 = arith.constant 3 : index
    %c0_20 = arith.constant 0 : index
    %c0_21 = arith.constant 0 : index
    %15 = vector.load %arg2[%c3, %c0_20, %c0_21] : memref<4x8x32xbf16, #tpu.memory_space<vmem>>, vector<1x8x32xbf16>
    %16 = vector.shape_cast %15 : vector<1x8x32xbf16> to vector<8x32xbf16>
    %c0_22 = arith.constant 0 : index
    %c3_23 = arith.constant 3 : index
    %c0_24 = arith.constant 0 : index
    %c0_25 = arith.constant 0 : index
    %17 = vector.load %arg1[%c0_22, %c3_23, %c0_24, %c0_25] : memref<1x4x32x64xbf16, #tpu.memory_space<vmem>>, vector<1x1x32x64xbf16>
    %18 = vector.shape_cast %17 : vector<1x1x32x64xbf16> to vector<32x64xbf16>
    %cst_26 = arith.constant dense<0.000000e+00> : vector<8x64xf32>
    %19 = tpu.matmul %16, %18, %cst_26 {dimension_numbers = #tpu.dot_dimension_numbers<[1], [0], [0], [1], [0, 0, 1, 1], [], []>} : vector<8x32xbf16>, vector<32x64xbf16>, vector<8x64xf32> -> vector<8x64xf32>
    %cst_27 = arith.constant dense<0.000000e+00> : vector<8xf32>
    %20 = vector.multi_reduction <add>, %4, %cst_27 [1] : vector<8x64xf32> to vector<8xf32>
    %21 = vector.shape_cast %20 : vector<8xf32> to vector<8x1xf32>
    %cst_28 = arith.constant 0.000000e+00 : f32
    %22 = vector.broadcast %cst_28 : f32 to vector<8x1xf32>
    %23 = arith.addf %22, %21 : vector<8x1xf32>
    %cst_29 = arith.constant dense<0.000000e+00> : vector<8xf32>
    %24 = vector.multi_reduction <add>, %9, %cst_29 [1] : vector<8x64xf32> to vector<8xf32>
    %25 = vector.shape_cast %24 : vector<8xf32> to vector<8x1xf32>
    %26 = arith.addf %23, %25 : vector<8x1xf32>
    %cst_30 = arith.constant dense<0.000000e+00> : vector<8xf32>
    %27 = vector.multi_reduction <add>, %14, %cst_30 [1] : vector<8x64xf32> to vector<8xf32>
    %28 = vector.shape_cast %27 : vector<8xf32> to vector<8x1xf32>
    %29 = arith.addf %26, %28 : vector<8x1xf32>
    %cst_31 = arith.constant dense<0.000000e+00> : vector<8xf32>
    %30 = vector.multi_reduction <add>, %19, %cst_31 [1] : vector<8x64xf32> to vector<8xf32>
    %31 = vector.shape_cast %30 : vector<8xf32> to vector<8x1xf32>
    %32 = arith.addf %29, %31 : vector<8x1xf32>
    %33 = arith.mulf %4, %4 : vector<8x64xf32>
    %cst_32 = arith.constant dense<0.000000e+00> : vector<8xf32>
    %34 = vector.multi_reduction <add>, %33, %cst_32 [1] : vector<8x64xf32> to vector<8xf32>
    %35 = vector.shape_cast %34 : vector<8xf32> to vector<8x1xf32>
    %cst_33 = arith.constant 0.000000e+00 : f32
    %36 = vector.broadcast %cst_33 : f32 to vector<8x1xf32>
    %37 = arith.addf %36, %35 : vector<8x1xf32>
    %38 = arith.mulf %9, %9 : vector<8x64xf32>
    %cst_34 = arith.constant dense<0.000000e+00> : vector<8xf32>
    %39 = vector.multi_reduction <add>, %38, %cst_34 [1] : vector<8x64xf32> to vector<8xf32>
    %40 = vector.shape_cast %39 : vector<8xf32> to vector<8x1xf32>
    %41 = arith.addf %37, %40 : vector<8x1xf32>
    %42 = arith.mulf %14, %14 : vector<8x64xf32>
    %cst_35 = arith.constant dense<0.000000e+00> : vector<8xf32>
    %43 = vector.multi_reduction <add>, %42, %cst_35 [1] : vector<8x64xf32> to vector<8xf32>
    %44 = vector.shape_cast %43 : vector<8xf32> to vector<8x1xf32>
    %45 = arith.addf %41, %44 : vector<8x1xf32>
    %46 = arith.mulf %19, %19 : vector<8x64xf32>
    %cst_36 = arith.constant dense<0.000000e+00> : vector<8xf32>
    %47 = vector.multi_reduction <add>, %46, %cst_36 [1] : vector<8x64xf32> to vector<8xf32>
    %48 = vector.shape_cast %47 : vector<8xf32> to vector<8x1xf32>
    %49 = arith.addf %45, %48 : vector<8x1xf32>
    %cst_37 = arith.constant 3.906250e-03 : f32
    %50 = vector.broadcast %cst_37 : f32 to vector<8x1xf32>
    %51 = arith.mulf %32, %50 : vector<8x1xf32>
    %cst_38 = arith.constant 3.906250e-03 : f32
    %52 = vector.broadcast %cst_38 : f32 to vector<8x1xf32>
    %53 = arith.mulf %49, %52 : vector<8x1xf32>
    %54 = arith.mulf %51, %51 : vector<8x1xf32>
    %55 = arith.subf %53, %54 : vector<8x1xf32>
    %cst_39 = arith.constant 0.000000e+00 : f32
    %56 = vector.broadcast %cst_39 : f32 to vector<8x1xf32>
    %57 = arith.maximumf %55, %56 : vector<8x1xf32>
    %cst_40 = arith.constant 9.99999974E-6 : f32
    %58 = vector.broadcast %cst_40 : f32 to vector<8x1xf32>
    %59 = arith.addf %57, %58 : vector<8x1xf32>
    %60 = math.rsqrt %59 : vector<8x1xf32>
    %61 = vector.broadcast %51 : vector<8x1xf32> to vector<8x64xf32>
    %62 = arith.subf %4, %61 : vector<8x64xf32>
    %63 = vector.broadcast %60 : vector<8x1xf32> to vector<8x64xf32>
    %64 = arith.mulf %62, %63 : vector<8x64xf32>
    %65 = vector.broadcast %51 : vector<8x1xf32> to vector<8x64xf32>
    %66 = arith.subf %9, %65 : vector<8x64xf32>
    %67 = vector.broadcast %60 : vector<8x1xf32> to vector<8x64xf32>
    %68 = arith.mulf %66, %67 : vector<8x64xf32>
    %69 = vector.broadcast %51 : vector<8x1xf32> to vector<8x64xf32>
    %70 = arith.subf %14, %69 : vector<8x64xf32>
    %71 = vector.broadcast %60 : vector<8x1xf32> to vector<8x64xf32>
    %72 = arith.mulf %70, %71 : vector<8x64xf32>
    %73 = vector.broadcast %51 : vector<8x1xf32> to vector<8x64xf32>
    %74 = arith.subf %19, %73 : vector<8x64xf32>
    %75 = vector.broadcast %60 : vector<8x1xf32> to vector<8x64xf32>
    %76 = arith.mulf %74, %75 : vector<8x64xf32>
    %cst_41 = arith.constant 0.000000e+00 : f32
    %77 = vector.broadcast %cst_41 : f32 to vector<8x64xf32>
    %78 = arith.maximumf %64, %77 : vector<8x64xf32>
    %cst_42 = arith.constant 0.000000e+00 : f32
    %79 = vector.broadcast %cst_42 : f32 to vector<8x64xf32>
    %80 = arith.maximumf %68, %79 : vector<8x64xf32>
    %cst_43 = arith.constant 0.000000e+00 : f32
    %81 = vector.broadcast %cst_43 : f32 to vector<8x64xf32>
    %82 = arith.maximumf %72, %81 : vector<8x64xf32>
    %cst_44 = arith.constant 0.000000e+00 : f32
    %83 = vector.broadcast %cst_44 : f32 to vector<8x64xf32>
    %84 = arith.maximumf %76, %83 : vector<8x64xf32>
    %c0_45 = arith.constant 0 : index
    %c0_46 = arith.constant 0 : index
    %85 = vector.load %arg4[%c0_45, %c0_46] : memref<8x36xbf16, #tpu.memory_space<vmem>>, vector<8x36xbf16>
    %c0_47 = arith.constant 0 : index
    %c0_48 = arith.constant 0 : index
    %c0_49 = arith.constant 0 : index
    %86 = vector.load %arg3[%c0_47, %c0_48, %c0_49] : memref<1x36x256xbf16, #tpu.memory_space<vmem>>, vector<1x36x256xbf16>
    %87 = vector.shape_cast %86 : vector<1x36x256xbf16> to vector<36x256xbf16>
    %cst_50 = arith.constant dense<0.000000e+00> : vector<8x256xf32>
    %88 = tpu.matmul %85, %87, %cst_50 {dimension_numbers = #tpu.dot_dimension_numbers<[1], [0], [0], [1], [0, 0, 1, 1], [], []>} : vector<8x36xbf16>, vector<36x256xbf16>, vector<8x256xf32> -> vector<8x256xf32>
    %cst_51 = arith.constant dense<0.000000e+00> : vector<8xf32>
    %89 = vector.multi_reduction <add>, %88, %cst_51 [1] : vector<8x256xf32> to vector<8xf32>
    %90 = vector.shape_cast %89 : vector<8xf32> to vector<8x1xf32>
    %cst_52 = arith.constant 2.560000e+02 : f32
    %91 = vector.broadcast %cst_52 : f32 to vector<8x1xf32>
    %92 = arith.divf %90, %91 : vector<8x1xf32>
    %93 = arith.mulf %88, %88 : vector<8x256xf32>
    %cst_53 = arith.constant dense<0.000000e+00> : vector<8xf32>
    %94 = vector.multi_reduction <add>, %93, %cst_53 [1] : vector<8x256xf32> to vector<8xf32>
    %95 = vector.shape_cast %94 : vector<8xf32> to vector<8x1xf32>
    %cst_54 = arith.constant 2.560000e+02 : f32
    %96 = vector.broadcast %cst_54 : f32 to vector<8x1xf32>
    %97 = arith.divf %95, %96 : vector<8x1xf32>
    %98 = arith.mulf %92, %92 : vector<8x1xf32>
    %99 = arith.subf %97, %98 : vector<8x1xf32>
    %cst_55 = arith.constant 0.000000e+00 : f32
    %100 = vector.broadcast %cst_55 : f32 to vector<8x1xf32>
    %101 = arith.maximumf %99, %100 : vector<8x1xf32>
    %102 = vector.broadcast %92 : vector<8x1xf32> to vector<8x256xf32>
    %103 = arith.subf %88, %102 : vector<8x256xf32>
    %cst_56 = arith.constant 9.99999974E-6 : f32
    %104 = vector.broadcast %cst_56 : f32 to vector<8x1xf32>
    %105 = arith.addf %101, %104 : vector<8x1xf32>
    %106 = math.rsqrt %105 : vector<8x1xf32>
    %107 = vector.broadcast %106 : vector<8x1xf32> to vector<8x256xf32>
    %108 = arith.mulf %103, %107 : vector<8x256xf32>
    %c0_57 = arith.constant 0 : index
    %c0_58 = arith.constant 0 : index
    %109 = vector.load %arg5[%c0_57, %c0_58] : memref<256x256xf32, #tpu.memory_space<vmem>>, vector<256x256xf32>
    %cst_59 = arith.constant dense<0.000000e+00> : vector<8x256xf32>
    %110 = tpu.matmul %108, %109, %cst_59 {dimension_numbers = #tpu.dot_dimension_numbers<[1], [0], [0], [1], [0, 0, 1, 1], [], []>} : vector<8x256xf32>, vector<256x256xf32>, vector<8x256xf32> -> vector<8x256xf32>
    %cst_60 = arith.constant 0.000000e+00 : f32
    %111 = vector.broadcast %cst_60 : f32 to vector<8x256xf32>
    %112 = arith.maximumf %110, %111 : vector<8x256xf32>
    %113 = vector.extract_strided_slice %112 {offsets = [0, 0], sizes = [8, 64], strides = [1, 1]} : vector<8x256xf32> to vector<8x64xf32>
    %114 = arith.mulf %78, %113 : vector<8x64xf32>
    %115 = vector.extract_strided_slice %112 {offsets = [0, 64], sizes = [8, 64], strides = [1, 1]} : vector<8x256xf32> to vector<8x64xf32>
    %116 = arith.mulf %80, %115 : vector<8x64xf32>
    %117 = vector.extract_strided_slice %112 {offsets = [0, 128], sizes = [8, 64], strides = [1, 1]} : vector<8x256xf32> to vector<8x64xf32>
    %118 = arith.mulf %82, %117 : vector<8x64xf32>
    %119 = vector.extract_strided_slice %112 {offsets = [0, 192], sizes = [8, 64], strides = [1, 1]} : vector<8x256xf32> to vector<8x64xf32>
    %120 = arith.mulf %84, %119 : vector<8x64xf32>
    %121 = arith.truncf %114 : vector<8x64xf32> to vector<8x64xbf16>
    %c0_61 = arith.constant 0 : index
    %c0_62 = arith.constant 0 : index
    %c0_63 = arith.constant 0 : index
    %122 = vector.load %arg6[%c0_61, %c0_62, %c0_63] : memref<1x8x256xbf16, #tpu.memory_space<vmem>>, vector<1x8x64xbf16>
    %123 = vector.shape_cast %122 : vector<1x8x64xbf16> to vector<8x64xbf16>
    %124 = vector.shape_cast %121 : vector<8x64xbf16> to vector<1x8x64xbf16>
    tpu.vector_store %arg6[%c0_61, %c0_62, %c0_63], %124 {strides = array<i32>} : memref<1x8x256xbf16, #tpu.memory_space<vmem>>, vector<1x8x64xbf16>,
    %125 = arith.truncf %116 : vector<8x64xf32> to vector<8x64xbf16>
    %c0_64 = arith.constant 0 : index
    %c0_65 = arith.constant 0 : index
    %c64 = arith.constant 64 : index
    %126 = vector.load %arg6[%c0_64, %c0_65, %c64] : memref<1x8x256xbf16, #tpu.memory_space<vmem>>, vector<1x8x64xbf16>
    %127 = vector.shape_cast %126 : vector<1x8x64xbf16> to vector<8x64xbf16>
    %128 = vector.shape_cast %125 : vector<8x64xbf16> to vector<1x8x64xbf16>
    tpu.vector_store %arg6[%c0_64, %c0_65, %c64], %128 {strides = array<i32>} : memref<1x8x256xbf16, #tpu.memory_space<vmem>>, vector<1x8x64xbf16>,
    %129 = arith.truncf %118 : vector<8x64xf32> to vector<8x64xbf16>
    %c0_66 = arith.constant 0 : index
    %c0_67 = arith.constant 0 : index
    %c128 = arith.constant 128 : index
    %130 = vector.load %arg6[%c0_66, %c0_67, %c128] : memref<1x8x256xbf16, #tpu.memory_space<vmem>>, vector<1x8x64xbf16>
    %131 = vector.shape_cast %130 : vector<1x8x64xbf16> to vector<8x64xbf16>
    %132 = vector.shape_cast %129 : vector<8x64xbf16> to vector<1x8x64xbf16>
    tpu.vector_store %arg6[%c0_66, %c0_67, %c128], %132 {strides = array<i32>} : memref<1x8x256xbf16, #tpu.memory_space<vmem>>, vector<1x8x64xbf16>,
    %133 = arith.truncf %120 : vector<8x64xf32> to vector<8x64xbf16>
    %c0_68 = arith.constant 0 : index
    %c0_69 = arith.constant 0 : index
    %c192 = arith.constant 192 : index
    %134 = vector.load %arg6[%c0_68, %c0_69, %c192] : memref<1x8x256xbf16, #tpu.memory_space<vmem>>, vector<1x8x64xbf16>
    %135 = vector.shape_cast %134 : vector<1x8x64xbf16> to vector<8x64xbf16>
    %136 = vector.shape_cast %133 : vector<8x64xbf16> to vector<1x8x64xbf16>
    tpu.vector_store %arg6[%c0_68, %c0_69, %c192], %136 {strides = array<i32>} : memref<1x8x256xbf16, #tpu.memory_space<vmem>>, vector<1x8x64xbf16>,
    return
  }
  func.func @transform_0(%arg0: i32) -> (i32, i32, i32, i32) {
    %c0_i32 = arith.constant 0 : i32
    %c0_i32_0 = arith.constant 0 : i32
    %c0_i32_1 = arith.constant 0 : i32
    %c0_i32_2 = arith.constant 0 : i32
    return %arg0, %c0_i32, %c0_i32_0, %c0_i32_1 : i32, i32, i32, i32
  }
  func.func @transform_1(%arg0: i32) -> (i32, i32, i32) {
    %c0_i32 = arith.constant 0 : i32
    %c0_i32_0 = arith.constant 0 : i32
    %c0_i32_1 = arith.constant 0 : i32
    %c0_i32_2 = arith.constant 0 : i32
    return %c0_i32, %c0_i32_0, %c0_i32_1 : i32, i32, i32
  }
  func.func @transform_2(%arg0: i32) -> (i32, i32, i32) {
    %c0_i32 = arith.constant 0 : i32
    %c0_i32_0 = arith.constant 0 : i32
    %c0_i32_1 = arith.constant 0 : i32
    return %arg0, %c0_i32, %c0_i32_0 : i32, i32, i32
  }
  func.func @transform_3(%arg0: i32) -> (i32, i32) {
    %c0_i32 = arith.constant 0 : i32
    %c0_i32_0 = arith.constant 0 : i32
    %c0_i32_1 = arith.constant 0 : i32
    return %c0_i32, %c0_i32_0 : i32, i32
  }
  func.func @transform_4(%arg0: i32) -> (i32, i32) {
    %c0_i32 = arith.constant 0 : i32
    %c0_i32_0 = arith.constant 0 : i32
    %c0_i32_1 = arith.constant 0 : i32
    return %c0_i32, %c0_i32_0 : i32, i32
  }
  func.func @transform_5(%arg0: i32) -> (i32, i32, i32) {
    %c0_i32 = arith.constant 0 : i32
    %c0_i32_0 = arith.constant 0 : i32
    %c0_i32_1 = arith.constant 0 : i32
    return %arg0, %c0_i32, %c0_i32_0 : i32, i32, i32
  }
}

module attributes {stable_mosaic.version = 11 : i64} {
  func.func @_layer_kernel(%arg0: i32, %arg1: memref<1x1x72x256xbf16, #tpu.memory_space<vmem>>, %arg2: memref<1x3x72xbf16, #tpu.memory_space<vmem>>, %arg3: memref<1x3x256xf32, #tpu.memory_space<vmem>>) attributes {dimension_semantics = [#tpu.dimension_semantics<parallel>], iteration_bounds = array<i64: 2>, scalar_prefetch = 0 : i64, scratch_operands = 0 : i64, tpu.core_type = #tpu.core_type<tc>, window_params = [{transform_indices = @transform_0, window_bounds = array<i64: 1, 1, 72, 256>}, {pipeline_mode = #tpu.pipeline_mode<synchronous>, transform_indices = @transform_1, window_bounds = array<i64: 1, 3, 72>}, {transform_indices = @transform_2, window_bounds = array<i64: 1, 3, 256>}]} {
    %c0 = arith.constant 0 : index
    %c0_0 = arith.constant 0 : index
    %c0_1 = arith.constant 0 : index
    %0 = vector.load %arg2[%c0, %c0_0, %c0_1] : memref<1x3x72xbf16, #tpu.memory_space<vmem>>, vector<1x3x72xbf16>
    %1 = vector.shape_cast %0 : vector<1x3x72xbf16> to vector<3x72xbf16>
    %c0_2 = arith.constant 0 : index
    %c0_3 = arith.constant 0 : index
    %c0_4 = arith.constant 0 : index
    %c0_5 = arith.constant 0 : index
    %2 = vector.load %arg1[%c0_2, %c0_3, %c0_4, %c0_5] : memref<1x1x72x256xbf16, #tpu.memory_space<vmem>>, vector<1x1x72x256xbf16>
    %3 = vector.shape_cast %2 : vector<1x1x72x256xbf16> to vector<72x256xbf16>
    %cst = arith.constant dense<0.000000e+00> : vector<3x256xf32>
    %4 = tpu.matmul %1, %3, %cst {dimension_numbers = #tpu.dot_dimension_numbers<[1], [0], [0], [1], [0, 0, 1, 1], [], []>} : vector<3x72xbf16>, vector<72x256xbf16>, vector<3x256xf32> -> vector<3x256xf32>
    %5 = arith.negf %4 : vector<3x256xf32>
    %6 = math.exp %5 : vector<3x256xf32>
    %cst_6 = arith.constant 1.000000e+00 : f32
    %7 = vector.broadcast %cst_6 : f32 to vector<3x256xf32>
    %8 = arith.addf %7, %6 : vector<3x256xf32>
    %9 = arith.divf %7, %8 : vector<3x256xf32>
    %c0_7 = arith.constant 0 : index
    %c0_8 = arith.constant 0 : index
    %c0_9 = arith.constant 0 : index
    %10 = vector.load %arg3[%c0_7, %c0_8, %c0_9] : memref<1x3x256xf32, #tpu.memory_space<vmem>>, vector<1x3x256xf32>
    %11 = vector.shape_cast %10 : vector<1x3x256xf32> to vector<3x256xf32>
    %12 = vector.shape_cast %9 : vector<3x256xf32> to vector<1x3x256xf32>
    tpu.vector_store %arg3[%c0_7, %c0_8, %c0_9], %12 {strides = array<i32>} : memref<1x3x256xf32, #tpu.memory_space<vmem>>, vector<1x3x256xf32>,
    return
  }
  func.func @transform_0(%arg0: i32) -> (i32, i32, i32, i32) {
    %c0_i32 = arith.constant 0 : i32
    %c0_i32_0 = arith.constant 0 : i32
    %c0_i32_1 = arith.constant 0 : i32
    %c0_i32_2 = arith.constant 0 : i32
    return %arg0, %c0_i32, %c0_i32_0, %c0_i32_1 : i32, i32, i32, i32
  }
  func.func @transform_1(%arg0: i32) -> (i32, i32, i32) {
    %c0_i32 = arith.constant 0 : i32
    %c0_i32_0 = arith.constant 0 : i32
    %c0_i32_1 = arith.constant 0 : i32
    %c0_i32_2 = arith.constant 0 : i32
    return %c0_i32, %c0_i32_0, %c0_i32_1 : i32, i32, i32
  }
  func.func @transform_2(%arg0: i32) -> (i32, i32, i32) {
    %c0_i32 = arith.constant 0 : i32
    %c0_i32_0 = arith.constant 0 : i32
    %c0_i32_1 = arith.constant 0 : i32
    return %arg0, %c0_i32, %c0_i32_0 : i32, i32, i32
  }
}

</mosaic_0001>

<bundles_post_ra>
// kernel: forward.6
= control target key start
LH: loop header
LB: loop body
LE: loop exit
PB: predicated region body
PF: predicated region fallthrough
CT: control target
= control target key end

     0   :  { %s380_s9 = smov 0   ;;  %s404_s0 = inlined_call_operand.vmem [shape: bf16[2,1,36,256], index: 0, kind: input, shape index: {}]   ;;  %s405_s1 = inlined_call_operand.vmem [shape: bf16[1,8,36], index: 1, kind: input, shape index: {}]   ;;  %s406_s2 = inlined_call_operand.vmem [shape: bf16[2,8,256], index: 2, kind: output, shape index: {}]  }
   0x1 LB: > { %s315_s10 = sadd.s32 4294967295, %s362_s9   ;;  %p319_p0 = scmp.ge.s32.totalorder %s362_s9, 1  ;;  %s362_s9 = sphi %s380_s9, %s12_s9  }
   0x2   : > { %p112_p1 = scmp.lt.s32.totalorder %s362_s9, 3 }
   0x4   : > { %p113_p2 = pnand %p319_p0, %p112_p1 }
   0x5   : > { %p134_p3 = scmp.lt.s32.totalorder (!%p113_p2), %s315_s10, 1 }
   0x6   : > { %116 = sbr.rel (%p113_p2) target bundleno = 398 (0x18e), region = 28 }
   0xb   : > { %v364_v0 = vmov 0   ;;  %s408_s10 = smov (!%p134_p3, %s315_s10), 1  ;;  %vm180_vm0 = vcmask 1041408   ;;  %v145_v9 = vld [vmem:[%s405_s1] sm:$0xf]  ;;  %vm176_vm1 = vcmask 293888  }
   0xc   : > { %219 = vmatprep.mubr.bf16.mxu0 %v364_v0  ;;  %s336_s11 = smul.u32 40, %s408_s10  ;;  %s334_s17 = sshll.u32 %s408_s10, 3 }
   0xd   : > { %s143_s20 = scalar_lea.vmem %s406_s2, %s334_s17 }
   0xe   : > { %s138_s14 = scalar_lea.vmem %s404_s0, %s336_s11 }
   0xf   : > { %v150_v1 = vld [vmem:[%s138_s14 + $0x20] sm:$0x33]  ;;  %v348_v4 = vld [vmem:[%s138_s14 + $0x14] ss:$8 sps:$4 sm:$0xff]   ;;  %v350_v6 = vld [vmem:[%s138_s14 + $0x10] ss:$8 sps:$4 sm:$0xff]  }
  0x10   : > { %v328_v2 = vcombine.high %v150_v1, %v150_v1  ;;  %v327_v3 = vcombine.low %v150_v1, %v150_v1  ;;  %v351_v7 = vld [vmem:[%s138_s14 + $0x4] ss:$8 sps:$4 sm:$0xff]   ;;  %v353_v8 = vld [vmem:[%s138_s14] ss:$8 sps:$4 sm:$0xff]  }
  0x12   : > { %329 = vmatprep.subr.msk.bf16.mxu0 %vm180_vm0, %v328_v2  ;;  %v182_v5 = vsel %vm180_vm0, %v327_v3, 0 }
  0x13   : > { %198 = vmatpush1.bf16.msra.mxu0 %v182_v5 }
  0x14   : > { %199 = vmatprep.subr.bf16.mxu0 %v348_v4 }
  0x17   : > { %200 = vmatpush1.bf16.msra.mxu0 %v350_v6 }
  0x18   : > { %201 = vmatprep.subr.bf16.mxu0 %v351_v7 }
  0x1b   : > { %202 = vmatpush1.bf16.msra.mxu0 %v353_v8 }
  0x1e   : > { %330 = vmatmul.mubr.msk.bf16.vlgmr.msra.gmra.mxu0 %vm176_vm1, %v145_v9 }
  0xde   : > { %v221_v10 = vpop.f32.mrf.mxu0 }
  0xdf   : > { %v232_v15 = vmul.f32 %v221_v10, %v221_v10 }
  0xe0   : > { %v223_v11 = vpop.f32.mrf.mxu0 }
  0xe1   : > { %v228_v12 = vadd.f32 %v223_v11, %v221_v10  ;;  %v233_v13 = vmul.f32 %v223_v11, %v223_v11 }
  0xe2   : > { %v225_v14 = vpop.f32.mrf.mxu0 }
  0xe3   : > { %229 = vadd.xlane.f32.xlu0 %v228_v12  ;;  %v234_v17 = vadd.f32 %v233_v13, %v232_v15 }
  0xe4   : > { %v226_v16 = vpop.f32.mrf.mxu0 }
  0xe7   : > { %235 = vadd.xlane.f32.xlu0 %v234_v17 }
 0x16c   : > { %v230_v18 = vpop.xlane.xlu0 %229 }
 0x16d   : > { %v238_v19 = vmul.f32 0.00390625, %v230_v18 }
 0x16f   : > { %v240_v21 = vmul.f32 %v238_v19, %v238_v19  ;;  %v245_v26 = vsub.f32 %v221_v10, %v238_v19  ;;  %v246_v27 = vsub.f32 %v223_v11, %v238_v19 }
 0x170   : > { %v236_v20 = vpop.xlane.xlu0 %235 }
 0x171   : > { %v239_v22 = vmul.f32 0.00390625, %v236_v20 }
 0x173   : > { %v241_v23 = vsub.f32 %v239_v22, %v240_v21 }
 0x175   : > { %v242_v24 = vmax.f32 %v241_v23, 0.0 }
 0x177   : > { %v243_v25 = vadd.f32 1e-05, %v242_v24 }
 0x179   : > { %354 = vrsqrt.f32 %v243_v25 }
 0x186   : > { %v355_v28 = vpop.eup %354 }
 0x187   : > { %v247_v29 = vmul.f32 %v355_v28, %v245_v26  ;;  %v248_v30 = vmul.f32 %v355_v28, %v246_v27 }
 0x189   : > { %v249_v31 = vmax.f32 %v247_v29, 0.0  ;;  %v250_v32 = vmax.f32 %v248_v30, 0.0 }
 0x18b   : > { %v335_v33 = vpack.c.bf16 %v250_v32, %v249_v31 }
 0x18d   : > { %259 = vst [vmem:[%s143_s20] sm:$0xff] %v335_v33 }
 0x18e PF: > { %s12_s9 = sadd.s32 1, %s362_s9  }
 0x18f   : > { %p9_p4 = scmp.ge.s32.totalorder %s12_s9, 4  }
 0x191   :  { %11 = sbr.rel (!%p9_p4) target bundleno = 1 (0x1), region = 58 }

// kernel: forward.7
= control target key start
LH: loop header
LB: loop body
LE: loop exit
PB: predicated region body
PF: predicated region fallthrough
CT: control target
= control target key end

     0   :  { %s799_s18 = smov 0   ;;  %s988_s0 = inlined_call_operand.vmem [shape: bf16[2,1,128,64], index: 0, kind: input, shape index: {}]   ;;  %s989_s1 = inlined_call_operand.vmem [shape: bf16[1,8,128], index: 1, kind: input, shape index: {}]   ;;  %s990_s2 = inlined_call_operand.vmem [shape: bf16[2,64,225], index: 2, kind: input, shape index: {}]   ;;  %s991_s3 = inlined_call_operand.vmem [shape: bf16[8,64], index: 3, kind: input, shape index: {}]   ;;  %s992_s4 = inlined_call_operand.vmem [shape: f32[225,64], index: 4, kind: input, shape index: {}]   ;;  %s993_s5 = inlined_call_operand.vmem [shape: bf16[2,8,64], index: 5, kind: output, shape index: {}]  }
   0x1 LB: > { %s661_s19 = sadd.s32 4294967295, %s764_s18   ;;  %p665_p0 = scmp.ge.s32.totalorder %s764_s18, 1  ;;  %s764_s18 = sphi %s799_s18, %s15_s18  }
   0x2   : > { %p197_p1 = scmp.lt.s32.totalorder %s764_s18, 3 }
   0x4   : > { %p198_p2 = pnand %p665_p0, %p197_p1 }
   0x5   : > { %p229_p3 = scmp.lt.s32.totalorder (!%p198_p2), %s661_s19, 1 }
   0x6   : > { %201 = sbr.rel (%p198_p2) target bundleno = 627 (0x273), region = 40 }
   0xb   : > { %v766_v0 = vmov 0.0   ;;  %vm767_vm0 = vmmov 0   ;;  %s995_s19 = smov (!%p229_p3, %s661_s19), 1  ;;  %v244_v10 = vld [vmem:[%s989_s1] sm:$0xf]  ;;  %v768_v14 = vmov 0  }
   0xc   : > { %703 = vmatprep.subr.bf16.mxu0 %v766_v0  ;;  %719 = vmatprep.mubr.msk.bf16.mxu0 %vm767_vm0, %v766_v0  ;;  %s692_s20 = sshll.u32 %s995_s19, 6  ;;  %vm349_vm1 = vcmask 523264   ;;  %v369_v19 = vld [vmem:[%s991_s3] sm:$0xf]  ;;  %v500_v20 = vld [vmem:[%s992_s4 + $0x78] sm:$0xff]  ;;  %v499_v21 = vld [vmem:[%s992_s4 + $0x70] sm:$0xff] }
   0xd   : > { %521 = vmatprep.subr.mxu1 %v766_v0  ;;  %s233_s23 = scalar_lea.vmem %s988_s0, %s692_s20  ;;  %s821_s26 = scalar_lea.vmem %s990_s2, %s692_s20  ;;  %v498_v22 = vld [vmem:[%s992_s4 + $0x68] sm:$0xff]  ;;  %v497_v23 = vld [vmem:[%s992_s4 + $0x60] sm:$0xff]  ;;  %v496_v31 = vld [vmem:[%s992_s4 + $0x58] sm:$0xff]  ;;  %vm462_vm2 = vcmask 793600   ;;  %vm517_vm3 = vcmask 1040384   ;;  %vm594_vm4 = vcmask 519168  }
   0xe   : > { %v734_v1 = vld [vmem:[%s233_s23 + $0x38] sm:$0xff]   ;;  %v735_v2 = vld [vmem:[%s233_s23 + $0x30] sm:$0xff]   ;;  %v736_v3 = vld [vmem:[%s233_s23 + $0x28] sm:$0xff]   ;;  %522 = vmatpush1.msra.mxu1 %v500_v20  ;;  %s670_s20 = sshll.u32 %s995_s19, 2 }
   0xf   : > { %704 = vmatpush3.bf16.msra.mxu0 %v734_v1  ;;  %v737_v4 = vld [vmem:[%s233_s23 + $0x20] sm:$0xff]   ;;  %v738_v5 = vld [vmem:[%s233_s23 + $0x18] sm:$0xff]   ;;  %v739_v6 = vld [vmem:[%s233_s23 + $0x10] sm:$0xff]   ;;  %523 = vmatprep.subr.mxu1 %v766_v0 }
  0x10   : > { %705 = vmatprep.subr.bf16.mxu0 %v766_v0  ;;  %v740_v7 = vld [vmem:[%s233_s23 + $0x8] sm:$0xff]   ;;  %v741_v8 = vld [vmem:[%s233_s23] sm:$0xff]   ;;  %v744_v9 = vld [vmem:[%s821_s26 + $0x34] ss:$8 sps:$4 sm:$0xff]   ;;  %524 = vmatpush1.msra.mxu1 %v499_v21  ;;  %s242_s23 = scalar_lea.vmem %s993_s5, %s670_s20 }
  0x11   : > { %v742_v11 = vld [vmem:[%s821_s26 + $0x30] ss:$8 sps:$4 sm:$0xff]   ;;  %v747_v12 = vld [vmem:[%s821_s26 + $0x24] ss:$8 sps:$4 sm:$0xff]   ;;  %v745_v13 = vld [vmem:[%s821_s26 + $0x20] ss:$8 sps:$4 sm:$0xff]   ;;  %525 = vmatprep.subr.mxu1 %v766_v0 }
  0x12   : > { %v750_v15 = vld [vmem:[%s821_s26 + $0x14] ss:$8 sps:$4 sm:$0xff]   ;;  %v748_v16 = vld [vmem:[%s821_s26 + $0x10] ss:$8 sps:$4 sm:$0xff]   ;;  %v753_v17 = vld [vmem:[%s821_s26 + $0x4] ss:$8 sps:$4 sm:$0xff]   ;;  %526 = vmatpush1.msra.mxu1 %v498_v22 }
  0x13   : > { %706 = vmatpush3.bf16.msra.mxu0 %v735_v2  ;;  %v751_v18 = vld [vmem:[%s821_s26] ss:$8 sps:$4 sm:$0xff]   ;;  %527 = vmatprep.subr.mxu1 %v766_v0  ;;  %v495_v32 = vld [vmem:[%s992_s4 + $0x50] sm:$0xff]  ;;  %v492_v39 = vld [vmem:[%s992_s4 + $0x38] sm:$0xff] }
  0x14   : > { %707 = vmatprep.subr.bf16.mxu0 %v766_v0  ;;  %528 = vmatpush1.msra.mxu1 %v497_v23  ;;  %v494_v33 = vld [vmem:[%s992_s4 + $0x48] sm:$0xff]  ;;  %v493_v35 = vld [vmem:[%s992_s4 + $0x40] sm:$0xff]  ;;  %v491_v43 = vld [vmem:[%s992_s4 + $0x30] sm:$0xff] }
  0x15   : > { %529 = vmatprep.subr.mxu1 %v766_v0  ;;  %v490_v46 = vld [vmem:[%s992_s4 + $0x28] sm:$0xff]  ;;  %v489_v48 = vld [vmem:[%s992_s4 + $0x20] sm:$0xff]  ;;  %v488_v49 = vld [vmem:[%s992_s4 + $0x18] sm:$0xff] }
  0x16   : > { %530 = vmatpush1.msra.mxu1 %v496_v31  ;;  %v487_v50 = vld [vmem:[%s992_s4 + $0x10] sm:$0xff]  ;;  %v486_v51 = vld [vmem:[%s992_s4 + $0x8] sm:$0xff]  ;;  %v485_v52 = vld [vmem:[%s992_s4] sm:$0xff] }
  0x17   : > { %708 = vmatpush3.bf16.msra.mxu0 %v736_v3  ;;  %531 = vmatprep.subr.mxu1 %v766_v0  ;;  %v513_v53 = vld [vmem:[%s992_s4 + $0xe0] sm:$0x1]  ;;  %v512_v54 = vld [vmem:[%s992_s4 + $0xd8] sm:$0xff]  ;;  %v511_v55 = vld [vmem:[%s992_s4 + $0xd0] sm:$0xff] }
  0x18   : > { %709 = vmatprep.subr.bf16.mxu0 %v766_v0  ;;  %532 = vmatpush1.msra.mxu1 %v495_v32  ;;  %v510_v56 = vld [vmem:[%s992_s4 + $0xc8] sm:$0xff]  ;;  %v509_v57 = vld [vmem:[%s992_s4 + $0xc0] sm:$0xff]  ;;  %v508_v58 = vld [vmem:[%s992_s4 + $0xb8] sm:$0xff] }
  0x19   : > { %533 = vmatprep.subr.mxu1 %v766_v0  ;;  %v507_v59 = vld [vmem:[%s992_s4 + $0xb0] sm:$0xff]  ;;  %v506_v60 = vld [vmem:[%s992_s4 + $0xa8] sm:$0xff]  ;;  %v505_v61 = vld [vmem:[%s992_s4 + $0xa0] sm:$0xff] }
  0x1a   : > { %534 = vmatpush1.msra.mxu1 %v494_v33  ;;  %v504_v62 = vld [vmem:[%s992_s4 + $0x98] sm:$0xff]  ;;  %v503_v63 = vld [vmem:[%s992_s4 + $0x90] sm:$0xff]  ;;  %v502_v1 = vld [vmem:[%s992_s4 + $0x88] sm:$0xff] }
  0x1b   : > { %710 = vmatpush3.bf16.msra.mxu0 %v737_v4  ;;  %535 = vmatprep.subr.mxu1 %v766_v0  ;;  %v501_v2 = vld [vmem:[%s992_s4 + $0x80] sm:$0xff] }
  0x1c   : > { %711 = vmatprep.subr.bf16.mxu0 %v766_v0  ;;  %536 = vmatpush1.msra.mxu1 %v493_v35 }
  0x1d   : > { %537 = vmatprep.subr.mxu1 %v766_v0 }
  0x1e   : > { %538 = vmatpush1.msra.mxu1 %v492_v39 }
  0x1f   : > { %712 = vmatpush3.bf16.msra.mxu0 %v738_v5  ;;  %539 = vmatprep.subr.mxu1 %v766_v0 }
  0x20   : > { %713 = vmatprep.subr.bf16.mxu0 %v766_v0  ;;  %540 = vmatpush1.msra.mxu1 %v491_v43 }
  0x21   : > { %541 = vmatprep.subr.mxu1 %v766_v0 }
  0x22   : > { %542 = vmatpush1.msra.mxu1 %v490_v46 }
  0x23   : > { %714 = vmatpush3.bf16.msra.mxu0 %v739_v6  ;;  %543 = vmatprep.subr.mxu1 %v766_v0 }
  0x24   : > { %715 = vmatprep.subr.bf16.mxu0 %v766_v0  ;;  %544 = vmatpush1.msra.mxu1 %v489_v48 }
  0x25   : > { %545 = vmatprep.subr.mxu1 %v766_v0 }
  0x26   : > { %546 = vmatpush1.msra.mxu1 %v488_v49 }
  0x27   : > { %716 = vmatpush3.bf16.msra.mxu0 %v740_v7  ;;  %547 = vmatprep.subr.mxu1 %v766_v0 }
  0x28   : > { %717 = vmatprep.subr.bf16.mxu0 %v766_v0  ;;  %548 = vmatpush1.msra.mxu1 %v487_v50 }
  0x29   : > { %549 = vmatprep.subr.mxu1 %v766_v0 }
  0x2a   : > { %550 = vmatpush1.msra.mxu1 %v486_v51 }
  0x2b   : > { %718 = vmatpush3.bf16.msra.mxu0 %v741_v8  ;;  %551 = vmatprep.subr.mxu1 %v766_v0 }
  0x2c   : > { %429 = vmatprep.subr.bf16.mxu0 %v744_v9  ;;  %552 = vmatpush1.msra.mxu1 %v485_v52 }
  0x2d   : > { %559 = vmatprep.subr.mxu1 %v766_v0 }
  0x2e   : > { %720 = vmatmul.mubr.bf16.vlgmr.msra.gmra.mxu0 %v244_v10  ;;  %688 = vmatpush2.msk.msra.mxu1 %vm517_vm3, %v513_v53 }
  0x2f   : > { %430 = vmatpush1.bf16.msra.mxu0 %v742_v11  ;;  %453 = vmatprep.mubr.bf16.mxu0 %v768_v14 }
  0x30   : > { %431 = vmatprep.subr.bf16.mxu0 %v747_v12  ;;  %561 = vmatprep.subr.mxu1 %v766_v0 }
  0x31   : > { %562 = vmatpush2.msra.mxu1 %v512_v54 }
  0x32   : > { %563 = vmatprep.subr.mxu1 %v766_v0 }
  0x33   : > { %432 = vmatpush1.bf16.msra.mxu0 %v745_v13  ;;  %564 = vmatpush2.msra.mxu1 %v511_v55 }
  0x34   : > { %433 = vmatprep.subr.bf16.mxu0 %v750_v15  ;;  %565 = vmatprep.subr.mxu1 %v766_v0 }
  0x35   : > { %566 = vmatpush2.msra.mxu1 %v510_v56 }
  0x36   : > { %567 = vmatprep.subr.mxu1 %v766_v0 }
  0x37   : > { %434 = vmatpush1.bf16.msra.mxu0 %v748_v16  ;;  %568 = vmatpush2.msra.mxu1 %v509_v57 }
  0x38   : > { %435 = vmatprep.subr.bf16.mxu0 %v753_v17  ;;  %569 = vmatprep.subr.mxu1 %v766_v0 }
  0x39   : > { %570 = vmatpush2.msra.mxu1 %v508_v58 }
  0x3a   : > { %571 = vmatprep.subr.mxu1 %v766_v0 }
  0x3b   : > { %436 = vmatpush1.bf16.msra.mxu0 %v751_v18  ;;  %572 = vmatpush2.msra.mxu1 %v507_v59 }
  0x3c   : > { %573 = vmatprep.subr.mxu1 %v766_v0 }
  0x3d   : > { %574 = vmatpush2.msra.mxu1 %v506_v60 }
  0x3e   : > { %687 = vmatmul.mubr.msk.bf16.vlgmr.msra.gmra.mxu0 %vm349_vm1, %v369_v19  ;;  %575 = vmatprep.subr.mxu1 %v766_v0 }
  0x3f   : > { %576 = vmatpush2.msra.mxu1 %v505_v61 }
  0x40   : > { %577 = vmatprep.subr.mxu1 %v766_v0 }
  0x41   : > { %578 = vmatpush2.msra.mxu1 %v504_v62 }
  0x42   : > { %579 = vmatprep.subr.mxu1 %v766_v0 }
  0x43   : > { %580 = vmatpush2.msra.mxu1 %v503_v63 }
  0x44   : > { %581 = vmatprep.subr.mxu1 %v766_v0 }
  0x45   : > { %582 = vmatpush2.msra.mxu1 %v502_v1 }
  0x46   : > { %583 = vmatprep.subr.mxu1 %v766_v0 }
  0x47   : > { %584 = vmatpush2.msra.mxu1 %v501_v2 }
  0xee   : > { %v859_v24 = vpop.f32.mrf.mxu0 }
  0xef   : > { %v350_v25 = vsel %vm349_vm1, %v859_v24, 0.0  ;;  %v354_v26 = vmul.f32 %v859_v24, %v859_v24 }
  0xf0   : > { %351 = vadd.xlane.f32.xlu1 %v350_v25  ;;  %v721_v27 = vpop.f32.mrf.mxu0 }
  0xf1   : > { %v355_v28 = vsel %vm349_vm1, %v354_v26, 0.0 }
  0xf2   : > { %v346_v29 = vpop.f32.mrf.mxu0 }
  0xf4   : > { %356 = vadd.xlane.f32.xlu1 %v355_v28  ;;  %v722_v30 = vpop.f32.mrf.mxu0 }
  0xfe   : > { %v877_v34 = vpop.f32.mrf.mxu0 }
  0xff   : > { %v469_v45 = vmul.f32 %v877_v34, %v877_v34 }
 0x100   : > { %v883_v36 = vpop.f32.mrf.mxu0 }
 0x101   : > { %v470_v37 = vmul.f32 %v883_v36, %v883_v36  ;;  %v463_v38 = vsel %vm462_vm2, %v883_v36, 0.0 }
 0x102   : > { %v459_v40 = vpop.f32.mrf.mxu0  ;;  %v464_v41 = vadd.f32 %v463_v38, %v877_v34 }
 0x103   : > { %v471_v42 = vsel %vm462_vm2, %v470_v37, 0.0 }
 0x104   : > { %465 = vadd.xlane.f32.xlu0 %v464_v41  ;;  %v460_v44 = vpop.f32.mrf.mxu0  ;;  %v472_v47 = vadd.f32 %v471_v42, %v469_v45 }
 0x108   : > { %473 = vadd.xlane.f32.xlu0 %v472_v47 }
 0x179   : > { %v352_v0 = vpop.xlane.xlu1 %351 }
 0x17a   : > { %v359_v16 = vmul.f32 0.015625, %v352_v0 }
 0x17c   : > { %v361_v18 = vmul.f32 %v359_v16, %v359_v16  ;;  %v366_v25 = vsub.f32 %v859_v24, %v359_v16 }
 0x17d   : > { %v357_v17 = vpop.xlane.xlu1 %356 }
 0x17e   : > { %v360_v19 = vmul.f32 0.015625, %v357_v17 }
 0x180   : > { %v362_v20 = vsub.f32 %v360_v19, %v361_v18 }
 0x182   : > { %v363_v21 = vmax.f32 %v362_v20, 0.0 }
 0x184   : > { %v364_v22 = vadd.f32 1e-05, %v363_v21 }
 0x18d   : > { %v466_v3 = vpop.xlane.xlu0 %465 }
 0x18e   : > { %v468_v4 = vmul.f32 0.0044444446, %v466_v3 }
 0x190   : > { %v476_v6 = vmul.f32 %v468_v4, %v468_v4  ;;  %v479_v11 = vsub.f32 %v877_v34, %v468_v4  ;;  %v480_v12 = vsub.f32 %v883_v36, %v468_v4 }
 0x191   : > { %v474_v5 = vpop.xlane.xlu0 %473 }
 0x192   : > { %v475_v7 = vmul.f32 0.0044444446, %v474_v5 }
 0x194   : > { %v477_v8 = vsub.f32 %v475_v7, %v476_v6 }
 0x196   : > { %v478_v9 = vmax.f32 %v477_v8, 0.0 }
 0x198   : > { %v481_v10 = vadd.f32 1e-05, %v478_v9 }
 0x19a   : > { %754 = vrsqrt.f32 %v481_v10 }
 0x19b   : > { %756 = vrsqrt.f32 %v364_v22 }
 0x1a7   : > { %v755_v13 = vpop.eup %754 }
 0x1a8   : > { %v484_v14 = vmul.f32 %v755_v13, %v480_v12  ;;  %v483_v15 = vmul.f32 %v755_v13, %v479_v11  ;;  %v757_v23 = vpop.eup %756 }
 0x1a9   : > { %v367_v26 = vmul.f32 %v757_v23, %v366_v25 }
 0x1aa   : > { %689 = vmatprep.mubr.msk.f32.mxu1 %vm462_vm2, %v484_v14 }
 0x1ab   : > { %586 = vmatmul.mubr.f32.vlgmr.msra.gmra.mxu1 %v483_v15  ;;  %v368_v28 = vmax.f32 %v367_v26, 0.0 }
 0x26b   : > { %v587_v27 = vpop.f32.mrf.mxu1 }
 0x26c   : > { %v591_v29 = vmax.f32 %v587_v27, 0.0 }
 0x26d   : > { %v589_v30 = vpop.f32.mrf.mxu1 }
 0x26e   : > { %v592_v31 = vmul.f32 %v591_v29, %v368_v28 }
 0x270   : > { %v593_v32 = vpack.c.bf16 %v592_v31, %v592_v31 }
 0x272   : > { %595 = vst.msk [vmem:[%s242_s23] sm:$0xf] %vm594_vm4, %v593_v32 }
 0x273 PF: > { %s15_s18 = sadd.s32 1, %s764_s18  }
 0x274   : > { %p12_p4 = scmp.ge.s32.totalorder %s15_s18, 4  }
 0x276   :  { %14 = sbr.rel (!%p12_p4) target bundleno = 1 (0x1), region = 73 }

// kernel: forward.8
= control target key start
LH: loop header
LB: loop body
LE: loop exit
PB: predicated region body
PF: predicated region fallthrough
CT: control target
= control target key end

     0   :  { %s893_s18 = smov 0   ;;  %s1104_s0 = inlined_call_operand.vmem [shape: bf16[2,1,128,16], index: 0, kind: input, shape index: {}]   ;;  %s1105_s1 = inlined_call_operand.vmem [shape: bf16[1,16,128], index: 1, kind: input, shape index: {}]   ;;  %s1106_s2 = inlined_call_operand.vmem [shape: bf16[2,64,225], index: 2, kind: input, shape index: {}]   ;;  %s1107_s3 = inlined_call_operand.vmem [shape: bf16[16,64], index: 3, kind: input, shape index: {}]   ;;  %s1108_s4 = inlined_call_operand.vmem [shape: f32[225,16], index: 4, kind: input, shape index: {}]   ;;  %s1109_s5 = inlined_call_operand.vmem [shape: bf16[2,16,16], index: 5, kind: output, shape index: {}]  }
   0x1 LB: > { %s740_s19 = sadd.s32 4294967295, %s858_s18   ;;  %p744_p0 = scmp.ge.s32.totalorder %s858_s18, 1  ;;  %s858_s18 = sphi %s893_s18, %s15_s18  }
   0x2   : > { %p197_p1 = scmp.lt.s32.totalorder %s858_s18, 3 }
   0x4   : > { %p198_p2 = pnand %p744_p0, %p197_p1 }
   0x5   : > { %p230_p3 = scmp.lt.s32.totalorder (!%p198_p2), %s740_s19, 1 }
   0x6   : > { %201 = sbr.rel (%p198_p2) target bundleno = 631 (0x277), region = 40 }
   0xb   : > { %v860_v0 = vmov 0.0   ;;  %vm861_vm0 = vmmov 0   ;;  %s1111_s19 = smov (!%p230_p3, %s740_s19), 1  ;;  %v830_v10 = vld [vmem:[%s1105_s1] sm:$0xff]   ;;  %v862_v14 = vmov 0   ;;  %vm453_vm1 = vcmask 523264  }
   0xc   : > { %791 = vmatprep.subr.bf16.mxu0 %v860_v0  ;;  %807 = vmatprep.mubr.msk.bf16.mxu0 %vm861_vm0, %v860_v0  ;;  %s777_s20 = sshll.u32 %s1111_s19, 6  ;;  %v843_v19 = vld [vmem:[%s1107_s3] sm:$0xff]   ;;  %v559_v20 = vld [vmem:[%s1108_s4 + $0x78] sm:$0xff]  ;;  %v558_v21 = vld [vmem:[%s1108_s4 + $0x70] sm:$0xff]  ;;  %vm500_vm2 = vcmask 793600   ;;  %vm359_vm3 = vcmask 130048  }
   0xd   : > { %583 = vmatprep.subr.mxu1 %v860_v0  ;;  %s234_s23 = scalar_lea.vmem %s1104_s0, %s777_s20  ;;  %s915_s26 = scalar_lea.vmem %s1106_s2, %s777_s20  ;;  %v557_v22 = vld [vmem:[%s1108_s4 + $0x68] sm:$0xff]  ;;  %v556_v23 = vld [vmem:[%s1108_s4 + $0x60] sm:$0xff]  ;;  %v555_v24 = vld [vmem:[%s1108_s4 + $0x58] sm:$0xff]  ;;  %vm579_vm4 = vcmask 1040384   ;;  %vm670_vm5 = vcmask 125952  }
   0xe   : > { %v822_v1 = vld [vmem:[%s234_s23 + $0x38] sm:$0xff]   ;;  %v823_v2 = vld [vmem:[%s234_s23 + $0x30] sm:$0xff]   ;;  %v824_v3 = vld [vmem:[%s234_s23 + $0x28] sm:$0xff]   ;;  %584 = vmatpush1.msra.mxu1 %v559_v20  ;;  %s779_s20 = sshll.u32 %s1111_s19, 3 }
   0xf   : > { %792 = vmatpush3.bf16.msra.mxu0 %v822_v1  ;;  %v825_v4 = vld [vmem:[%s234_s23 + $0x20] sm:$0xff]   ;;  %v826_v5 = vld [vmem:[%s234_s23 + $0x18] sm:$0xff]   ;;  %v827_v6 = vld [vmem:[%s234_s23 + $0x10] sm:$0xff]   ;;  %585 = vmatprep.subr.mxu1 %v860_v0 }
  0x10   : > { %793 = vmatprep.subr.bf16.mxu0 %v860_v0  ;;  %v828_v7 = vld [vmem:[%s234_s23 + $0x8] sm:$0xff]   ;;  %v829_v8 = vld [vmem:[%s234_s23] sm:$0xff]   ;;  %v833_v9 = vld [vmem:[%s915_s26 + $0x34] ss:$8 sps:$4 sm:$0xff]   ;;  %586 = vmatpush1.msra.mxu1 %v558_v21  ;;  %s244_s23 = scalar_lea.vmem %s1109_s5, %s779_s20 }
  0x11   : > { %v831_v11 = vld [vmem:[%s915_s26 + $0x30] ss:$8 sps:$4 sm:$0xff]   ;;  %v836_v12 = vld [vmem:[%s915_s26 + $0x24] ss:$8 sps:$4 sm:$0xff]   ;;  %v834_v13 = vld [vmem:[%s915_s26 + $0x20] ss:$8 sps:$4 sm:$0xff]   ;;  %587 = vmatprep.subr.mxu1 %v860_v0 }
  0x12   : > { %v839_v15 = vld [vmem:[%s915_s26 + $0x14] ss:$8 sps:$4 sm:$0xff]   ;;  %v837_v16 = vld [vmem:[%s915_s26 + $0x10] ss:$8 sps:$4 sm:$0xff]   ;;  %v842_v17 = vld [vmem:[%s915_s26 + $0x4] ss:$8 sps:$4 sm:$0xff]   ;;  %588 = vmatpush1.msra.mxu1 %v557_v22 }
  0x13   : > { %794 = vmatpush3.bf16.msra.mxu0 %v823_v2  ;;  %v840_v18 = vld [vmem:[%s915_s26] ss:$8 sps:$4 sm:$0xff]   ;;  %589 = vmatprep.subr.mxu1 %v860_v0  ;;  %v554_v25 = vld [vmem:[%s1108_s4 + $0x50] sm:$0xff]  ;;  %v551_v28 = vld [vmem:[%s1108_s4 + $0x38] sm:$0xff] }
  0x14   : > { %795 = vmatprep.subr.bf16.mxu0 %v860_v0  ;;  %590 = vmatpush1.msra.mxu1 %v556_v23  ;;  %v553_v26 = vld [vmem:[%s1108_s4 + $0x48] sm:$0xff]  ;;  %v552_v27 = vld [vmem:[%s1108_s4 + $0x40] sm:$0xff]  ;;  %v550_v29 = vld [vmem:[%s1108_s4 + $0x30] sm:$0xff] }
  0x15   : > { %591 = vmatprep.subr.mxu1 %v860_v0  ;;  %v549_v30 = vld [vmem:[%s1108_s4 + $0x28] sm:$0xff]  ;;  %v548_v31 = vld [vmem:[%s1108_s4 + $0x20] sm:$0xff]  ;;  %v547_v32 = vld [vmem:[%s1108_s4 + $0x18] sm:$0xff] }
  0x16   : > { %592 = vmatpush1.msra.mxu1 %v555_v24  ;;  %v546_v33 = vld [vmem:[%s1108_s4 + $0x10] sm:$0xff]  ;;  %v545_v56 = vld [vmem:[%s1108_s4 + $0x8] sm:$0xff]  ;;  %v544_v60 = vld [vmem:[%s1108_s4] sm:$0xff] }
  0x17   : > { %796 = vmatpush3.bf16.msra.mxu0 %v824_v3  ;;  %593 = vmatprep.subr.mxu1 %v860_v0  ;;  %v572_v61 = vld [vmem:[%s1108_s4 + $0xe0] sm:$0x1]  ;;  %v571_v63 = vld [vmem:[%s1108_s4 + $0xd8] sm:$0xff]  ;;  %v570_v1 = vld [vmem:[%s1108_s4 + $0xd0] sm:$0xff] }
  0x18   : > { %797 = vmatprep.subr.bf16.mxu0 %v860_v0  ;;  %594 = vmatpush1.msra.mxu1 %v554_v25  ;;  %v569_v2 = vld [vmem:[%s1108_s4 + $0xc8] sm:$0xff]  ;;  %v568_v3 = vld [vmem:[%s1108_s4 + $0xc0] sm:$0xff] }
  0x19   : > { %595 = vmatprep.subr.mxu1 %v860_v0 }
  0x1a   : > { %596 = vmatpush1.msra.mxu1 %v553_v26 }
  0x1b   : > { %798 = vmatpush3.bf16.msra.mxu0 %v825_v4  ;;  %597 = vmatprep.subr.mxu1 %v860_v0  ;;  %v567_v4 = vld [vmem:[%s1108_s4 + $0xb8] sm:$0xff] }
  0x1c   : > { %799 = vmatprep.subr.bf16.mxu0 %v860_v0  ;;  %598 = vmatpush1.msra.mxu1 %v552_v27 }
  0x1d   : > { %599 = vmatprep.subr.mxu1 %v860_v0 }
  0x1e   : > { %600 = vmatpush1.msra.mxu1 %v551_v28 }
  0x1f   : > { %800 = vmatpush3.bf16.msra.mxu0 %v826_v5  ;;  %601 = vmatprep.subr.mxu1 %v860_v0  ;;  %v566_v5 = vld [vmem:[%s1108_s4 + $0xb0] sm:$0xff] }
  0x20   : > { %801 = vmatprep.subr.bf16.mxu0 %v860_v0  ;;  %602 = vmatpush1.msra.mxu1 %v550_v29 }
  0x21   : > { %603 = vmatprep.subr.mxu1 %v860_v0 }
  0x22   : > { %604 = vmatpush1.msra.mxu1 %v549_v30 }
  0x23   : > { %802 = vmatpush3.bf16.msra.mxu0 %v827_v6  ;;  %605 = vmatprep.subr.mxu1 %v860_v0  ;;  %v565_v6 = vld [vmem:[%s1108_s4 + $0xa8] sm:$0xff] }
  0x24   : > { %803 = vmatprep.subr.bf16.mxu0 %v860_v0  ;;  %606 = vmatpush1.msra.mxu1 %v548_v31 }
  0x25   : > { %607 = vmatprep.subr.mxu1 %v860_v0 }
  0x26   : > { %608 = vmatpush1.msra.mxu1 %v547_v32 }
  0x27   : > { %804 = vmatpush3.bf16.msra.mxu0 %v828_v7  ;;  %609 = vmatprep.subr.mxu1 %v860_v0  ;;  %v564_v7 = vld [vmem:[%s1108_s4 + $0xa0] sm:$0xff] }
  0x28   : > { %805 = vmatprep.subr.bf16.mxu0 %v860_v0  ;;  %610 = vmatpush1.msra.mxu1 %v546_v33 }
  0x29   : > { %611 = vmatprep.subr.mxu1 %v860_v0 }
  0x2a   : > { %612 = vmatpush1.msra.mxu1 %v545_v56 }
  0x2b   : > { %806 = vmatpush3.bf16.msra.mxu0 %v829_v8  ;;  %613 = vmatprep.subr.mxu1 %v860_v0  ;;  %v563_v8 = vld [vmem:[%s1108_s4 + $0x98] sm:$0xff] }
  0x2c   : > { %465 = vmatprep.subr.bf16.mxu0 %v833_v9  ;;  %614 = vmatpush1.msra.mxu1 %v544_v60  ;;  %v562_v9 = vld [vmem:[%s1108_s4 + $0x90] sm:$0xff] }
  0x2d   : > { %621 = vmatprep.subr.mxu1 %v860_v0 }
  0x2e   : > { %808 = vmatmul.mubr.bf16.vlgmr.msra.gmra.mxu0 %v830_v10  ;;  %770 = vmatpush2.msk.msra.mxu1 %vm579_vm4, %v572_v61  ;;  %v561_v10 = vld [vmem:[%s1108_s4 + $0x88] sm:$0xff] }
  0x2f   : > { %466 = vmatpush1.bf16.msra.mxu0 %v831_v11  ;;  %489 = vmatprep.mubr.bf16.mxu0 %v862_v14  ;;  %v560_v11 = vld [vmem:[%s1108_s4 + $0x80] sm:$0xff] }
  0x30   : > { %467 = vmatprep.subr.bf16.mxu0 %v836_v12  ;;  %623 = vmatprep.subr.mxu1 %v860_v0 }
  0x31   : > { %624 = vmatpush2.msra.mxu1 %v571_v63 }
  0x32   : > { %625 = vmatprep.subr.mxu1 %v860_v0 }
  0x33   : > { %468 = vmatpush1.bf16.msra.mxu0 %v834_v13  ;;  %626 = vmatpush2.msra.mxu1 %v570_v1 }
  0x34   : > { %469 = vmatprep.subr.bf16.mxu0 %v839_v15  ;;  %627 = vmatprep.subr.mxu1 %v860_v0 }
  0x35   : > { %628 = vmatpush2.msra.mxu1 %v569_v2 }
  0x36   : > { %629 = vmatprep.subr.mxu1 %v860_v0 }
  0x37   : > { %470 = vmatpush1.bf16.msra.mxu0 %v837_v16  ;;  %630 = vmatpush2.msra.mxu1 %v568_v3 }
  0x38   : > { %471 = vmatprep.subr.bf16.mxu0 %v842_v17  ;;  %631 = vmatprep.subr.mxu1 %v860_v0 }
  0x39   : > { %632 = vmatpush2.msra.mxu1 %v567_v4 }
  0x3a   : > { %633 = vmatprep.subr.mxu1 %v860_v0 }
  0x3b   : > { %472 = vmatpush1.bf16.msra.mxu0 %v840_v18  ;;  %634 = vmatpush2.msra.mxu1 %v566_v5 }
  0x3c   : > { %635 = vmatprep.subr.mxu1 %v860_v0 }
  0x3d   : > { %636 = vmatpush2.msra.mxu1 %v565_v6 }
  0x3e   : > { %769 = vmatmul.mubr.msk.bf16.vlgmr.msra.gmra.mxu0 %vm453_vm1, %v843_v19  ;;  %637 = vmatprep.subr.mxu1 %v860_v0 }
  0x3f   : > { %638 = vmatpush2.msra.mxu1 %v564_v7 }
  0x40   : > { %639 = vmatprep.subr.mxu1 %v860_v0 }
  0x41   : > { %640 = vmatpush2.msra.mxu1 %v563_v8 }
  0x42   : > { %641 = vmatprep.subr.mxu1 %v860_v0 }
  0x43   : > { %642 = vmatpush2.msra.mxu1 %v562_v9 }
  0x44   : > { %643 = vmatprep.subr.mxu1 %v860_v0 }
  0x45   : > { %644 = vmatpush2.msra.mxu1 %v561_v10 }
  0x46   : > { %645 = vmatprep.subr.mxu1 %v860_v0 }
  0x47   : > { %646 = vmatpush2.msra.mxu1 %v560_v11 }
  0xee   : > { %v992_v34 = vpop.f32.mrf.mxu0 }
  0xef   : > { %v360_v54 = vsel %vm359_vm3, %v992_v34, 0.0  ;;  %v368_v55 = vmul.f32 %v992_v34, %v992_v34 }
  0xf0   : > { %v809_v35 = vpop.f32.mrf.mxu0 }
  0xf1   : > { %v370_v57 = vsel %vm359_vm3, %v368_v55, 0.0 }
  0xf2   : > { %v994_v36 = vpop.f32.mrf.mxu0 }
  0xf3   : > { %v363_v58 = vsel %vm359_vm3, %v994_v36, 0.0  ;;  %v369_v59 = vmul.f32 %v994_v36, %v994_v36 }
  0xf4   : > { %v810_v37 = vpop.f32.mrf.mxu0 }
  0xf5   : > { %v373_v62 = vsel %vm359_vm3, %v369_v59, 0.0 }
  0xfe   : > { %v996_v38 = vpop.f32.mrf.mxu0 }
  0xff   : > { %v512_v46 = vmul.f32 %v996_v38, %v996_v38 }
 0x100   : > { %v998_v39 = vpop.f32.mrf.mxu0 }
 0x101   : > { %v513_v40 = vmul.f32 %v998_v39, %v998_v39  ;;  %v501_v41 = vsel %vm500_vm2, %v998_v39, 0.0 }
 0x102   : > { %v1004_v42 = vpop.f32.mrf.mxu0  ;;  %v502_v43 = vadd.f32 %v501_v41, %v996_v38 }
 0x103   : > { %v516_v44 = vsel %vm500_vm2, %v513_v40, 0.0  ;;  %v514_v52 = vmul.f32 %v1004_v42, %v1004_v42 }
 0x104   : > { %503 = vadd.xlane.f32.xlu0 %v502_v43  ;;  %v1008_v45 = vpop.f32.mrf.mxu0  ;;  %v517_v49 = vadd.f32 %v516_v44, %v512_v46 }
 0x105   : > { %v515_v47 = vmul.f32 %v1008_v45, %v1008_v45  ;;  %v505_v48 = vsel %vm500_vm2, %v1008_v45, 0.0 }
 0x106   : > { %v506_v50 = vadd.f32 %v505_v48, %v1004_v42 }
 0x107   : > { %v520_v51 = vsel %vm500_vm2, %v515_v47, 0.0 }
 0x108   : > { %518 = vadd.xlane.f32.xlu0 %v517_v49  ;;  %507 = vadd.xlane.f32.xlu1 %v506_v50  ;;  %v521_v53 = vadd.f32 %v520_v51, %v514_v52 }
 0x10c   : > { %361 = vadd.xlane.f32.xlu0 %v360_v54  ;;  %522 = vadd.xlane.f32.xlu1 %v521_v53 }
 0x110   : > { %371 = vadd.xlane.f32.xlu0 %v370_v57  ;;  %364 = vadd.xlane.f32.xlu1 %v363_v58 }
 0x114   : > { %374 = vadd.xlane.f32.xlu1 %v373_v62 }
 0x18d   : > { %v504_v12 = vpop.xlane.xlu0 %503 }
 0x18e   : > { %v510_v13 = vmul.f32 0.0044444446, %v504_v12 }
 0x190   : > { %v526_v16 = vmul.f32 %v510_v13, %v510_v13  ;;  %v532_v0 = vsub.f32 %v996_v38, %v510_v13  ;;  %v533_v28 = vsub.f32 %v998_v39, %v510_v13 }
 0x191   : > { %v519_v14 = vpop.xlane.xlu0 %518  ;;  %v508_v15 = vpop.xlane.xlu1 %507 }
 0x192   : > { %v524_v17 = vmul.f32 0.0044444446, %v519_v14  ;;  %v511_v18 = vmul.f32 0.0044444446, %v508_v15 }
 0x194   : > { %v528_v19 = vsub.f32 %v524_v17, %v526_v16  ;;  %v527_v22 = vmul.f32 %v511_v18, %v511_v18  ;;  %v534_v32 = vsub.f32 %v1004_v42, %v511_v18  ;;  %v535_v33 = vsub.f32 %v1008_v45, %v511_v18 }
 0x195   : > { %v523_v20 = vpop.xlane.xlu1 %522  ;;  %v362_v41 = vpop.xlane.xlu0 %361 }
 0x196   : > { %v530_v21 = vmax.f32 %v528_v19, 0.0  ;;  %v525_v23 = vmul.f32 0.0044444446, %v523_v20  ;;  %v378_v39 = vmul.f32 0.0625, %v362_v41 }
 0x198   : > { %v536_v24 = vadd.f32 1e-05, %v530_v21  ;;  %v529_v25 = vsub.f32 %v525_v23, %v527_v22  ;;  %v382_v47 = vmul.f32 %v378_v39, %v378_v39  ;;  %v392_v56 = vsub.f32 %v992_v34, %v378_v39 }
 0x199   : > { %v365_v38 = vpop.xlane.xlu1 %364  ;;  %v372_v43 = vpop.xlane.xlu0 %371 }
 0x19a   : > { %844 = vrsqrt.f32 %v536_v24  ;;  %v531_v26 = vmax.f32 %v529_v25, 0.0  ;;  %v380_v44 = vmul.f32 0.0625, %v372_v43  ;;  %v379_v48 = vmul.f32 0.0625, %v365_v38 }
 0x19c   : > { %v537_v27 = vadd.f32 1e-05, %v531_v26  ;;  %v384_v42 = vsub.f32 %v380_v44, %v382_v47  ;;  %v383_v49 = vmul.f32 %v379_v48, %v379_v48  ;;  %v393_v59 = vsub.f32 %v994_v36, %v379_v48 }
 0x19d   : > { %v375_v46 = vpop.xlane.xlu1 %374 }
 0x19e   : > { %846 = vrsqrt.f32 %v537_v27  ;;  %v381_v45 = vmul.f32 0.0625, %v375_v46  ;;  %v386_v50 = vmax.f32 %v384_v42, 0.0 }
 0x1a0   : > { %v385_v51 = vsub.f32 %v381_v45, %v383_v49  ;;  %v388_v52 = vadd.f32 1e-05, %v386_v50 }
 0x1a2   : > { %v387_v53 = vmax.f32 %v385_v51, 0.0  ;;  %848 = vrsqrt.f32 %v388_v52 }
 0x1a4   : > { %v389_v54 = vadd.f32 1e-05, %v387_v53 }
 0x1a6   : > { %850 = vrsqrt.f32 %v389_v54 }
 0x1a7   : > { %v845_v29 = vpop.eup %844 }
 0x1a8   : > { %v541_v30 = vmul.f32 %v845_v29, %v533_v28  ;;  %v540_v31 = vmul.f32 %v845_v29, %v532_v0 }
 0x1aa   : > { %771 = vmatprep.mubr.msk.f32.mxu1 %vm500_vm2, %v541_v30 }
 0x1ab   : > { %v847_v35 = vpop.eup %846  ;;  %648 = vmatmul.mubr.f32.vlgmr.msra.gmra.mxu1 %v540_v31 }
 0x1ac   : > { %v543_v37 = vmul.f32 %v847_v35, %v535_v33  ;;  %v542_v40 = vmul.f32 %v847_v35, %v534_v32 }
 0x1ae   : > { %772 = vmatprep.mubr.msk.f32.mxu1 %vm500_vm2, %v543_v37 }
 0x1af   : > { %653 = vmatmul.mubr.f32.gmra.mxu1 %v542_v40  ;;  %v849_v55 = vpop.eup %848 }
 0x1b0   : > { %v394_v57 = vmul.f32 %v849_v55, %v392_v56 }
 0x1b2   : > { %v396_v61 = vmax.f32 %v394_v57, 0.0 }
 0x1b3   : > { %v851_v58 = vpop.eup %850 }
 0x1b4   : > { %v395_v63 = vmul.f32 %v851_v58, %v393_v59 }
 0x1b6   : > { %v397_v5 = vmax.f32 %v395_v63, 0.0 }
 0x26b   : > { %v649_v60 = vpop.f32.mrf.mxu1 }
 0x26c   : > { %v658_v62 = vmax.f32 %v649_v60, 0.0 }
 0x26d   : > { %v651_v1 = vpop.f32.mrf.mxu1 }
 0x26e   : > { %v660_v2 = vmul.f32 %v658_v62, %v396_v61 }
 0x26f   : > { %v654_v3 = vpop.f32.mrf.mxu1 }
 0x270   : > { %v780_v4 = vpack.c.bf16 %v660_v2, %v660_v2  ;;  %v659_v34 = vmax.f32 %v654_v3, 0.0 }
 0x271   : > { %v656_v6 = vpop.f32.mrf.mxu1 }
 0x272   : > { %671 = vst.msk [vmem:[%s244_s23] sm:$0xf] %vm670_vm5, %v780_v4  ;;  %v661_v7 = vmul.f32 %v659_v34, %v397_v5 }
 0x274   : > { %v781_v36 = vpack.c.bf16 %v661_v7, %v661_v7 }
 0x276   : > { %672 = vst.msk [vmem:[%s244_s23 + $0x4] sm:$0xf] %vm670_vm5, %v781_v36 }
 0x277 PF: > { %s15_s18 = sadd.s32 1, %s858_s18  }
 0x278   : > { %p12_p4 = scmp.ge.s32.totalorder %s15_s18, 4  }
 0x27a   :  { %14 = sbr.rel (!%p12_p4) target bundleno = 1 (0x1), region = 73 }

// kernel: forward.9
= control target key start
LH: loop header
LB: loop body
LE: loop exit
PB: predicated region body
PF: predicated region fallthrough
CT: control target
= control target key end

     0   :  { %s1185_s18 = smov 0   ;;  %s1451_s0 = inlined_call_operand.vmem [shape: bf16[2,4,64,16], index: 0, kind: input, shape index: {}]   ;;  %s1452_s1 = inlined_call_operand.vmem [shape: bf16[4,8,64], index: 1, kind: input, shape index: {}]   ;;  %s1453_s2 = inlined_call_operand.vmem [shape: bf16[2,64,225], index: 2, kind: input, shape index: {}]   ;;  %s1454_s3 = inlined_call_operand.vmem [shape: bf16[8,64], index: 3, kind: input, shape index: {}]   ;;  %s1455_s4 = inlined_call_operand.vmem [shape: f32[225,64], index: 4, kind: input, shape index: {}]   ;;  %s1456_s5 = inlined_call_operand.vmem [shape: bf16[2,8,64], index: 5, kind: output, shape index: {}]  }
   0x1 LB: > { %s943_s19 = sadd.s32 4294967295, %s1144_s18   ;;  %p947_p0 = scmp.ge.s32.totalorder %s1144_s18, 1  ;;  %s1144_s18 = sphi %s1185_s18, %s15_s18  }
   0x2   : > { %p197_p1 = scmp.lt.s32.totalorder %s1144_s18, 3 }
   0x4   : > { %p198_p2 = pnand %p947_p0, %p197_p1 }
   0x5   : > { %p229_p3 = scmp.lt.s32.totalorder (!%p198_p2), %s943_s19, 1  ;;  %s1149_s28 = smov (!%p198_p2), 96  }
   0x6   : > { %201 = sbr.rel (%p198_p2) target bundleno = 877 (0x36d), region = 40  ;;  %s1150_s29 = smov (!%p198_p2), 112  }
   0x7   : > { %s1151_s8 = smov (!%p198_p2), 80   ;;  %s1153_s9 = smov (!%p198_p2), 16  }
   0x8   : > { %s1154_s10 = smov (!%p198_p2), 48  }
   0xb   : > { %v1146_v0 = vmov 0.0   ;;  %vm1147_vm0 = vmmov 0   ;;  %s1458_s19 = smov (!%p229_p3, %s943_s19), 1  ;;  %v244_v5 = vld [vmem:[%s1452_s1] sm:$0xf]  ;;  %vm277_vm1 = vcmask 523264  }
   0xc   : > { %1041 = vmatprep.subr.bf16.mxu0 %v1146_v0  ;;  %1049 = vmatprep.mubr.msk.bf16.mxu0 %vm1147_vm0, %v1146_v0  ;;  %s1016_s20 = sshll.u32 %s1458_s19, 7  ;;  %s1017_s24 = sshll.u32 %s1458_s19, 6  ;;  %v958_v14 = vld [vmem:[%s1452_s1 + $0x4] sm:$0xf]  ;;  %v986_v16 = vld [vmem:[%s1452_s1 + $0xc] sm:$0xf] }
   0xd   : > { %1077 = vmatprep.subr.bf16.mxu1 %v1146_v0  ;;  %1085 = vmatprep.mubr.msk.bf16.mxu1 %vm1147_vm0, %v1146_v0  ;;  %s1205_s23 = scalar_lea.vmem %s1451_s0, %s1016_s20  ;;  %s1218_s27 = scalar_lea.vmem %s1453_s2, %s1017_s24  ;;  %v972_v21 = vld [vmem:[%s1452_s1 + $0x8] sm:$0xf]  ;;  %v1148_v25 = vmov 0   ;;  %v611_v30 = vld [vmem:[%s1454_s3] sm:$0xf]  ;;  %vm555_vm2 = vcmask 130048  }
   0xe   : > { %v1106_v1 = vld [vmem:[%s1205_s23 + $0x18] sm:$0xff]   ;;  %v1107_v2 = vld [vmem:[%s1205_s23 + $0x10] sm:$0xff]   ;;  %v1108_v3 = vld [vmem:[%s1205_s23 + $0x8] sm:$0xff]   ;;  %vm704_vm3 = vcmask 793600   ;;  %vm759_vm4 = vcmask 1040384   ;;  %vm849_vm5 = vcmask 125952  }
   0xf   : > { %1042 = vmatpush3.bf16.msra.mxu0 %v1106_v1  ;;  %v1109_v4 = vld [vmem:[%s1205_s23] sm:$0xff]   ;;  %v1110_v6 = vld [vmem:[%s1205_s23 + $0x38] sm:$0xff]   ;;  %v1111_v7 = vld [vmem:[%s1205_s23 + $0x30] sm:$0xff]   ;;  %vm858_vm6 = vcmask 257152   ;;  %vm867_vm7 = vcmask 388352   ;;  %vm876_vm8 = vcmask 519552  }
  0x10   : > { %1043 = vmatprep.subr.bf16.mxu0 %v1146_v0  ;;  %v1130_v8 = vld [vmem:[%s1205_s23 + $0x78] sm:$0xff]   ;;  %v1131_v9 = vld [vmem:[%s1205_s23 + $0x70] sm:$0xff]   ;;  %v1112_v10 = vld [vmem:[%s1205_s23 + $0x28] sm:$0xff]  }
  0x11   : > { %1078 = vmatpush3.bf16.msra.mxu1 %v1130_v8  ;;  %v1132_v11 = vld [vmem:[%s1205_s23 + $0x68] sm:$0xff]   ;;  %v1113_v12 = vld [vmem:[%s1205_s23 + $0x20] sm:$0xff]   ;;  %v1114_v15 = vld [vmem:[%s1205_s23 + $0x58] sm:$0xff]  }
  0x12   : > { %1079 = vmatprep.subr.bf16.mxu1 %v1146_v0  ;;  %v1133_v13 = vld [vmem:[%s1205_s23 + $0x60] sm:$0xff]   ;;  %v1115_v17 = vld [vmem:[%s1205_s23 + $0x50] sm:$0xff]   ;;  %v1116_v18 = vld [vmem:[%s1205_s23 + $0x48] sm:$0xff]  }
  0x13   : > { %1044 = vmatpush3.bf16.msra.mxu0 %v1107_v2  ;;  %v1117_v19 = vld [vmem:[%s1205_s23 + $0x40] sm:$0xff]   ;;  %v1120_v20 = vld [vmem:[%s1218_s27 + $0x34] ss:$8 sps:$4 sm:$0xff]   ;;  %v1118_v22 = vld [vmem:[%s1218_s27 + $0x30] ss:$8 sps:$4 sm:$0xff]  }
  0x14   : > { %1045 = vmatprep.subr.bf16.mxu0 %v1146_v0  ;;  %v1123_v23 = vld [vmem:[%s1218_s27 + $0x24] ss:$8 sps:$4 sm:$0xff]   ;;  %v1121_v24 = vld [vmem:[%s1218_s27 + $0x20] ss:$8 sps:$4 sm:$0xff]   ;;  %v1126_v26 = vld [vmem:[%s1218_s27 + $0x14] ss:$8 sps:$4 sm:$0xff]  }
  0x15   : > { %1080 = vmatpush3.bf16.msra.mxu1 %v1131_v9  ;;  %v1124_v27 = vld [vmem:[%s1218_s27 + $0x10] ss:$8 sps:$4 sm:$0xff]   ;;  %v1129_v28 = vld [vmem:[%s1218_s27 + $0x4] ss:$8 sps:$4 sm:$0xff]   ;;  %v1127_v29 = vld [vmem:[%s1218_s27] ss:$8 sps:$4 sm:$0xff]  }
  0x16   : > { %1081 = vmatprep.subr.bf16.mxu1 %v1146_v0  ;;  %v742_v50 = vld [vmem:[%s1455_s4 + $0x78] sm:$0xff]  ;;  %v741_v51 = vld [vmem:[%s1455_s4 + $0x70] sm:$0xff]  ;;  %v740_v53 = vld [vmem:[%s1455_s4 + $0x68] sm:$0xff]  ;;  %s952_s27 = sshll.u32 %s1458_s19, 2  ;;  %s1152_s19 = smov 32  }
  0x17   : > { %1046 = vmatpush3.bf16.msra.mxu0 %v1108_v3  ;;  %v739_v55 = vld [vmem:[%s1455_s4 + $0x60] sm:$0xff]  ;;  %v738_v57 = vld [vmem:[%s1455_s4 + $0x58] sm:$0xff]  ;;  %v737_v59 = vld [vmem:[%s1455_s4 + $0x50] sm:$0xff]  ;;  %s1442_s7 = scalar_lea.vmem %s1456_s5, %s952_s27 }
  0x18   : > { %1047 = vmatprep.subr.bf16.mxu0 %v1146_v0  ;;  %v736_v60 = vld [vmem:[%s1455_s4 + $0x48] sm:$0xff]  ;;  %v735_v61 = vld [vmem:[%s1455_s4 + $0x40] sm:$0xff]  ;;  %v734_v62 = vld [vmem:[%s1455_s4 + $0x38] sm:$0xff] }
  0x19   : > { %1082 = vmatpush3.bf16.msra.mxu1 %v1132_v11  ;;  %v733_v63 = vld [vmem:[%s1455_s4 + $0x30] sm:$0xff]  ;;  %v732_v2 = vld [vmem:[%s1455_s4 + $0x28] sm:$0xff] }
  0x1a   : > { %1083 = vmatprep.subr.bf16.mxu1 %v1146_v0 }
  0x1b   : > { %1048 = vmatpush3.bf16.msra.mxu0 %v1109_v4 }
  0x1c   : > { %1053 = vmatprep.subr.bf16.mxu0 %v1146_v0 }
  0x1d   : > { %1084 = vmatpush3.bf16.msra.mxu1 %v1133_v13  ;;  %v729_v13 = vld [vmem:[%s1455_s4 + $0x10] sm:$0xff] }
  0x1e   : > { %1050 = vmatmul.mubr.msk.bf16.vlgmr.msra.gmra.mxu0 %vm277_vm1, %v244_v5  ;;  %763 = vmatprep.subr.mxu1 %v1146_v0 }
  0x1f   : > { %1054 = vmatpush3.bf16.msra.mxu0 %v1110_v6  ;;  %1061 = vmatprep.mubr.msk.bf16.mxu0 %vm1147_vm0, %v1146_v0  ;;  %v731_v6 = vld [vmem:[%s1455_s4 + $0x20] sm:$0xff] }
  0x20   : > { %1055 = vmatprep.subr.bf16.mxu0 %v1146_v0  ;;  %1086 = vmatmul.mubr.msk.bf16.vlgmr.msra.gmra.mxu1 %vm277_vm1, %v986_v16 }
  0x21   : > { %764 = vmatpush1.msra.mxu1 %v742_v50 }
  0x22   : > { %765 = vmatprep.subr.mxu1 %v1146_v0 }
  0x23   : > { %1056 = vmatpush3.bf16.msra.mxu0 %v1111_v7  ;;  %766 = vmatpush1.msra.mxu1 %v741_v51 }
  0x24   : > { %1057 = vmatprep.subr.bf16.mxu0 %v1146_v0  ;;  %767 = vmatprep.subr.mxu1 %v1146_v0 }
  0x25   : > { %768 = vmatpush1.msra.mxu1 %v740_v53 }
  0x26   : > { %769 = vmatprep.subr.mxu1 %v1146_v0 }
  0x27   : > { %1058 = vmatpush3.bf16.msra.mxu0 %v1112_v10  ;;  %770 = vmatpush1.msra.mxu1 %v739_v55  ;;  %v730_v10 = vld [vmem:[%s1455_s4 + $0x18] sm:$0xff] }
  0x28   : > { %1059 = vmatprep.subr.bf16.mxu0 %v1146_v0  ;;  %771 = vmatprep.subr.mxu1 %v1146_v0 }
  0x29   : > { %772 = vmatpush1.msra.mxu1 %v738_v57 }
  0x2a   : > { %773 = vmatprep.subr.mxu1 %v1146_v0 }
  0x2b   : > { %1060 = vmatpush3.bf16.msra.mxu0 %v1113_v12  ;;  %774 = vmatpush1.msra.mxu1 %v737_v59 }
  0x2c   : > { %1065 = vmatprep.subr.bf16.mxu0 %v1146_v0  ;;  %775 = vmatprep.subr.mxu1 %v1146_v0 }
  0x2d   : > { %776 = vmatpush1.msra.mxu1 %v736_v60 }
  0x2e   : > { %1062 = vmatmul.mubr.msk.bf16.vlgmr.msra.gmra.mxu0 %vm277_vm1, %v958_v14  ;;  %777 = vmatprep.subr.mxu1 %v1146_v0 }
  0x2f   : > { %1066 = vmatpush3.bf16.msra.mxu0 %v1114_v15  ;;  %1073 = vmatprep.mubr.msk.bf16.mxu0 %vm1147_vm0, %v1146_v0 }
  0x30   : > { %1067 = vmatprep.subr.bf16.mxu0 %v1146_v0  ;;  %778 = vmatpush1.msra.mxu1 %v735_v61 }
  0x31   : > { %779 = vmatprep.subr.mxu1 %v1146_v0 }
  0x32   : > { %780 = vmatpush1.msra.mxu1 %v734_v62 }
  0x33   : > { %1068 = vmatpush3.bf16.msra.mxu0 %v1115_v17  ;;  %781 = vmatprep.subr.mxu1 %v1146_v0  ;;  %v728_v17 = vld [vmem:[%s1455_s4 + $0x8] sm:$0xff] }
  0x34   : > { %1069 = vmatprep.subr.bf16.mxu0 %v1146_v0  ;;  %782 = vmatpush1.msra.mxu1 %v733_v63 }
  0x35   : > { %783 = vmatprep.subr.mxu1 %v1146_v0 }
  0x36   : > { %784 = vmatpush1.msra.mxu1 %v732_v2 }
  0x37   : > { %1070 = vmatpush3.bf16.msra.mxu0 %v1116_v18  ;;  %785 = vmatprep.subr.mxu1 %v1146_v0 }
  0x38   : > { %1071 = vmatprep.subr.bf16.mxu0 %v1146_v0  ;;  %786 = vmatpush1.msra.mxu1 %v731_v6 }
  0x39   : > { %787 = vmatprep.subr.mxu1 %v1146_v0 }
  0x3a   : > { %788 = vmatpush1.msra.mxu1 %v730_v10 }
  0x3b   : > { %1072 = vmatpush3.bf16.msra.mxu0 %v1117_v19  ;;  %789 = vmatprep.subr.mxu1 %v1146_v0 }
  0x3c   : > { %671 = vmatprep.subr.bf16.mxu0 %v1120_v20  ;;  %790 = vmatpush1.msra.mxu1 %v729_v13  ;;  %v727_v20 = vld [vmem:[%s1455_s4] sm:$0xff] }
  0x3d   : > { %791 = vmatprep.subr.mxu1 %v1146_v0 }
  0x3e   : > { %1074 = vmatmul.mubr.msk.bf16.vlgmr.msra.gmra.mxu0 %vm277_vm1, %v972_v21  ;;  %792 = vmatpush1.msra.mxu1 %v728_v17  ;;  %v755_v21 = vld [vmem:[%s1455_s4 + $0xe0] sm:$0x1] }
  0x3f   : > { %672 = vmatpush1.bf16.msra.mxu0 %v1118_v22  ;;  %695 = vmatprep.mubr.bf16.mxu0 %v1148_v25  ;;  %v752_v25 = vld [vmem:[%s1455_s4 + $0xc8] sm:$0xff] }
  0x40   : > { %673 = vmatprep.subr.bf16.mxu0 %v1123_v23  ;;  %793 = vmatprep.subr.mxu1 %v1146_v0  ;;  %v754_v23 = vld [vmem:[%s1455_s4 + $0xd8] sm:$0xff] }
  0x41   : > { %794 = vmatpush1.msra.mxu1 %v727_v20 }
  0x42   : > { %801 = vmatprep.subr.mxu1 %v1146_v0 }
  0x43   : > { %674 = vmatpush1.bf16.msra.mxu0 %v1121_v24  ;;  %1009 = vmatpush2.msk.msra.mxu1 %vm759_vm4, %v755_v21  ;;  %v753_v24 = vld [vmem:[%s1455_s4 + $0xd0] sm:$0xff] }
  0x44   : > { %675 = vmatprep.subr.bf16.mxu0 %v1126_v26  ;;  %803 = vmatprep.subr.mxu1 %v1146_v0  ;;  %v751_v26 = vld [vmem:[%s1455_s4 + $0xc0] sm:$0xff] }
  0x45   : > { %804 = vmatpush2.msra.mxu1 %v754_v23 }
  0x46   : > { %805 = vmatprep.subr.mxu1 %v1146_v0 }
  0x47   : > { %676 = vmatpush1.bf16.msra.mxu0 %v1124_v27  ;;  %806 = vmatpush2.msra.mxu1 %v753_v24  ;;  %v750_v27 = vld [vmem:[%s1455_s4 + $0xb8] sm:$0xff] }
  0x48   : > { %677 = vmatprep.subr.bf16.mxu0 %v1129_v28  ;;  %807 = vmatprep.subr.mxu1 %v1146_v0  ;;  %v749_v28 = vld [vmem:[%s1455_s4 + $0xb0] sm:$0xff] }
  0x49   : > { %808 = vmatpush2.msra.mxu1 %v752_v25 }
  0x4a   : > { %809 = vmatprep.subr.mxu1 %v1146_v0 }
  0x4b   : > { %678 = vmatpush1.bf16.msra.mxu0 %v1127_v29  ;;  %810 = vmatpush2.msra.mxu1 %v751_v26  ;;  %v748_v29 = vld [vmem:[%s1455_s4 + $0xa8] sm:$0xff] }
  0x4c   : > { %811 = vmatprep.subr.mxu1 %v1146_v0 }
  0x4d   : > { %812 = vmatpush2.msra.mxu1 %v750_v27 }
  0x4e   : > { %1008 = vmatmul.mubr.msk.bf16.vlgmr.msra.gmra.mxu0 %vm277_vm1, %v611_v30  ;;  %813 = vmatprep.subr.mxu1 %v1146_v0  ;;  %v747_v30 = vld [vmem:[%s1455_s4 + $0xa0] sm:$0xff] }
  0x4f   : > { %814 = vmatpush2.msra.mxu1 %v749_v28 }
  0x50   : > { %815 = vmatprep.subr.mxu1 %v1146_v0 }
  0x51   : > { %816 = vmatpush2.msra.mxu1 %v748_v29 }
  0x52   : > { %817 = vmatprep.subr.mxu1 %v1146_v0 }
  0x53   : > { %818 = vmatpush2.msra.mxu1 %v747_v30 }
  0x54   : > { %819 = vmatprep.subr.mxu1 %v1146_v0 }
  0xde   : > { %v1276_v31 = vpop.f32.mrf.mxu0 }
  0xdf   : > { %v556_v32 = vsel %vm555_vm2, %v1276_v31, 0.0  ;;  %v572_v38 = vmul.f32 %v1276_v31, %v1276_v31 }
  0xe0   : > { %v1051_v33 = vpop.f32.mrf.mxu0  ;;  %557 = vadd.xlane.f32.xlu1 %v556_v32  ;;  %v1286_v40 = vpop.f32.mrf.mxu1  ;;  %v746_v32 = vld [vmem:[%s1455_s4 + $0x98] sm:$0xff] }
  0xe1   : > { %v573_v43 = vsel %vm555_vm2, %v572_v38, 0.0  ;;  %v568_v46 = vsel %vm555_vm2, %v1286_v40, 0.0  ;;  %v587_v47 = vmul.f32 %v1286_v40, %v1286_v40  ;;  %820 = vmatpush2.msra.mxu1 %v746_v32  ;;  %v745_v33 = vld [vmem:[%s1455_s4 + $0x90] sm:$0xff] }
  0xe2   : > { %v318_v34 = vpop.f32.mrf.mxu0  ;;  %v1087_v42 = vpop.f32.mrf.mxu1  ;;  %821 = vmatprep.subr.mxu1 %v1146_v0 }
  0xe3   : > { %v588_v49 = vsel %vm555_vm2, %v587_v47, 0.0  ;;  %822 = vmatpush2.msra.mxu1 %v745_v33  ;;  %v744_v34 = vld [vmem:[%s1455_s4 + $0x88] sm:$0xff] }
  0xe4   : > { %v1052_v35 = vpop.f32.mrf.mxu0  ;;  %v552_v45 = vpop.f32.mrf.mxu1  ;;  %823 = vmatprep.subr.mxu1 %v1146_v0 }
  0xe5   : > { %824 = vmatpush2.msra.mxu1 %v744_v34  ;;  %v743_v35 = vld [vmem:[%s1455_s4 + $0x80] sm:$0xff] }
  0xe6   : > { %v1088_v48 = vpop.f32.mrf.mxu1  ;;  %825 = vmatprep.subr.mxu1 %v1146_v0 }
  0xe7   : > { %826 = vmatpush2.msra.mxu1 %v743_v35 }
  0xee   : > { %v1280_v36 = vpop.f32.mrf.mxu0 }
  0xef   : > { %v560_v37 = vsel %vm555_vm2, %v1280_v36, 0.0  ;;  %v577_v16 = vmul.f32 %v1280_v36, %v1280_v36 }
  0xf0   : > { %561 = vadd.xlane.f32.xlu1 %v560_v37  ;;  %v1063_v39 = vpop.f32.mrf.mxu0 }
  0xf1   : > { %v578_v18 = vsel %vm555_vm2, %v577_v16, 0.0 }
  0xf2   : > { %v396_v41 = vpop.f32.mrf.mxu0 }
  0xf4   : > { %574 = vadd.xlane.f32.xlu1 %v573_v43  ;;  %v1064_v44 = vpop.f32.mrf.mxu0 }
  0xf8   : > { %569 = vadd.xlane.f32.xlu1 %v568_v46 }
  0xfc   : > { %589 = vadd.xlane.f32.xlu1 %v588_v49 }
  0xfe   : > { %v1300_v52 = vpop.f32.mrf.mxu0 }
  0xff   : > { %v564_v15 = vsel %vm555_vm2, %v1300_v52, 0.0  ;;  %v582_v19 = vmul.f32 %v1300_v52, %v1300_v52 }
 0x100   : > { %v1075_v54 = vpop.f32.mrf.mxu0 }
 0x101   : > { %v583_v22 = vsel %vm555_vm2, %v582_v19, 0.0 }
 0x102   : > { %v474_v56 = vpop.f32.mrf.mxu0 }
 0x104   : > { %v1076_v58 = vpop.f32.mrf.mxu0 }
 0x10e   : > { %v1334_v1 = vpop.f32.mrf.mxu0 }
 0x10f   : > { %v711_v12 = vmul.f32 %v1334_v1, %v1334_v1 }
 0x110   : > { %v1340_v3 = vpop.f32.mrf.mxu0 }
 0x111   : > { %v712_v4 = vmul.f32 %v1340_v3, %v1340_v3  ;;  %v705_v5 = vsel %vm704_vm3, %v1340_v3, 0.0 }
 0x112   : > { %v701_v7 = vpop.f32.mrf.mxu0  ;;  %v706_v8 = vadd.f32 %v705_v5, %v1334_v1 }
 0x113   : > { %v713_v9 = vsel %vm704_vm3, %v712_v4, 0.0 }
 0x114   : > { %707 = vadd.xlane.f32.xlu0 %v706_v8  ;;  %v702_v11 = vpop.f32.mrf.mxu0  ;;  %v714_v14 = vadd.f32 %v713_v9, %v711_v12 }
 0x118   : > { %715 = vadd.xlane.f32.xlu0 %v714_v14 }
 0x11c   : > { %565 = vadd.xlane.f32.xlu0 %v564_v15 }
 0x120   : > { %579 = vadd.xlane.f32.xlu0 %v578_v18 }
 0x124   : > { %584 = vadd.xlane.f32.xlu0 %v583_v22 }
 0x169   : > { %v558_v37 = vpop.xlane.xlu1 %557 }
 0x179   : > { %v562_v38 = vpop.xlane.xlu1 %561 }
 0x17a   : > { %v563_v46 = vadd.f32 %v562_v38, %v558_v37 }
 0x17d   : > { %v575_v45 = vpop.xlane.xlu1 %574 }
 0x181   : > { %v570_v51 = vpop.xlane.xlu1 %569 }
 0x185   : > { %v590_v57 = vpop.xlane.xlu1 %589 }
 0x19d   : > { %v708_v39 = vpop.xlane.xlu0 %707 }
 0x19e   : > { %v710_v41 = vmul.f32 0.0044444446, %v708_v39 }
 0x1a0   : > { %v718_v43 = vmul.f32 %v710_v41, %v710_v41  ;;  %v721_v2 = vsub.f32 %v1334_v1, %v710_v41  ;;  %v722_v4 = vsub.f32 %v1340_v3, %v710_v41 }
 0x1a1   : > { %v716_v42 = vpop.xlane.xlu0 %715 }
 0x1a2   : > { %v717_v44 = vmul.f32 0.0044444446, %v716_v42 }
 0x1a4   : > { %v719_v47 = vsub.f32 %v717_v44, %v718_v43 }
 0x1a5   : > { %v566_v48 = vpop.xlane.xlu0 %565 }
 0x1a6   : > { %v720_v49 = vmax.f32 %v719_v47, 0.0  ;;  %v567_v50 = vadd.f32 %v566_v48, %v563_v46 }
 0x1a8   : > { %v723_v0 = vadd.f32 1e-05, %v720_v49  ;;  %v571_v54 = vadd.f32 %v570_v51, %v567_v50 }
 0x1a9   : > { %v580_v53 = vpop.xlane.xlu0 %579 }
 0x1aa   : > { %1134 = vrsqrt.f32 %v723_v0  ;;  %v581_v55 = vadd.f32 %v580_v53, %v575_v45  ;;  %v592_v58 = vmul.f32 0.015625, %v571_v54 }
 0x1ac   : > { %v594_v62 = vmul.f32 %v592_v58, %v592_v58  ;;  %v603_v10 = vsub.f32 %v1300_v52, %v592_v58  ;;  %v601_v11 = vsub.f32 %v1280_v36, %v592_v58  ;;  %v605_v12 = vsub.f32 %v1286_v40, %v592_v58 }
 0x1ad   : > { %v585_v56 = vpop.xlane.xlu0 %584  ;;  %v599_v15 = vsub.f32 %v1276_v31, %v592_v58 }
 0x1ae   : > { %v586_v59 = vadd.f32 %v585_v56, %v581_v55 }
 0x1b0   : > { %v591_v60 = vadd.f32 %v590_v57, %v586_v59 }
 0x1b2   : > { %v593_v61 = vmul.f32 0.015625, %v591_v60 }
 0x1b4   : > { %v595_v63 = vsub.f32 %v593_v61, %v594_v62 }
 0x1b6   : > { %v596_v5 = vmax.f32 %v595_v63, 0.0 }
 0x1b7   : > { %v1135_v6 = vpop.eup %1134 }
 0x1b8   : > { %v597_v7 = vadd.f32 1e-05, %v596_v5  ;;  %v726_v8 = vmul.f32 %v1135_v6, %v722_v4  ;;  %v725_v9 = vmul.f32 %v1135_v6, %v721_v2 }
 0x1ba   : > { %1136 = vrsqrt.f32 %v597_v7  ;;  %1010 = vmatprep.mubr.msk.f32.mxu1 %vm704_vm3, %v726_v8 }
 0x1bb   : > { %828 = vmatmul.mubr.f32.vlgmr.msra.gmra.mxu1 %v725_v9 }
 0x1c7   : > { %v1137_v13 = vpop.eup %1136 }
 0x1c8   : > { %v604_v1 = vmul.f32 %v1137_v13, %v603_v10  ;;  %v602_v14 = vmul.f32 %v1137_v13, %v601_v11  ;;  %v606_v3 = vmul.f32 %v1137_v13, %v605_v12  ;;  %v600_v16 = vmul.f32 %v1137_v13, %v599_v15 }
 0x1ca   : > { %v607_v18 = vmax.f32 %v600_v16, 0.0  ;;  %v609_v31 = vmax.f32 %v604_v1, 0.0  ;;  %v608_v40 = vmax.f32 %v602_v14, 0.0  ;;  %v610_v27 = vmax.f32 %v606_v3, 0.0 }
 0x27b   : > { %v829_v17 = vpop.f32.mrf.mxu1 }
 0x27c   : > { %v833_v19 = vmax.f32 %v829_v17, 0.0 }
 0x27d   : > { %v831_v20 = vpop.f32.mrf.mxu1 }
 0x27e   : > { %v834_v21 = vmul.f32 %v833_v19, %v607_v18  ;;  %840 = vrot.lane.b32.xlu1 %v833_v19, %s1149_s28  ;;  %836 = vrot.lane.b32.xlu0 %v833_v19, %s1150_s29 }
 0x280   : > { %v848_v36 = vpack.c.bf16 %v834_v21, %v834_v21 }
 0x282   : > { %844 = vrot.lane.b32.xlu1 %v833_v19, %s1151_s8  ;;  %850 = vst.msk [vmem:[%s1442_s7] sm:$0xf] %vm849_vm5, %v848_v36 }
 0x2f0   : > { %v841_v52 = vpop.permute.xlu1 %840  ;;  %v837_v22 = vpop.permute.xlu0 %836 }
 0x2f1   : > { %v843_v23 = vmul.f32 %v841_v52, %v609_v31  ;;  %v839_v24 = vmul.f32 %v837_v22, %v608_v40 }
 0x2f3   : > { %v1019_v25 = vpack.c.bf16 %v843_v23, %v843_v23  ;;  %v1018_v26 = vpack.c.bf16 %v839_v24, %v839_v24 }
 0x2f4   : > { %v845_v28 = vpop.permute.xlu1 %844 }
 0x2f5   : > { %v847_v29 = vmul.f32 %v845_v28, %v610_v27  ;;  %864 = vrot.lane.b32.xlu0 %v1019_v25, %s1152_s19  ;;  %855 = vrot.lane.b32.xlu1 %v1018_v26, %s1153_s9 }
 0x2f7   : > { %v1020_v30 = vpack.c.bf16 %v847_v29, %v847_v29 }
 0x2f9   : > { %873 = vrot.lane.b32.xlu1 %v1020_v30, %s1154_s10 }
 0x367   : > { %v856_v32 = vpop.permute.xlu1 %855  ;;  %v865_v33 = vpop.permute.xlu0 %864 }
 0x368   : > { %859 = vst.msk [vmem:[%s1442_s7] sm:$0xf] %vm858_vm6, %v856_v32 }
 0x369   : > { %868 = vst.msk [vmem:[%s1442_s7] sm:$0xf] %vm867_vm7, %v865_v33 }
 0x36b   : > { %v874_v34 = vpop.permute.xlu1 %873 }
 0x36c   : > { %877 = vst.msk [vmem:[%s1442_s7] sm:$0xf] %vm876_vm8, %v874_v34 }
 0x36d PF: > { %s15_s18 = sadd.s32 1, %s1144_s18  }
 0x36e   : > { %p12_p4 = scmp.ge.s32.totalorder %s15_s18, 4  }
 0x370   :  { %14 = sbr.rel (!%p12_p4) target bundleno = 1 (0x1), region = 79 }

// kernel: forward.10
= control target key start
LH: loop header
LB: loop body
LE: loop exit
PB: predicated region body
PF: predicated region fallthrough
CT: control target
= control target key end

     0   :  { %s1062_s18 = smov 0   ;;  %s1363_s0 = inlined_call_operand.vmem [shape: bf16[2,4,32,64], index: 0, kind: input, shape index: {}]   ;;  %s1364_s1 = inlined_call_operand.vmem [shape: bf16[4,8,32], index: 1, kind: input, shape index: {}]   ;;  %s1365_s2 = inlined_call_operand.vmem [shape: bf16[2,36,256], index: 2, kind: input, shape index: {}]   ;;  %s1366_s3 = inlined_call_operand.vmem [shape: bf16[8,36], index: 3, kind: input, shape index: {}]   ;;  %s1367_s4 = inlined_call_operand.vmem [shape: f32[256,256], index: 4, kind: input, shape index: {}]   ;;  %s1368_s5 = inlined_call_operand.vmem [shape: bf16[2,8,256], index: 5, kind: output, shape index: {}]  }
   0x1 LB: > { %s890_s19 = sadd.s32 4294967295, %s1026_s18   ;;  %p894_p0 = scmp.ge.s32.totalorder %s1026_s18, 1  ;;  %s1026_s18 = sphi %s1062_s18, %s15_s18  }
   0x2   : > { %p197_p1 = scmp.lt.s32.totalorder %s1026_s18, 3 }
   0x4   : > { %p198_p2 = pnand %p894_p0, %p197_p1 }
   0x5   : > { %p230_p3 = scmp.lt.s32.totalorder (!%p198_p2), %s890_s19, 1 }
   0x6   : > { %201 = sbr.rel (%p198_p2) target bundleno = 856 (0x358), region = 40 }
   0xb   : > { %v1028_v0 = vmov 0.0   ;;  %vm1029_vm0 = vmmov 0   ;;  %s1370_s19 = smov (!%p230_p3, %s890_s19), 1  ;;  %v246_v3 = vld [vmem:[%s1364_s1] sm:$0xf]  ;;  %vm263_vm1 = vcmask 261120  }
   0xc   : > { %955 = vmatprep.subr.bf16.mxu0 %v1028_v0  ;;  %959 = vmatprep.mubr.msk.bf16.mxu0 %vm1029_vm0, %v1028_v0  ;;  %s939_s20 = sshll.u32 %s1370_s19, 6  ;;  %s987_s24 = smul.u32 40, %s1370_s19  ;;  %v903_v6 = vld [vmem:[%s1364_s1 + $0x4] sm:$0xf]  ;;  %v911_v9 = vld [vmem:[%s1364_s1 + $0x8] sm:$0xf] }
   0xd   : > { %s1077_s23 = scalar_lea.vmem %s1363_s0, %s939_s20  ;;  %vm584_vm2 = vcmask 1041408   ;;  %v919_v15 = vld [vmem:[%s1364_s1 + $0xc] sm:$0xf]  ;;  %v1030_v19 = vmov 0   ;;  %v549_v22 = vld [vmem:[%s1366_s3] sm:$0xf] }
   0xe   : > { %v1000_v1 = vld [vmem:[%s1077_s23 + $0x8] sm:$0xff]   ;;  %v1001_v2 = vld [vmem:[%s1077_s23] sm:$0xff]   ;;  %v1002_v4 = vld [vmem:[%s1077_s23 + $0x18] sm:$0xff]   ;;  %s1089_s29 = scalar_lea.vmem %s1365_s2, %s987_s24  ;;  %vm580_vm3 = vcmask 293888   ;;  %vm493_vm4 = vcmask 523264   ;;  %s940_s28 = sshll.u32 %s1370_s19, 3 }
   0xf   : > { %956 = vmatpush3.bf16.msra.mxu0 %v1000_v1  ;;  %v1003_v5 = vld [vmem:[%s1077_s23 + $0x10] sm:$0xff]   ;;  %v1004_v7 = vld [vmem:[%s1077_s23 + $0x28] sm:$0xff]   ;;  %v1005_v8 = vld [vmem:[%s1077_s23 + $0x20] sm:$0xff]   ;;  %s244_s7 = scalar_lea.vmem %s1368_s5, %s940_s28  ;;  %vm802_vm5 = vcmask 519168   ;;  %vm811_vm6 = vcmask 1043968  }
  0x10   : > { %957 = vmatprep.subr.bf16.mxu0 %v1028_v0  ;;  %v1006_v10 = vld [vmem:[%s1077_s23 + $0x38] sm:$0xff]   ;;  %v554_v11 = vld [vmem:[%s1089_s29 + $0x20] sm:$0x33]  ;;  %v1007_v12 = vld [vmem:[%s1077_s23 + $0x30] sm:$0xff]  }
  0x11   : > { %v932_v13 = vcombine.high %v554_v11, %v554_v11  ;;  %v931_v14 = vcombine.low %v554_v11, %v554_v11  ;;  %v1012_v17 = vld [vmem:[%s1089_s29 + $0x14] ss:$8 sps:$4 sm:$0xff]   ;;  %v1010_v18 = vld [vmem:[%s1089_s29 + $0x10] ss:$8 sps:$4 sm:$0xff]   ;;  %v1015_v20 = vld [vmem:[%s1089_s29 + $0x4] ss:$8 sps:$4 sm:$0xff]  }
  0x12   : > { %v1013_v21 = vld [vmem:[%s1089_s29] ss:$8 sps:$4 sm:$0xff]   ;;  %v683_v32 = vld [vmem:[%s1367_s4 + $0xf8] sm:$0xff]  ;;  %v682_v33 = vld [vmem:[%s1367_s4 + $0xf0] sm:$0xff]  ;;  %s1031_s29 = smov 64  }
  0x13   : > { %958 = vmatpush3.bf16.msra.mxu0 %v1001_v2  ;;  %v586_v16 = vsel %vm584_vm2, %v931_v14, 0  ;;  %v681_v34 = vld [vmem:[%s1367_s4 + $0xe8] sm:$0xff]  ;;  %716 = vmatprep.subr.mxu1 %v683_v32  ;;  %v680_v36 = vld [vmem:[%s1367_s4 + $0xe0] sm:$0xff]  ;;  %v679_v41 = vld [vmem:[%s1367_s4 + $0xd8] sm:$0xff] }
  0x14   : > { %963 = vmatprep.subr.bf16.mxu0 %v1028_v0  ;;  %717 = vmatpush1.msra.mxu1 %v682_v33  ;;  %v678_v43 = vld [vmem:[%s1367_s4 + $0xd0] sm:$0xff]  ;;  %v677_v44 = vld [vmem:[%s1367_s4 + $0xc8] sm:$0xff]  ;;  %v676_v45 = vld [vmem:[%s1367_s4 + $0xc0] sm:$0xff] }
  0x15   : > { %718 = vmatprep.subr.mxu1 %v681_v34  ;;  %v675_v47 = vld [vmem:[%s1367_s4 + $0xb8] sm:$0xff]  ;;  %v674_v48 = vld [vmem:[%s1367_s4 + $0xb0] sm:$0xff]  ;;  %v673_v49 = vld [vmem:[%s1367_s4 + $0xa8] sm:$0xff] }
  0x16   : > { %960 = vmatmul.mubr.msk.bf16.vlgmr.msra.gmra.mxu0 %vm263_vm1, %v246_v3  ;;  %719 = vmatpush1.msra.mxu1 %v680_v36  ;;  %v672_v51 = vld [vmem:[%s1367_s4 + $0xa0] sm:$0xff]  ;;  %v671_v54 = vld [vmem:[%s1367_s4 + $0x98] sm:$0xff]  ;;  %v670_v56 = vld [vmem:[%s1367_s4 + $0x90] sm:$0xff] }
  0x17   : > { %964 = vmatpush3.bf16.msra.mxu0 %v1002_v4  ;;  %967 = vmatprep.mubr.msk.bf16.mxu0 %vm1029_vm0, %v1028_v0  ;;  %v669_v58 = vld [vmem:[%s1367_s4 + $0x88] sm:$0xff]  ;;  %v668_v60 = vld [vmem:[%s1367_s4 + $0x80] sm:$0xff]  ;;  %v667_v61 = vld [vmem:[%s1367_s4 + $0x78] sm:$0xff] }
  0x18   : > { %965 = vmatprep.subr.bf16.mxu0 %v1028_v0  ;;  %720 = vmatprep.subr.mxu1 %v679_v41  ;;  %v666_v63 = vld [vmem:[%s1367_s4 + $0x70] sm:$0xff]  ;;  %v664_v1 = vld [vmem:[%s1367_s4 + $0x60] sm:$0xff]  ;;  %v663_v2 = vld [vmem:[%s1367_s4 + $0x58] sm:$0xff] }
  0x19   : > { %721 = vmatpush1.msra.mxu1 %v678_v43  ;;  %v662_v3 = vld [vmem:[%s1367_s4 + $0x50] sm:$0xff]  ;;  %v661_v4 = vld [vmem:[%s1367_s4 + $0x48] sm:$0xff]  ;;  %v656_v14 = vld [vmem:[%s1367_s4 + $0x20] sm:$0xff] }
  0x1a   : > { %722 = vmatprep.subr.mxu1 %v677_v44  ;;  %v658_v11 = vld [vmem:[%s1367_s4 + $0x30] sm:$0xff]  ;;  %v709_v34 = vld [vmem:[%s1367_s4 + $0x1c8] sm:$0xff]  ;;  %v707_v36 = vld [vmem:[%s1367_s4 + $0x1b8] sm:$0xff] }
  0x1b   : > { %966 = vmatpush3.bf16.msra.mxu0 %v1003_v5  ;;  %723 = vmatpush1.msra.mxu1 %v676_v45  ;;  %v710_v33 = vld [vmem:[%s1367_s4 + $0x1d0] sm:$0xff]  ;;  %v704_v41 = vld [vmem:[%s1367_s4 + $0x1a0] sm:$0xff]  ;;  %v701_v44 = vld [vmem:[%s1367_s4 + $0x188] sm:$0xff] }
  0x1c   : > { %971 = vmatprep.subr.bf16.mxu0 %v1028_v0  ;;  %724 = vmatprep.subr.mxu1 %v675_v47  ;;  %v702_v43 = vld [vmem:[%s1367_s4 + $0x190] sm:$0xff]  ;;  %v700_v45 = vld [vmem:[%s1367_s4 + $0x180] sm:$0xff] }
  0x1d   : > { %725 = vmatpush1.msra.mxu1 %v674_v48  ;;  %v698_v47 = vld [vmem:[%s1367_s4 + $0x170] sm:$0xff]  ;;  %v697_v48 = vld [vmem:[%s1367_s4 + $0x168] sm:$0xff] }
  0x1e   : > { %968 = vmatmul.mubr.msk.bf16.vlgmr.msra.gmra.mxu0 %vm263_vm1, %v903_v6  ;;  %726 = vmatprep.subr.mxu1 %v673_v49  ;;  %v660_v6 = vld [vmem:[%s1367_s4 + $0x40] sm:$0xff] }
  0x1f   : > { %972 = vmatpush3.bf16.msra.mxu0 %v1004_v7  ;;  %975 = vmatprep.mubr.msk.bf16.mxu0 %vm1029_vm0, %v1028_v0  ;;  %v696_v49 = vld [vmem:[%s1367_s4 + $0x160] sm:$0xff] }
  0x20   : > { %973 = vmatprep.subr.bf16.mxu0 %v1028_v0  ;;  %727 = vmatpush1.msra.mxu1 %v672_v51  ;;  %v695_v51 = vld [vmem:[%s1367_s4 + $0x158] sm:$0xff] }
  0x21   : > { %728 = vmatprep.subr.mxu1 %v671_v54  ;;  %v692_v54 = vld [vmem:[%s1367_s4 + $0x140] sm:$0xff] }
  0x22   : > { %729 = vmatpush1.msra.mxu1 %v670_v56  ;;  %v690_v56 = vld [vmem:[%s1367_s4 + $0x130] sm:$0xff] }
  0x23   : > { %974 = vmatpush3.bf16.msra.mxu0 %v1005_v8  ;;  %730 = vmatprep.subr.mxu1 %v669_v58  ;;  %v688_v58 = vld [vmem:[%s1367_s4 + $0x120] sm:$0xff] }
  0x24   : > { %979 = vmatprep.subr.bf16.mxu0 %v1028_v0  ;;  %731 = vmatpush1.msra.mxu1 %v668_v60  ;;  %v686_v60 = vld [vmem:[%s1367_s4 + $0x110] sm:$0xff] }
  0x25   : > { %732 = vmatprep.subr.mxu1 %v667_v61  ;;  %v685_v61 = vld [vmem:[%s1367_s4 + $0x108] sm:$0xff] }
  0x26   : > { %976 = vmatmul.mubr.msk.bf16.vlgmr.msra.gmra.mxu0 %vm263_vm1, %v911_v9  ;;  %733 = vmatpush1.msra.mxu1 %v666_v63 }
  0x27   : > { %980 = vmatpush3.bf16.msra.mxu0 %v1006_v10  ;;  %983 = vmatprep.mubr.msk.bf16.mxu0 %vm1029_vm0, %v1028_v0  ;;  %v659_v10 = vld [vmem:[%s1367_s4 + $0x38] sm:$0xff] }
  0x28   : > { %981 = vmatprep.subr.bf16.mxu0 %v1028_v0  ;;  %v665_v0 = vld [vmem:[%s1367_s4 + $0x68] sm:$0xff] }
  0x29   : > { %734 = vmatprep.subr.mxu1 %v665_v0 }
  0x2a   : > { %735 = vmatpush1.msra.mxu1 %v664_v1 }
  0x2b   : > { %982 = vmatpush3.bf16.msra.mxu0 %v1007_v12  ;;  %736 = vmatprep.subr.mxu1 %v663_v2  ;;  %v657_v12 = vld [vmem:[%s1367_s4 + $0x28] sm:$0xff] }
  0x2c   : > { %933 = vmatprep.subr.msk.bf16.mxu0 %vm584_vm2, %v932_v13  ;;  %737 = vmatpush1.msra.mxu1 %v662_v3 }
  0x2d   : > { %738 = vmatprep.subr.mxu1 %v661_v4 }
  0x2e   : > { %984 = vmatmul.mubr.msk.bf16.vlgmr.msra.gmra.mxu0 %vm263_vm1, %v919_v15  ;;  %739 = vmatpush1.msra.mxu1 %v660_v6 }
  0x2f   : > { %602 = vmatpush1.bf16.msra.mxu0 %v586_v16  ;;  %623 = vmatprep.mubr.bf16.mxu0 %v1030_v19  ;;  %v655_v16 = vld [vmem:[%s1367_s4 + $0x18] sm:$0xff] }
  0x30   : > { %603 = vmatprep.subr.bf16.mxu0 %v1012_v17  ;;  %740 = vmatprep.subr.mxu1 %v659_v10 }
  0x31   : > { %741 = vmatpush1.msra.mxu1 %v658_v11 }
  0x32   : > { %742 = vmatprep.subr.mxu1 %v657_v12 }
  0x33   : > { %604 = vmatpush1.bf16.msra.mxu0 %v1010_v18  ;;  %v654_v18 = vld [vmem:[%s1367_s4 + $0x10] sm:$0xff]  ;;  %743 = vmatpush1.msra.mxu1 %v656_v14 }
  0x34   : > { %605 = vmatprep.subr.bf16.mxu0 %v1015_v20  ;;  %v653_v20 = vld [vmem:[%s1367_s4 + $0x8] sm:$0xff]  ;;  %744 = vmatprep.subr.mxu1 %v655_v16 }
  0x35   : > { %745 = vmatpush1.msra.mxu1 %v654_v18 }
  0x36   : > { %746 = vmatprep.subr.mxu1 %v653_v20 }
  0x37   : > { %606 = vmatpush1.bf16.msra.mxu0 %v1013_v21  ;;  %v652_v21 = vld [vmem:[%s1367_s4] sm:$0xff] }
  0x38   : > { %747 = vmatpush1.msra.mxu1 %v652_v21 }
  0x3a   : > { %934 = vmatmul.mubr.msk.bf16.vlgmr.msra.gmra.mxu0 %vm580_vm3, %v549_v22  ;;  %v715_v22 = vld [vmem:[%s1367_s4 + $0x1f8] sm:$0xff] }
  0x3b   : > { %748 = vmatprep.subr.mxu1 %v715_v22 }
  0xd6   : > { %v1120_v23 = vpop.f32.mrf.mxu0 }
  0xd7   : > { %v494_v24 = vsel %vm493_vm4, %v1120_v23, 0.0  ;;  %v510_v30 = vmul.f32 %v1120_v23, %v1120_v23 }
  0xd8   : > { %v961_v25 = vpop.f32.mrf.mxu0  ;;  %495 = vadd.xlane.f32.xlu1 %v494_v24  ;;  %v714_v24 = vld [vmem:[%s1367_s4 + $0x1f0] sm:$0xff] }
  0xd9   : > { %v511_v37 = vsel %vm493_vm4, %v510_v30, 0.0  ;;  %v713_v25 = vld [vmem:[%s1367_s4 + $0x1e8] sm:$0xff]  ;;  %749 = vmatpush2.msra.mxu1 %v714_v24  ;;  %v711_v30 = vld [vmem:[%s1367_s4 + $0x1d8] sm:$0xff] }
  0xda   : > { %v304_v26 = vpop.f32.mrf.mxu0  ;;  %750 = vmatprep.subr.mxu1 %v713_v25 }
  0xdc   : > { %v962_v27 = vpop.f32.mrf.mxu0 }
  0xde   : > { %v1124_v28 = vpop.f32.mrf.mxu0 }
  0xdf   : > { %v498_v29 = vsel %vm493_vm4, %v1124_v28, 0.0  ;;  %v515_v27 = vmul.f32 %v1124_v28, %v1124_v28 }
  0xe0   : > { %499 = vadd.xlane.f32.xlu1 %v498_v29  ;;  %v969_v31 = vpop.f32.mrf.mxu0  ;;  %v712_v29 = vld [vmem:[%s1367_s4 + $0x1e0] sm:$0xff] }
  0xe1   : > { %751 = vmatpush2.msra.mxu1 %v712_v29  ;;  %v516_v31 = vsel %vm493_vm4, %v515_v27, 0.0 }
  0xe2   : > { %v366_v35 = vpop.f32.mrf.mxu0  ;;  %752 = vmatprep.subr.mxu1 %v711_v30 }
  0xe3   : > { %753 = vmatpush2.msra.mxu1 %v710_v33  ;;  %v708_v35 = vld [vmem:[%s1367_s4 + $0x1c0] sm:$0xff] }
  0xe4   : > { %512 = vadd.xlane.f32.xlu1 %v511_v37  ;;  %v970_v38 = vpop.f32.mrf.mxu0  ;;  %754 = vmatprep.subr.mxu1 %v709_v34 }
  0xe5   : > { %755 = vmatpush2.msra.mxu1 %v708_v35  ;;  %v706_v38 = vld [vmem:[%s1367_s4 + $0x1b0] sm:$0xff] }
  0xe6   : > { %v1143_v39 = vpop.f32.mrf.mxu0  ;;  %756 = vmatprep.subr.mxu1 %v707_v36 }
  0xe7   : > { %v502_v26 = vsel %vm493_vm4, %v1143_v39, 0.0  ;;  %v520_v32 = vmul.f32 %v1143_v39, %v1143_v39  ;;  %757 = vmatpush2.msra.mxu1 %v706_v38 }
  0xe8   : > { %v977_v40 = vpop.f32.mrf.mxu0 }
  0xe9   : > { %v521_v37 = vsel %vm493_vm4, %v520_v32, 0.0  ;;  %v705_v40 = vld [vmem:[%s1367_s4 + $0x1a8] sm:$0xff] }
  0xea   : > { %v428_v42 = vpop.f32.mrf.mxu0  ;;  %758 = vmatprep.subr.mxu1 %v705_v40 }
  0xeb   : > { %759 = vmatpush2.msra.mxu1 %v704_v41  ;;  %v703_v42 = vld [vmem:[%s1367_s4 + $0x198] sm:$0xff] }
  0xec   : > { %v978_v46 = vpop.f32.mrf.mxu0  ;;  %760 = vmatprep.subr.mxu1 %v703_v42 }
  0xed   : > { %761 = vmatpush2.msra.mxu1 %v702_v43  ;;  %v699_v46 = vld [vmem:[%s1367_s4 + $0x178] sm:$0xff] }
  0xee   : > { %v1166_v50 = vpop.f32.mrf.mxu0  ;;  %762 = vmatprep.subr.mxu1 %v701_v44 }
  0xef   : > { %v506_v52 = vsel %vm493_vm4, %v1166_v50, 0.0  ;;  %v525_v53 = vmul.f32 %v1166_v50, %v1166_v50  ;;  %763 = vmatpush2.msra.mxu1 %v700_v45 }
  0xf0   : > { %507 = vadd.xlane.f32.xlu1 %v506_v52  ;;  %v985_v55 = vpop.f32.mrf.mxu0  ;;  %764 = vmatprep.subr.mxu1 %v699_v46  ;;  %v694_v52 = vld [vmem:[%s1367_s4 + $0x150] sm:$0xff] }
  0xf1   : > { %v526_v57 = vsel %vm493_vm4, %v525_v53, 0.0  ;;  %765 = vmatpush2.msra.mxu1 %v698_v47  ;;  %v693_v53 = vld [vmem:[%s1367_s4 + $0x148] sm:$0xff]  ;;  %v691_v55 = vld [vmem:[%s1367_s4 + $0x138] sm:$0xff] }
  0xf2   : > { %v490_v59 = vpop.f32.mrf.mxu0  ;;  %766 = vmatprep.subr.mxu1 %v697_v48 }
  0xf3   : > { %767 = vmatpush2.msra.mxu1 %v696_v49  ;;  %v687_v59 = vld [vmem:[%s1367_s4 + $0x118] sm:$0xff] }
  0xf4   : > { %527 = vadd.xlane.f32.xlu1 %v526_v57  ;;  %v986_v62 = vpop.f32.mrf.mxu0  ;;  %768 = vmatprep.subr.mxu1 %v695_v51  ;;  %v689_v57 = vld [vmem:[%s1367_s4 + $0x128] sm:$0xff] }
  0xf5   : > { %769 = vmatpush2.msra.mxu1 %v694_v52  ;;  %v684_v62 = vld [vmem:[%s1367_s4 + $0x100] sm:$0xff] }
  0xf6   : > { %770 = vmatprep.subr.mxu1 %v693_v53 }
  0xf7   : > { %771 = vmatpush2.msra.mxu1 %v692_v54 }
  0xf8   : > { %772 = vmatprep.subr.mxu1 %v691_v55 }
  0xf9   : > { %773 = vmatpush2.msra.mxu1 %v690_v56 }
  0xfa   : > { %v1209_v5 = vpop.f32.mrf.mxu0  ;;  %774 = vmatprep.subr.mxu1 %v689_v57 }
  0xfb   : > { %v637_v15 = vmul.f32 %v1209_v5, %v1209_v5  ;;  %775 = vmatpush2.msra.mxu1 %v688_v58 }
  0xfc   : > { %v1214_v7 = vpop.f32.mrf.mxu0  ;;  %776 = vmatprep.subr.mxu1 %v687_v59 }
  0xfd   : > { %v632_v8 = vadd.f32 %v1214_v7, %v1209_v5  ;;  %v638_v9 = vmul.f32 %v1214_v7, %v1214_v7  ;;  %777 = vmatpush2.msra.mxu1 %v686_v60 }
  0xfe   : > { %v629_v13 = vpop.f32.mrf.mxu0  ;;  %778 = vmatprep.subr.mxu1 %v685_v61 }
  0xff   : > { %633 = vadd.xlane.f32.xlu0 %v632_v8  ;;  %v639_v19 = vadd.f32 %v638_v9, %v637_v15  ;;  %779 = vmatpush2.msra.mxu1 %v684_v62 }
 0x100   : > { %v630_v17 = vpop.f32.mrf.mxu0 }
 0x103   : > { %640 = vadd.xlane.f32.xlu0 %v639_v19 }
 0x107   : > { %503 = vadd.xlane.f32.xlu0 %v502_v26 }
 0x10b   : > { %517 = vadd.xlane.f32.xlu0 %v516_v31 }
 0x10f   : > { %522 = vadd.xlane.f32.xlu0 %v521_v37 }
 0x161   : > { %v496_v63 = vpop.xlane.xlu1 %495 }
 0x169   : > { %v500_v2 = vpop.xlane.xlu1 %499 }
 0x16a   : > { %v501_v8 = vadd.f32 %v500_v2, %v496_v63 }
 0x16d   : > { %v513_v10 = vpop.xlane.xlu1 %512 }
 0x179   : > { %v508_v15 = vpop.xlane.xlu1 %507 }
 0x17d   : > { %v528_v22 = vpop.xlane.xlu1 %527 }
 0x188   : > { %v634_v0 = vpop.xlane.xlu0 %633 }
 0x189   : > { %v636_v1 = vmul.f32 0.00390625, %v634_v0 }
 0x18b   : > { %v643_v4 = vmul.f32 %v636_v1, %v636_v1  ;;  %v646_v29 = vsub.f32 %v1209_v5, %v636_v1  ;;  %v647_v31 = vsub.f32 %v1214_v7, %v636_v1 }
 0x18c   : > { %v641_v3 = vpop.xlane.xlu0 %640 }
 0x18d   : > { %v642_v6 = vmul.f32 0.00390625, %v641_v3 }
 0x18f   : > { %v644_v9 = vsub.f32 %v642_v6, %v643_v4 }
 0x190   : > { %v504_v11 = vpop.xlane.xlu0 %503 }
 0x191   : > { %v645_v12 = vmax.f32 %v644_v9, 0.0  ;;  %v505_v13 = vadd.f32 %v504_v11, %v501_v8 }
 0x193   : > { %v648_v14 = vadd.f32 1e-05, %v645_v12  ;;  %v509_v17 = vadd.f32 %v508_v15, %v505_v13 }
 0x194   : > { %v518_v16 = vpop.xlane.xlu0 %517 }
 0x195   : > { %1016 = vrsqrt.f32 %v648_v14  ;;  %v519_v18 = vadd.f32 %v518_v16, %v513_v10  ;;  %v530_v20 = vmul.f32 0.00390625, %v509_v17 }
 0x197   : > { %v532_v25 = vmul.f32 %v530_v20, %v530_v20  ;;  %v539_v36 = vsub.f32 %v1124_v28, %v530_v20  ;;  %v543_v37 = vsub.f32 %v1166_v50, %v530_v20  ;;  %v537_v5 = vsub.f32 %v1120_v23, %v530_v20 }
 0x198   : > { %v523_v19 = vpop.xlane.xlu0 %522  ;;  %v541_v7 = vsub.f32 %v1143_v39, %v530_v20 }
 0x199   : > { %v524_v21 = vadd.f32 %v523_v19, %v519_v18 }
 0x19b   : > { %v529_v24 = vadd.f32 %v528_v22, %v524_v21 }
 0x19d   : > { %v531_v26 = vmul.f32 0.00390625, %v529_v24 }
 0x19f   : > { %v533_v27 = vsub.f32 %v531_v26, %v532_v25 }
 0x1a1   : > { %v534_v30 = vmax.f32 %v533_v27, 0.0 }
 0x1a2   : > { %v1017_v32 = vpop.eup %1016 }
 0x1a3   : > { %v535_v33 = vadd.f32 1e-05, %v534_v30  ;;  %v651_v34 = vmul.f32 %v1017_v32, %v647_v31  ;;  %v650_v35 = vmul.f32 %v1017_v32, %v646_v29 }
 0x1a5   : > { %1018 = vrsqrt.f32 %v535_v33  ;;  %780 = vmatprep.mubr.f32.mxu1 %v651_v34 }
 0x1a6   : > { %781 = vmatmul.mubr.f32.vlgmr.msra.gmra.mxu1 %v650_v35 }
 0x1b2   : > { %v1019_v38 = vpop.eup %1018 }
 0x1b3   : > { %v540_v40 = vmul.f32 %v1019_v38, %v539_v36  ;;  %v544_v41 = vmul.f32 %v1019_v38, %v543_v37  ;;  %v538_v42 = vmul.f32 %v1019_v38, %v537_v5  ;;  %v542_v43 = vmul.f32 %v1019_v38, %v541_v7 }
 0x1b5   : > { %v545_v45 = vmax.f32 %v538_v42, 0.0  ;;  %v547_v49 = vmax.f32 %v542_v43, 0.0  ;;  %v546_v50 = vmax.f32 %v540_v40, 0.0  ;;  %v548_v54 = vmax.f32 %v544_v41, 0.0 }
 0x266   : > { %v782_v44 = vpop.f32.mrf.mxu1 }
 0x267   : > { %v787_v46 = vmax.f32 %v782_v44, 0.0 }
 0x268   : > { %v784_v47 = vpop.f32.mrf.mxu1 }
 0x269   : > { %v789_v48 = vmul.f32 %v787_v46, %v545_v45  ;;  %v788_v51 = vmax.f32 %v784_v47, 0.0  ;;  %791 = vrot.lane.b32.xlu0 %v787_v46, %s1031_s29 }
 0x26b   : > { %v801_v23 = vpack.c.bf16 %v789_v48, %v789_v48  ;;  %v795_v28 = vmul.f32 %v788_v51, %v547_v49  ;;  %797 = vrot.lane.b32.xlu1 %v788_v51, %s1031_s29 }
 0x26d   : > { %v813_v39 = vpack.c.bf16 %v795_v28, %v795_v28  ;;  %803 = vst.msk [vmem:[%s244_s7] sm:$0xf] %vm802_vm5, %v801_v23 }
 0x26f   : > { %814 = vst.msk [vmem:[%s244_s7 + $0x4] sm:$0xf] %vm802_vm5, %v813_v39 }
 0x2db   : > { %v792_v52 = vpop.permute.xlu0 %791 }
 0x2dc   : > { %v794_v53 = vmul.f32 %v792_v52, %v546_v50 }
 0x2dd   : > { %v798_v55 = vpop.permute.xlu1 %797 }
 0x2de   : > { %v941_v56 = vpack.c.bf16 %v794_v53, %v794_v53  ;;  %v800_v57 = vmul.f32 %v798_v55, %v548_v54 }
 0x2e0   : > { %808 = vrot.lane.b32.xlu1 %v941_v56, %s1031_s29  ;;  %v942_v58 = vpack.c.bf16 %v800_v57, %v800_v57 }
 0x2e4   : > { %819 = vrot.lane.b32.xlu1 %v942_v58, %s1031_s29 }
 0x352   : > { %v809_v59 = vpop.permute.xlu1 %808 }
 0x353   : > { %812 = vst.msk [vmem:[%s244_s7] sm:$0xf] %vm811_vm6, %v809_v59 }
 0x356   : > { %v820_v60 = vpop.permute.xlu1 %819 }
 0x357   : > { %822 = vst.msk [vmem:[%s244_s7 + $0x4] sm:$0xf] %vm811_vm6, %v820_v60 }
 0x358 PF: > { %s15_s18 = sadd.s32 1, %s1026_s18  }
 0x359   : > { %p12_p4 = scmp.ge.s32.totalorder %s15_s18, 4  }
 0x35b   :  { %14 = sbr.rel (!%p12_p4) target bundleno = 1 (0x1), region = 79 }

// kernel: forward.11
= control target key start
LH: loop header
LB: loop body
LE: loop exit
PB: predicated region body
PF: predicated region fallthrough
CT: control target
= control target key end

     0   :  { %s405_s9 = smov 0   ;;  %s429_s0 = inlined_call_operand.vmem [shape: bf16[2,1,72,256], index: 0, kind: input, shape index: {}]   ;;  %s430_s1 = inlined_call_operand.vmem [shape: bf16[1,3,72], index: 1, kind: input, shape index: {}]   ;;  %s431_s2 = inlined_call_operand.vmem [shape: f32[2,3,256], index: 2, kind: output, shape index: {}]  }
   0x1 LB: > { %s324_s10 = sadd.s32 4294967295, %s387_s9   ;;  %p328_p0 = scmp.ge.s32.totalorder %s387_s9, 1  ;;  %s387_s9 = sphi %s405_s9, %s12_s9  }
   0x2   : > { %p112_p1 = scmp.lt.s32.totalorder %s387_s9, 3 }
   0x4   : > { %p113_p2 = pnand %p328_p0, %p112_p1 }
   0x5   : > { %p134_p3 = scmp.lt.s32.totalorder (!%p113_p2), %s324_s10, 1 }
   0x6   : > { %116 = sbr.rel (%p113_p2) target bundleno = 268 (0x10c), region = 28 }
   0xb   : > { %v389_v0 = vmov 0   ;;  %s433_s10 = smov (!%p134_p3, %s324_s10), 1  ;;  %vm204_vm0 = vcmask 1043456   ;;  %v145_v13 = vld [vmem:[%s430_s1] sm:$0x3]  ;;  %vm200_vm1 = vcmask 588800  }
   0xc   : > { %243 = vmatprep.mubr.bf16.mxu0 %v389_v0  ;;  %s349_s11 = smul.u32 72, %s433_s10  ;;  %s348_s17 = sshll.u32 %s433_s10, 3 }
   0xd   : > { %s143_s20 = scalar_lea.vmem %s431_s2, %s348_s17 }
   0xe   : > { %s138_s14 = scalar_lea.vmem %s429_s0, %s349_s11 }
   0xf   : > { %v154_v1 = vld [vmem:[%s138_s14 + $0x40] sm:$0xff]  ;;  %v361_v4 = vld [vmem:[%s138_s14 + $0x34] ss:$8 sps:$4 sm:$0xff]   ;;  %v363_v6 = vld [vmem:[%s138_s14 + $0x30] ss:$8 sps:$4 sm:$0xff]  }
  0x10   : > { %v341_v2 = vcombine.high %v154_v1, %v154_v1  ;;  %v340_v3 = vcombine.low %v154_v1, %v154_v1  ;;  %v364_v7 = vld [vmem:[%s138_s14 + $0x24] ss:$8 sps:$4 sm:$0xff]   ;;  %v366_v8 = vld [vmem:[%s138_s14 + $0x20] ss:$8 sps:$4 sm:$0xff]   ;;  %v367_v9 = vld [vmem:[%s138_s14 + $0x14] ss:$8 sps:$4 sm:$0xff]  }
  0x11   : > { %v369_v10 = vld [vmem:[%s138_s14 + $0x10] ss:$8 sps:$4 sm:$0xff]   ;;  %v370_v11 = vld [vmem:[%s138_s14 + $0x4] ss:$8 sps:$4 sm:$0xff]   ;;  %v372_v12 = vld [vmem:[%s138_s14] ss:$8 sps:$4 sm:$0xff]  }
  0x12   : > { %342 = vmatprep.subr.msk.bf16.mxu0 %vm204_vm0, %v341_v2  ;;  %v206_v5 = vsel %vm204_vm0, %v340_v3, 0 }
  0x13   : > { %218 = vmatpush1.bf16.msra.mxu0 %v206_v5 }
  0x14   : > { %219 = vmatprep.subr.bf16.mxu0 %v361_v4 }
  0x17   : > { %220 = vmatpush1.bf16.msra.mxu0 %v363_v6 }
  0x18   : > { %221 = vmatprep.subr.bf16.mxu0 %v364_v7 }
  0x1b   : > { %222 = vmatpush1.bf16.msra.mxu0 %v366_v8 }
  0x1c   : > { %223 = vmatprep.subr.bf16.mxu0 %v367_v9 }
  0x1f   : > { %224 = vmatpush1.bf16.msra.mxu0 %v369_v10 }
  0x20   : > { %225 = vmatprep.subr.bf16.mxu0 %v370_v11 }
  0x23   : > { %226 = vmatpush1.bf16.msra.mxu0 %v372_v12 }
  0x26   : > { %343 = vmatmul.mubr.msk.bf16.vlgmr.msra.gmra.mxu0 %vm200_vm1, %v145_v13 }
  0xe6   : > { %v245_v14 = vpop.f32.mrf.mxu0 }
  0xe7   : > { %v344_v15 = vmul.f32 -1.442695, %v245_v14 }
  0xe8   : > { %v247_v16 = vpop.f32.mrf.mxu0 }
  0xe9   : > { %373 = vpow2.f32 %v344_v15  ;;  %v345_v17 = vmul.f32 -1.442695, %v247_v16 }
  0xea   : > { %v249_v18 = vpop.f32.mrf.mxu0 }
  0xeb   : > { %375 = vpow2.f32 %v345_v17 }
  0xec   : > { %v250_v19 = vpop.f32.mrf.mxu0 }
  0xf6   : > { %v374_v20 = vpop.eup %373 }
  0xf7   : > { %v258_v21 = vadd.f32 1.0, %v374_v20 }
  0xf8   : > { %v376_v22 = vpop.eup %375 }
  0xf9   : > { %v259_v23 = vadd.f32 1.0, %v376_v22  ;;  %377 = vrcp.f32 %v258_v21 }
  0xfb   : > { %379 = vrcp.f32 %v259_v23 }
 0x106   : > { %v378_v24 = vpop.eup %377 }
 0x108   : > { %v380_v25 = vpop.eup %379 }
 0x109   : > { %v266_v26 = vcombine.low %v378_v24, %v380_v25 }
 0x10b   : > { %268 = vst [vmem:[%s143_s20] sm:$0x77] %v266_v26 }
 0x10c PF: > { %s12_s9 = sadd.s32 1, %s387_s9  }
 0x10d   : > { %p9_p4 = scmp.ge.s32.totalorder %s12_s9, 4  }
 0x10f   :  { %11 = sbr.rel (!%p9_p4) target bundleno = 1 (0x1), region = 58 }

</bundles_post_ra>
